<compile_context>
chip_gen: v6e
topology: v6e:2x2x1
jax: 0.10.0
libtpu: 0.0.40
codegen_flags: <defaults>
</compile_context>

<pallas_src>
import functools

import jax
import jax.numpy as jnp
from jax.experimental import pallas as pl
from jax.experimental.pallas import tpu as pltpu


def _round_up(x, m):
    return (x + m - 1) // m * m


_NUM_LAYERS = 10          # 3 hand + 3 body + 4 head
_SHIFT_W = 512            # widest layer output; shift rows are zero-padded to this


# ---------------------------------------------------------------------------
# Fused whole-network kernel
# ---------------------------------------------------------------------------
def _fused_kernel(hand_x_ref, body_x_ref, shifts_ref,
                  hw0, hw1, hw2,          # hand model (shared by hand1/hand2)
                  bw0, bw1, bw2,          # body model
                  gw0, gw1, gw2, gw3,     # head (gw0 acts on concat(h1|h2|body))
                  out_ref):

    def layer(x, w_ref, idx, relu=True):
        # bf16 x bf16 -> f32 accumulate on the MXU; bias-add (+ReLU) in f32 on VPU.
        n = w_ref.shape[1]
        y = jnp.dot(x.astype(w_ref.dtype), w_ref[...],
                    preferred_element_type=jnp.float32)
        y = y + shifts_ref[idx:idx + 1, :n]
        if relu:
            y = jnp.maximum(y, 0.0)
        return y

    _, tb, _ = hand_x_ref.shape

    # ---- hand branch: stack hand1 / sign-flipped hand2 rows -> run model once ----
    h = jnp.concatenate([hand_x_ref[0], hand_x_ref[1]], axis=0)   # (2*tb, hand_in_p)
    h = layer(h, hw0, 0)
    h = layer(h, hw1, 1)
    h = layer(h, hw2, 2)                                          # (2*tb, 128)

    # ---- body branch ----
    b = body_x_ref[...]
    b = layer(b, bw0, 3)
    b = layer(b, bw1, 4)
    b = layer(b, bw2, 5)                                          # (tb, 128); cols 64: zero

    h1 = h[:tb]                                                   # sublane-aligned slices
    h2 = h[tb:]

    # ---- head: single K=384 matmul on lane-aligned concat (no K-split / adds) ----
    xcat = jnp.concatenate([h1, h2, b], axis=-1)                  # (tb, 384) f32
    y = layer(xcat, gw0, 6)
    y = layer(y, gw1, 7)
    y = layer(y, gw2, 8)
    y = layer(y, gw3, 9, relu=False)                              # final: Linear only

    out_ref[...] = y.astype(out_ref.dtype)


# ---------------------------------------------------------------------------
# Parameter construction (BN folded into weights; padded + bf16-cast once)
# ---------------------------------------------------------------------------
def init_linear_bn(key, in_f, out_f, batch_norm=True):
    kw, kb, kg, kbe, km, kv = jax.random.split(key, 6)
    bound = 1.0 / (in_f ** 0.5)
    W = jax.random.uniform(kw, (in_f, out_f), jnp.float32, -bound, bound)
    b = jax.random.uniform(kb, (out_f,), jnp.float32, -bound, bound)
    if batch_norm:
        eps = 1e-5
        gamma = 1.0 + 0.1 * jax.random.normal(kg, (out_f,), jnp.float32)
        beta = 0.1 * jax.random.normal(kbe, (out_f,), jnp.float32)
        running_mean = 0.1 * jax.random.normal(km, (out_f,), jnp.float32)
        running_var = 1.0 + 0.1 * jax.random.uniform(kv, (out_f,), jnp.float32)
        s = gamma / jnp.sqrt(running_var + eps)
        # ((x@W + b) - mean) * s + beta  ==  x@(W*s) + (b*s - mean*s + beta)
        scale = s
        shift = b * s - running_mean * s + beta
    else:
        scale = jnp.ones((out_f,), jnp.float32)
        shift = b
    return W, scale, shift


def _pad_weight(W, Kp, Np, dtype=jnp.bfloat16):
    K, N = W.shape
    Wp = jnp.zeros((Kp, Np), jnp.float32).at[:K, :N].set(W)
    return Wp.astype(dtype)


def build_params(key, num_classes, keypoints_len, frame_len, dim_no=3):
    hand_size = frame_len * 21 * dim_no
    body_size = frame_len * (keypoints_len - 2 * 21) * dim_no
    keys = jax.random.split(key, 10)

    hand_raw = [
        init_linear_bn(keys[0], hand_size, 512),
        init_linear_bn(keys[1], 512, 256),
        init_linear_bn(keys[2], 256, 128),
    ]
    body_raw = [
        init_linear_bn(keys[3], body_size, 256),
        init_linear_bn(keys[4], 256, 128),
        init_linear_bn(keys[5], 128, 64),
    ]
    head_raw = [
        init_linear_bn(keys[6], 2 * 128 + 64, 512),
        init_linear_bn(keys[7], 512, 512),
        init_linear_bn(keys[8], 512, 256),
        init_linear_bn(keys[9], 256, num_classes, batch_norm=False),
    ]

    all_layers = hand_raw + body_raw + head_raw
    shifts = jnp.zeros((_NUM_LAYERS, _SHIFT_W), jnp.float32)
    weights = []
    for i, (W, scale, shift) in enumerate(all_layers):
        shifts = shifts.at[i, :shift.shape[0]].set(shift)
        Wf = W * scale[None, :]                     # fold BN scale in f32
        K, N = Wf.shape
        if i == 6:
            # Head layer 0: input is concat(h1 | h2 | body64-padded-to-128) = 384
            # lanes, so pad its K from 320 to 384 (rows 320: are zero).
            weights.append(_pad_weight(Wf, 384, 512))
        else:
            weights.append(_pad_weight(Wf, _round_up(K, 128), _round_up(N, 128)))

    return (shifts,) + tuple(weights)


# ---------------------------------------------------------------------------
# LinearSplitModel forward (single fused pallas_call, batch-tiled grid)
# ---------------------------------------------------------------------------
@functools.partial(jax.jit, static_argnums=(2,))
def linear_split_forward(x, flat_params, num_classes):
    """x: (B, frame_len, keypoints_len, dim_no) float32."""
    B, F, K, D = x.shape
    hand_size = F * 21 * D
    body_size = F * (K - 42) * D
    hand_in_p = _round_up(hand_size, 128)
    body_in_p = _round_up(body_size, 128)
    nc_p = _round_up(num_classes, 128)

    # Batch padding (multiple of 16 for bf16 vreg packing) and batch-tile size.
    if B <= 128:
        Bp = max(_round_up(B, 16), 16)
        TB = Bp
    else:
        TB = 128
        Bp = _round_up(B, TB)
    n_tiles = Bp // TB

    # hand1 = x[:, :, -21:, :];  hand2 = x[:, :, -42:-21, :] with x-coord negated.
    sign = jnp.ones((D,), jnp.float32).at[0].set(-1.0)
    hand1 = x[:, :, -21:, :].reshape(B, hand_size)
    hand2 = (x[:, :, -42:-21, :] * sign).reshape(B, hand_size)
    body = x[:, :, :-42, :].reshape(B, body_size)

    # Padded bf16 activation slabs; hand views stacked on a leading axis so each
    # batch tile carries both views.
    hand_x = jnp.zeros((2, Bp, hand_in_p), jnp.float32)
    hand_x = hand_x.at[0, :B, :hand_size].set(hand1)
    hand_x = hand_x.at[1, :B, :hand_size].set(hand2)
    hand_x = hand_x.astype(jnp.bfloat16)
    body_x = (jnp.zeros((Bp, body_in_p), jnp.float32)
              .at[:B, :body_size].set(body).astype(jnp.bfloat16))

    shifts = flat_params[0]
    weights = flat_params[1:]

    in_specs = [
        pl.BlockSpec((2, TB, hand_in_p), lambda i: (0, i, 0)),
        pl.BlockSpec((TB, body_in_p), lambda i: (i, 0)),
        pl.BlockSpec(shifts.shape, lambda i: (0, 0)),
    ] + [pl.BlockSpec(w.shape, lambda i: (0, 0)) for w in weights]

    # Advisory cost estimate (per-call MXU flops + parameter/activation bytes).
    layer_kn = sum(int(w.shape[0]) * int(w.shape[1]) for w in weights)
    hand_kn = sum(int(w.shape[0]) * int(w.shape[1]) for w in weights[0:3])
    flops = 2 * Bp * (layer_kn + hand_kn)            # hand layers run on 2x rows
    weight_bytes = 2 * layer_kn                      # bf16
    act_bytes = (hand_x.size + body_x.size) * 2 + Bp * nc_p * 4 + shifts.size * 4
    cost = pl.CostEstimate(flops=flops, transcendentals=0,
                           bytes_accessed=weight_bytes + act_bytes)

    out = pl.pallas_call(
        _fused_kernel,
        out_shape=jax.ShapeDtypeStruct((Bp, nc_p), jnp.float32),
        grid_spec=pltpu.PrefetchScalarGridSpec(
            num_scalar_prefetch=0,
            grid=(n_tiles,),
            in_specs=in_specs,
            out_specs=pl.BlockSpec((TB, nc_p), lambda i: (i, 0)),
        ),
        compiler_params=pltpu.CompilerParams(
            dimension_semantics=("parallel",)),
        cost_estimate=cost,
    )(hand_x, body_x, shifts, *weights)

    return out[:B, :num_classes]


if __name__ == "__main__":
    # Small but consistent shapes: keypoints_len must exceed 42 (2 hands of 21).
    B = 2
    frame_len = 8
    keypoints_len = 50   # body keypoints = 50 - 42 = 8
    dim_no = 3
    num_classes = 10

    key = jax.random.PRNGKey(0)
    kx, kp = jax.random.split(key)
    x = jax.random.normal(kx, (B, frame_len, keypoints_len, dim_no), jnp.float32)
    params = build_params(kp, num_classes, keypoints_len, frame_len, dim_no)

    out = linear_split_forward(x, params, num_classes)
    out = jax.block_until_ready(out)
    assert out.shape == (B, num_classes), out.shape
    assert bool(jnp.isfinite(out).all())
    print("KERNEL_OK")
</pallas_src>

<mosaic_0001>
module attributes {stable_mosaic.version = 11 : i64} {
  func.func @_fused_kernel(%arg0: i32, %arg1: memref<2x16x512xbf16, #tpu.memory_space<vmem>>, %arg2: memref<16x256xbf16, #tpu.memory_space<vmem>>, %arg3: memref<10x512xf32, #tpu.memory_space<vmem>>, %arg4: memref<512x512xbf16, #tpu.memory_space<vmem>>, %arg5: memref<512x256xbf16, #tpu.memory_space<vmem>>, %arg6: memref<256x128xbf16, #tpu.memory_space<vmem>>, %arg7: memref<256x256xbf16, #tpu.memory_space<vmem>>, %arg8: memref<256x128xbf16, #tpu.memory_space<vmem>>, %arg9: memref<128x128xbf16, #tpu.memory_space<vmem>>, %arg10: memref<384x512xbf16, #tpu.memory_space<vmem>>, %arg11: memref<512x512xbf16, #tpu.memory_space<vmem>>, %arg12: memref<512x256xbf16, #tpu.memory_space<vmem>>, %arg13: memref<256x128xbf16, #tpu.memory_space<vmem>>, %arg14: memref<16x128xf32, #tpu.memory_space<vmem>>) attributes {dimension_semantics = [#tpu.dimension_semantics<parallel>], iteration_bounds = array<i64: 1>, scalar_prefetch = 0 : i64, scratch_operands = 0 : i64, tpu.core_type = #tpu.core_type<tc>, window_params = [{transform_indices = @transform_0, window_bounds = array<i64: 2, 16, 512>}, {transform_indices = @transform_1, window_bounds = array<i64: 16, 256>}, {pipeline_mode = #tpu.pipeline_mode<synchronous>, transform_indices = @transform_2, window_bounds = array<i64: 10, 512>}, {pipeline_mode = #tpu.pipeline_mode<synchronous>, transform_indices = @transform_3, window_bounds = array<i64: 512, 512>}, {pipeline_mode = #tpu.pipeline_mode<synchronous>, transform_indices = @transform_4, window_bounds = array<i64: 512, 256>}, {pipeline_mode = #tpu.pipeline_mode<synchronous>, transform_indices = @transform_5, window_bounds = array<i64: 256, 128>}, {pipeline_mode = #tpu.pipeline_mode<synchronous>, transform_indices = @transform_6, window_bounds = array<i64: 256, 256>}, {pipeline_mode = #tpu.pipeline_mode<synchronous>, transform_indices = @transform_7, window_bounds = array<i64: 256, 128>}, {pipeline_mode = #tpu.pipeline_mode<synchronous>, transform_indices = @transform_8, window_bounds = array<i64: 128, 128>}, {pipeline_mode = #tpu.pipeline_mode<synchronous>, transform_indices = @transform_9, window_bounds = array<i64: 384, 512>}, {pipeline_mode = #tpu.pipeline_mode<synchronous>, transform_indices = @transform_10, window_bounds = array<i64: 512, 512>}, {pipeline_mode = #tpu.pipeline_mode<synchronous>, transform_indices = @transform_11, window_bounds = array<i64: 512, 256>}, {pipeline_mode = #tpu.pipeline_mode<synchronous>, transform_indices = @transform_12, window_bounds = array<i64: 256, 128>}, {transform_indices = @transform_13, window_bounds = array<i64: 16, 128>}]} {
    %c0 = arith.constant 0 : index
    %c0_0 = arith.constant 0 : index
    %c0_1 = arith.constant 0 : index
    %0 = vector.load %arg1[%c0, %c0_0, %c0_1] : memref<2x16x512xbf16, #tpu.memory_space<vmem>>, vector<1x16x512xbf16>
    %1 = vector.shape_cast %0 : vector<1x16x512xbf16> to vector<16x512xbf16>
    %c1 = arith.constant 1 : index
    %c0_2 = arith.constant 0 : index
    %c0_3 = arith.constant 0 : index
    %2 = vector.load %arg1[%c1, %c0_2, %c0_3] : memref<2x16x512xbf16, #tpu.memory_space<vmem>>, vector<1x16x512xbf16>
    %3 = vector.shape_cast %2 : vector<1x16x512xbf16> to vector<16x512xbf16>
    %4 = tpu.concatenate %1, %3 in 0 : vector<16x512xbf16>, vector<16x512xbf16> -> vector<32x512xbf16>
    %c0_4 = arith.constant 0 : index
    %c0_5 = arith.constant 0 : index
    %5 = vector.load %arg4[%c0_4, %c0_5] : memref<512x512xbf16, #tpu.memory_space<vmem>>, vector<512x512xbf16>
    %cst = arith.constant dense<0.000000e+00> : vector<32x512xf32>
    %6 = tpu.matmul %4, %5, %cst {dimension_numbers = #tpu.dot_dimension_numbers<[1], [0], [0], [1], [0, 0, 1, 1], [], []>} : vector<32x512xbf16>, vector<512x512xbf16>, vector<32x512xf32> -> vector<32x512xf32>
    %c0_6 = arith.constant 0 : index
    %c0_7 = arith.constant 0 : index
    %7 = vector.load %arg3[%c0_6, %c0_7] : memref<10x512xf32, #tpu.memory_space<vmem>>, vector<1x512xf32>
    %8 = vector.broadcast %7 : vector<1x512xf32> to vector<32x512xf32>
    %9 = arith.addf %6, %8 : vector<32x512xf32>
    %cst_8 = arith.constant 0.000000e+00 : f32
    %10 = vector.broadcast %cst_8 : f32 to vector<32x512xf32>
    %11 = arith.maximumf %9, %10 : vector<32x512xf32>
    %12 = arith.truncf %11 : vector<32x512xf32> to vector<32x512xbf16>
    %c0_9 = arith.constant 0 : index
    %c0_10 = arith.constant 0 : index
    %13 = vector.load %arg5[%c0_9, %c0_10] : memref<512x256xbf16, #tpu.memory_space<vmem>>, vector<512x256xbf16>
    %cst_11 = arith.constant dense<0.000000e+00> : vector<32x256xf32>
    %14 = tpu.matmul %12, %13, %cst_11 {dimension_numbers = #tpu.dot_dimension_numbers<[1], [0], [0], [1], [0, 0, 1, 1], [], []>} : vector<32x512xbf16>, vector<512x256xbf16>, vector<32x256xf32> -> vector<32x256xf32>
    %c1_12 = arith.constant 1 : index
    %c0_13 = arith.constant 0 : index
    %15 = vector.load %arg3[%c1_12, %c0_13] : memref<10x512xf32, #tpu.memory_space<vmem>>, vector<1x256xf32>
    %16 = vector.broadcast %15 : vector<1x256xf32> to vector<32x256xf32>
    %17 = arith.addf %14, %16 : vector<32x256xf32>
    %cst_14 = arith.constant 0.000000e+00 : f32
    %18 = vector.broadcast %cst_14 : f32 to vector<32x256xf32>
    %19 = arith.maximumf %17, %18 : vector<32x256xf32>
    %20 = arith.truncf %19 : vector<32x256xf32> to vector<32x256xbf16>
    %c0_15 = arith.constant 0 : index
    %c0_16 = arith.constant 0 : index
    %21 = vector.load %arg6[%c0_15, %c0_16] : memref<256x128xbf16, #tpu.memory_space<vmem>>, vector<256x128xbf16>
    %cst_17 = arith.constant dense<0.000000e+00> : vector<32x128xf32>
    %22 = tpu.matmul %20, %21, %cst_17 {dimension_numbers = #tpu.dot_dimension_numbers<[1], [0], [0], [1], [0, 0, 1, 1], [], []>} : vector<32x256xbf16>, vector<256x128xbf16>, vector<32x128xf32> -> vector<32x128xf32>
    %c2 = arith.constant 2 : index
    %c0_18 = arith.constant 0 : index
    %23 = vector.load %arg3[%c2, %c0_18] : memref<10x512xf32, #tpu.memory_space<vmem>>, vector<1x128xf32>
    %24 = vector.broadcast %23 : vector<1x128xf32> to vector<32x128xf32>
    %25 = arith.addf %22, %24 : vector<32x128xf32>
    %cst_19 = arith.constant 0.000000e+00 : f32
    %26 = vector.broadcast %cst_19 : f32 to vector<32x128xf32>
    %27 = arith.maximumf %25, %26 : vector<32x128xf32>
    %c0_20 = arith.constant 0 : index
    %c0_21 = arith.constant 0 : index
    %28 = vector.load %arg2[%c0_20, %c0_21] : memref<16x256xbf16, #tpu.memory_space<vmem>>, vector<16x256xbf16>
    %c0_22 = arith.constant 0 : index
    %c0_23 = arith.constant 0 : index
    %29 = vector.load %arg7[%c0_22, %c0_23] : memref<256x256xbf16, #tpu.memory_space<vmem>>, vector<256x256xbf16>
    %cst_24 = arith.constant dense<0.000000e+00> : vector<16x256xf32>
    %30 = tpu.matmul %28, %29, %cst_24 {dimension_numbers = #tpu.dot_dimension_numbers<[1], [0], [0], [1], [0, 0, 1, 1], [], []>} : vector<16x256xbf16>, vector<256x256xbf16>, vector<16x256xf32> -> vector<16x256xf32>
    %c3 = arith.constant 3 : index
    %c0_25 = arith.constant 0 : index
    %31 = vector.load %arg3[%c3, %c0_25] : memref<10x512xf32, #tpu.memory_space<vmem>>, vector<1x256xf32>
    %32 = vector.broadcast %31 : vector<1x256xf32> to vector<16x256xf32>
    %33 = arith.addf %30, %32 : vector<16x256xf32>
    %cst_26 = arith.constant 0.000000e+00 : f32
    %34 = vector.broadcast %cst_26 : f32 to vector<16x256xf32>
    %35 = arith.maximumf %33, %34 : vector<16x256xf32>
    %36 = arith.truncf %35 : vector<16x256xf32> to vector<16x256xbf16>
    %c0_27 = arith.constant 0 : index
    %c0_28 = arith.constant 0 : index
    %37 = vector.load %arg8[%c0_27, %c0_28] : memref<256x128xbf16, #tpu.memory_space<vmem>>, vector<256x128xbf16>
    %cst_29 = arith.constant dense<0.000000e+00> : vector<16x128xf32>
    %38 = tpu.matmul %36, %37, %cst_29 {dimension_numbers = #tpu.dot_dimension_numbers<[1], [0], [0], [1], [0, 0, 1, 1], [], []>} : vector<16x256xbf16>, vector<256x128xbf16>, vector<16x128xf32> -> vector<16x128xf32>
    %c4 = arith.constant 4 : index
    %c0_30 = arith.constant 0 : index
    %39 = vector.load %arg3[%c4, %c0_30] : memref<10x512xf32, #tpu.memory_space<vmem>>, vector<1x128xf32>
    %40 = vector.broadcast %39 : vector<1x128xf32> to vector<16x128xf32>
    %41 = arith.addf %38, %40 : vector<16x128xf32>
    %cst_31 = arith.constant 0.000000e+00 : f32
    %42 = vector.broadcast %cst_31 : f32 to vector<16x128xf32>
    %43 = arith.maximumf %41, %42 : vector<16x128xf32>
    %44 = arith.truncf %43 : vector<16x128xf32> to vector<16x128xbf16>
    %c0_32 = arith.constant 0 : index
    %c0_33 = arith.constant 0 : index
    %45 = vector.load %arg9[%c0_32, %c0_33] : memref<128x128xbf16, #tpu.memory_space<vmem>>, vector<128x128xbf16>
    %cst_34 = arith.constant dense<0.000000e+00> : vector<16x128xf32>
    %46 = tpu.matmul %44, %45, %cst_34 {dimension_numbers = #tpu.dot_dimension_numbers<[1], [0], [0], [1], [0, 0, 1, 1], [], []>} : vector<16x128xbf16>, vector<128x128xbf16>, vector<16x128xf32> -> vector<16x128xf32>
    %c5 = arith.constant 5 : index
    %c0_35 = arith.constant 0 : index
    %47 = vector.load %arg3[%c5, %c0_35] : memref<10x512xf32, #tpu.memory_space<vmem>>, vector<1x128xf32>
    %48 = vector.broadcast %47 : vector<1x128xf32> to vector<16x128xf32>
    %49 = arith.addf %46, %48 : vector<16x128xf32>
    %cst_36 = arith.constant 0.000000e+00 : f32
    %50 = vector.broadcast %cst_36 : f32 to vector<16x128xf32>
    %51 = arith.maximumf %49, %50 : vector<16x128xf32>
    %52 = vector.extract_strided_slice %27 {offsets = [0, 0], sizes = [16, 128], strides = [1, 1]} : vector<32x128xf32> to vector<16x128xf32>
    %53 = vector.extract_strided_slice %27 {offsets = [16, 0], sizes = [16, 128], strides = [1, 1]} : vector<32x128xf32> to vector<16x128xf32>
    %54 = tpu.concatenate %52, %53, %51 in 1 : vector<16x128xf32>, vector<16x128xf32>, vector<16x128xf32> -> vector<16x384xf32>
    %55 = arith.truncf %54 : vector<16x384xf32> to vector<16x384xbf16>
    %c0_37 = arith.constant 0 : index
    %c0_38 = arith.constant 0 : index
    %56 = vector.load %arg10[%c0_37, %c0_38] : memref<384x512xbf16, #tpu.memory_space<vmem>>, vector<384x512xbf16>
    %cst_39 = arith.constant dense<0.000000e+00> : vector<16x512xf32>
    %57 = tpu.matmul %55, %56, %cst_39 {dimension_numbers = #tpu.dot_dimension_numbers<[1], [0], [0], [1], [0, 0, 1, 1], [], []>} : vector<16x384xbf16>, vector<384x512xbf16>, vector<16x512xf32> -> vector<16x512xf32>
    %c6 = arith.constant 6 : index
    %c0_40 = arith.constant 0 : index
    %58 = vector.load %arg3[%c6, %c0_40] : memref<10x512xf32, #tpu.memory_space<vmem>>, vector<1x512xf32>
    %59 = vector.broadcast %58 : vector<1x512xf32> to vector<16x512xf32>
    %60 = arith.addf %57, %59 : vector<16x512xf32>
    %cst_41 = arith.constant 0.000000e+00 : f32
    %61 = vector.broadcast %cst_41 : f32 to vector<16x512xf32>
    %62 = arith.maximumf %60, %61 : vector<16x512xf32>
    %63 = arith.truncf %62 : vector<16x512xf32> to vector<16x512xbf16>
    %c0_42 = arith.constant 0 : index
    %c0_43 = arith.constant 0 : index
    %64 = vector.load %arg11[%c0_42, %c0_43] : memref<512x512xbf16, #tpu.memory_space<vmem>>, vector<512x512xbf16>
    %cst_44 = arith.constant dense<0.000000e+00> : vector<16x512xf32>
    %65 = tpu.matmul %63, %64, %cst_44 {dimension_numbers = #tpu.dot_dimension_numbers<[1], [0], [0], [1], [0, 0, 1, 1], [], []>} : vector<16x512xbf16>, vector<512x512xbf16>, vector<16x512xf32> -> vector<16x512xf32>
    %c7 = arith.constant 7 : index
    %c0_45 = arith.constant 0 : index
    %66 = vector.load %arg3[%c7, %c0_45] : memref<10x512xf32, #tpu.memory_space<vmem>>, vector<1x512xf32>
    %67 = vector.broadcast %66 : vector<1x512xf32> to vector<16x512xf32>
    %68 = arith.addf %65, %67 : vector<16x512xf32>
    %cst_46 = arith.constant 0.000000e+00 : f32
    %69 = vector.broadcast %cst_46 : f32 to vector<16x512xf32>
    %70 = arith.maximumf %68, %69 : vector<16x512xf32>
    %71 = arith.truncf %70 : vector<16x512xf32> to vector<16x512xbf16>
    %c0_47 = arith.constant 0 : index
    %c0_48 = arith.constant 0 : index
    %72 = vector.load %arg12[%c0_47, %c0_48] : memref<512x256xbf16, #tpu.memory_space<vmem>>, vector<512x256xbf16>
    %cst_49 = arith.constant dense<0.000000e+00> : vector<16x256xf32>
    %73 = tpu.matmul %71, %72, %cst_49 {dimension_numbers = #tpu.dot_dimension_numbers<[1], [0], [0], [1], [0, 0, 1, 1], [], []>} : vector<16x512xbf16>, vector<512x256xbf16>, vector<16x256xf32> -> vector<16x256xf32>
    %c8 = arith.constant 8 : index
    %c0_50 = arith.constant 0 : index
    %74 = vector.load %arg3[%c8, %c0_50] : memref<10x512xf32, #tpu.memory_space<vmem>>, vector<1x256xf32>
    %75 = vector.broadcast %74 : vector<1x256xf32> to vector<16x256xf32>
    %76 = arith.addf %73, %75 : vector<16x256xf32>
    %cst_51 = arith.constant 0.000000e+00 : f32
    %77 = vector.broadcast %cst_51 : f32 to vector<16x256xf32>
    %78 = arith.maximumf %76, %77 : vector<16x256xf32>
    %79 = arith.truncf %78 : vector<16x256xf32> to vector<16x256xbf16>
    %c0_52 = arith.constant 0 : index
    %c0_53 = arith.constant 0 : index
    %80 = vector.load %arg13[%c0_52, %c0_53] : memref<256x128xbf16, #tpu.memory_space<vmem>>, vector<256x128xbf16>
    %cst_54 = arith.constant dense<0.000000e+00> : vector<16x128xf32>
    %81 = tpu.matmul %79, %80, %cst_54 {dimension_numbers = #tpu.dot_dimension_numbers<[1], [0], [0], [1], [0, 0, 1, 1], [], []>} : vector<16x256xbf16>, vector<256x128xbf16>, vector<16x128xf32> -> vector<16x128xf32>
    %c9 = arith.constant 9 : index
    %c0_55 = arith.constant 0 : index
    %82 = vector.load %arg3[%c9, %c0_55] : memref<10x512xf32, #tpu.memory_space<vmem>>, vector<1x128xf32>
    %83 = vector.broadcast %82 : vector<1x128xf32> to vector<16x128xf32>
    %84 = arith.addf %81, %83 : vector<16x128xf32>
    %c0_56 = arith.constant 0 : index
    %c0_57 = arith.constant 0 : index
    %85 = vector.load %arg14[%c0_56, %c0_57] : memref<16x128xf32, #tpu.memory_space<vmem>>, vector<16x128xf32>
    tpu.vector_store %arg14[%c0_56, %c0_57], %84 {strides = array<i32>} : memref<16x128xf32, #tpu.memory_space<vmem>>, vector<16x128xf32>,
    return
  }
  func.func @transform_0(%arg0: i32) -> (i32, i32, i32) {
    %c0_i32 = arith.constant 0 : i32
    %c0_i32_0 = arith.constant 0 : i32
    %c0_i32_1 = arith.constant 0 : i32
    return %c0_i32, %arg0, %c0_i32_0 : i32, i32, i32
  }
  func.func @transform_1(%arg0: i32) -> (i32, i32) {
    %c0_i32 = arith.constant 0 : i32
    %c0_i32_0 = arith.constant 0 : i32
    return %arg0, %c0_i32 : i32, i32
  }
  func.func @transform_2(%arg0: i32) -> (i32, i32) {
    %c0_i32 = arith.constant 0 : i32
    %c0_i32_0 = arith.constant 0 : i32
    %c0_i32_1 = arith.constant 0 : i32
    return %c0_i32, %c0_i32_0 : i32, i32
  }
  func.func @transform_3(%arg0: i32) -> (i32, i32) {
    %c0_i32 = arith.constant 0 : i32
    %c0_i32_0 = arith.constant 0 : i32
    %c0_i32_1 = arith.constant 0 : i32
    return %c0_i32, %c0_i32_0 : i32, i32
  }
  func.func @transform_4(%arg0: i32) -> (i32, i32) {
    %c0_i32 = arith.constant 0 : i32
    %c0_i32_0 = arith.constant 0 : i32
    %c0_i32_1 = arith.constant 0 : i32
    return %c0_i32, %c0_i32_0 : i32, i32
  }
  func.func @transform_5(%arg0: i32) -> (i32, i32) {
    %c0_i32 = arith.constant 0 : i32
    %c0_i32_0 = arith.constant 0 : i32
    %c0_i32_1 = arith.constant 0 : i32
    return %c0_i32, %c0_i32_0 : i32, i32
  }
  func.func @transform_6(%arg0: i32) -> (i32, i32) {
    %c0_i32 = arith.constant 0 : i32
    %c0_i32_0 = arith.constant 0 : i32
    %c0_i32_1 = arith.constant 0 : i32
    return %c0_i32, %c0_i32_0 : i32, i32
  }
  func.func @transform_7(%arg0: i32) -> (i32, i32) {
    %c0_i32 = arith.constant 0 : i32
    %c0_i32_0 = arith.constant 0 : i32
    %c0_i32_1 = arith.constant 0 : i32
    return %c0_i32, %c0_i32_0 : i32, i32
  }
  func.func @transform_8(%arg0: i32) -> (i32, i32) {
    %c0_i32 = arith.constant 0 : i32
    %c0_i32_0 = arith.constant 0 : i32
    %c0_i32_1 = arith.constant 0 : i32
    return %c0_i32, %c0_i32_0 : i32, i32
  }
  func.func @transform_9(%arg0: i32) -> (i32, i32) {
    %c0_i32 = arith.constant 0 : i32
    %c0_i32_0 = arith.constant 0 : i32
    %c0_i32_1 = arith.constant 0 : i32
    return %c0_i32, %c0_i32_0 : i32, i32
  }
  func.func @transform_10(%arg0: i32) -> (i32, i32) {
    %c0_i32 = arith.constant 0 : i32
    %c0_i32_0 = arith.constant 0 : i32
    %c0_i32_1 = arith.constant 0 : i32
    return %c0_i32, %c0_i32_0 : i32, i32
  }
  func.func @transform_11(%arg0: i32) -> (i32, i32) {
    %c0_i32 = arith.constant 0 : i32
    %c0_i32_0 = arith.constant 0 : i32
    %c0_i32_1 = arith.constant 0 : i32
    return %c0_i32, %c0_i32_0 : i32, i32
  }
  func.func @transform_12(%arg0: i32) -> (i32, i32) {
    %c0_i32 = arith.constant 0 : i32
    %c0_i32_0 = arith.constant 0 : i32
    %c0_i32_1 = arith.constant 0 : i32
    return %c0_i32, %c0_i32_0 : i32, i32
  }
  func.func @transform_13(%arg0: i32) -> (i32, i32) {
    %c0_i32 = arith.constant 0 : i32
    %c0_i32_0 = arith.constant 0 : i32
    return %arg0, %c0_i32 : i32, i32
  }
}

</mosaic_0001>

<bundles_post_ra>
// kernel: linear_split_forward.1
= control target key start
LH: loop header
LB: loop body
LE: loop exit
PB: predicated region body
PF: predicated region fallthrough
CT: control target
= control target key end

     0   :  { %18 = vsyncpa [#allocation3], 0  ;;  %s7338_s0 = inlined_call_operand.vmem [shape: bf16[2,16,512], index: 0, kind: input, shape index: {}]   ;;  %s7339_s1 = inlined_call_operand.vmem [shape: bf16[16,256], index: 1, kind: input, shape index: {}]   ;;  %s7340_s2 = inlined_call_operand.hbm [shape: f32[10,512], index: 2, kind: input, shape index: {}]   ;;  %s7341_s3 = inlined_call_operand.vmem [shape: bf16[512,512], index: 3, kind: input, shape index: {}]   ;;  %s7342_s4 = inlined_call_operand.hbm [shape: bf16[512,256], index: 4, kind: input, shape index: {}]   ;;  %s7343_s5 = inlined_call_operand.vmem [shape: bf16[256,128], index: 5, kind: input, shape index: {}]   ;;  %s7344_s6 = inlined_call_operand.hbm [shape: bf16[256,256], index: 6, kind: input, shape index: {}]   ;;  %s7345_s7 = inlined_call_operand.hbm [shape: bf16[256,128], index: 7, kind: input, shape index: {}]   ;;  %s7346_s8 = inlined_call_operand.hbm [shape: bf16[128,128], index: 8, kind: input, shape index: {}]   ;;  %s7347_s9 = inlined_call_operand.hbm [shape: bf16[384,512], index: 9, kind: input, shape index: {}]   ;;  %s7348_s10 = inlined_call_operand.hbm [shape: bf16[512,512], index: 10, kind: input, shape index: {}]   ;;  %s7349_s11 = inlined_call_operand.hbm [shape: bf16[512,256], index: 11, kind: input, shape index: {}]   ;;  %s7350_s12 = inlined_call_operand.hbm [shape: bf16[256,128], index: 12, kind: input, shape index: {}]   ;;  %s7351_s13 = inlined_call_operand.vmem [shape: f32[16,128], index: 13, kind: output, shape index: {}]  }
   0x1   :  { %19 = vsyncpa [#allocation5], 0 }
   0x2   :  { %20 = vsyncpa [#allocation8], 0 }
   0x3   :  { %21 = vsyncpa [#allocation11], 0 }
   0x4   :  { %22 = vsyncpa [#allocation14], 0  ;;  %s6649_s25 = smov [#allocation4]  }
   0x5   :  { %s46_s26 = sshll.u32 %s6649_s25, 4  ;;  %s47_s26 = int_to_ptr.vmem [resolvable:$true] %s46_s26 }
   0x6   :  { %s6467_s27 = scalar_lea.vmem %s47_s26, 8192  ;;  %p6472_p1 = scmp.lt.s32.totalorder %s47_s26, %s47_s26 }
   0x7   :  { %p6468_p0 = scmp.ne.s32.totalorder %s47_s26, %s6467_s27  ;;  %p6473_p2 = scmp.lt.s32.totalorder %s6467_s27, %s6467_s27 }
   0x9   :  { %p6474_p3 = por %p6473_p2, %p6472_p1 }
   0xb   :  { %p6475_p4 = pnand %p6474_p3, %p6468_p0 }
   0xd   :  { %6478 = shalt.err (!%p6475_p4)
}
   0xe   :  { %s6650_s28 = smov 128   ;;  %s6651_s29 = smov 8  }
   0xf   :  { %52 = dma.hbm_to_vmem [thread:$0]  %s7342_s4, 8192, %s47_s26, [#allocation5], %s6650_s28, %s6650_s28, %s6651_s29  }
  0x10   :  { %s6652_s15 = smov [#allocation7]  }
  0x11   :  { %s72_s16 = sshll.u32 %s6652_s15, 4  ;;  %s73_s16 = int_to_ptr.vmem [resolvable:$true] %s72_s16 }
  0x12   :  { %s6487_s17 = scalar_lea.vmem %s73_s16, 2048  ;;  %p6492_p6 = scmp.lt.s32.totalorder %s73_s16, %s73_s16 }
  0x13   :  { %p6488_p5 = scmp.ne.s32.totalorder %s73_s16, %s6487_s17  ;;  %p6493_p7 = scmp.lt.s32.totalorder %s6487_s17, %s6487_s17 }
  0x15   :  { %p6494_p8 = por %p6493_p7, %p6492_p6 }
  0x17   :  { %p6495_p9 = pnand %p6494_p8, %p6488_p5 }
  0x19   :  { %6498 = shalt.err (!%p6495_p9)
}
  0x1a   :  { %s6653_s18 = smov 64   ;;  %s6654_s19 = smov 4  }
  0x1b   :  { %78 = dma.hbm_to_vmem [thread:$0]  %s7345_s7, 2048, %s73_s16, [#allocation8], %s6653_s18, %s6653_s18, %s6654_s19  }
  0x1c   :  { %s6655_s4 = smov [#allocation10]  }
  0x1d   :  { %s96_s22 = sshll.u32 %s6655_s4, 4  ;;  %s97_s22 = int_to_ptr.vmem [resolvable:$true] %s96_s22 }
  0x1e   :  { %s6507_s23 = scalar_lea.vmem %s97_s22, 12288  ;;  %p6512_p11 = scmp.lt.s32.totalorder %s97_s22, %s97_s22 }
  0x1f   :  { %p6508_p10 = scmp.ne.s32.totalorder %s97_s22, %s6507_s23  ;;  %p6513_p12 = scmp.lt.s32.totalorder %s6507_s23, %s6507_s23 }
  0x21   :  { %p6514_p13 = por %p6513_p12, %p6512_p11 }
  0x23   :  { %p6515_p0 = pnand %p6514_p13, %p6508_p10 }
  0x25   :  { %6518 = shalt.err (!%p6515_p0)
}
  0x26   :  { %s6656_s24 = smov 256   ;;  %s6657_s25 = smov 16  }
  0x27   :  { %102 = dma.hbm_to_vmem [thread:$0]  %s7347_s9, 12288, %s97_s22, [#allocation11], %s6656_s24, %s6656_s24, %s6657_s25  }
  0x28   :  { %s6658_s7 = smov [#allocation13]   ;;  %s6659_s14 = smov [#allocation2]  }
  0x29   :  { %s120_s30 = sshll.u32 %s6658_s7, 4  ;;  %s32_s15 = sshll.u32 %s6659_s14, 4  ;;  %s121_s30 = int_to_ptr.vmem [resolvable:$true] %s120_s30  ;;  %s33_s15 = int_to_ptr.vmem [resolvable:$true] %s32_s15 }
  0x2a   :  { %s6527_s16 = scalar_lea.vmem %s121_s30, 8192  ;;  %p6532_p2 = scmp.lt.s32.totalorder %s121_s30, %s121_s30 }
  0x2b   :  { %p6528_p1 = scmp.ne.s32.totalorder %s121_s30, %s6527_s16  ;;  %p6533_p3 = scmp.lt.s32.totalorder %s6527_s16, %s6527_s16 }
  0x2d   :  { %p6534_p4 = por %p6533_p3, %p6532_p2 }
  0x2f   :  { %p6535_p5 = pnand %p6534_p4, %p6528_p1 }
  0x31   :  { %6538 = shalt.err (!%p6535_p5)
}
  0x32   :  { %126 = dma.hbm_to_vmem [thread:$0]  %s7349_s11, 8192, %s121_s30, [#allocation14], %s6650_s28, %s6650_s28, %s6651_s29  }
  0x33   :  { %s6547_s9 = scalar_lea.vmem %s33_s15, 1024  ;;  %p6552_p7 = scmp.lt.s32.totalorder %s33_s15, %s33_s15 }
  0x34   :  { %p6548_p6 = scmp.ne.s32.totalorder %s33_s15, %s6547_s9  ;;  %p6553_p8 = scmp.lt.s32.totalorder %s6547_s9, %s6547_s9 }
  0x36   :  { %p6554_p9 = por %p6553_p8, %p6552_p7 }
  0x38   :  { %p6555_p10 = pnand %p6554_p9, %p6548_p6 }
  0x3a   :  { %6558 = shalt.err (!%p6555_p10)
}
  0x3b   :  { %s6660_s21 = smov 512   ;;  %s6661_s4 = smov 32  }
  0x3c   :  { %38 = dma.hbm_to_vmem [thread:$0]  %s7340_s2, 1024, %s33_s15, [#allocation3], %s6660_s21, %s6660_s21, %s6661_s4  }
  0x3d   :  { %s6662_s26 = smov [#allocation6]   ;;  %s6663_s7 = smov [#allocation9]  }
  0x3e   :  { %s60_s27 = sshll.u32 %s6662_s26, 4  ;;  %s84_s14 = sshll.u32 %s6663_s7, 4  ;;  %s61_s27 = int_to_ptr.vmem [resolvable:$true] %s60_s27  ;;  %s85_s14 = int_to_ptr.vmem [resolvable:$true] %s84_s14 }
  0x3f   :  { %s6567_s11 = scalar_lea.vmem %s61_s27, 4096  ;;  %p6572_p12 = scmp.lt.s32.totalorder %s61_s27, %s61_s27 }
  0x40   :  { %p6568_p11 = scmp.ne.s32.totalorder %s61_s27, %s6567_s11  ;;  %p6573_p13 = scmp.lt.s32.totalorder %s6567_s11, %s6567_s11 }
  0x42   :  { %p6574_p0 = por %p6573_p13, %p6572_p12 }
  0x44   :  { %p6575_p1 = pnand %p6574_p0, %p6568_p11 }
  0x46   :  { %6578 = shalt.err (!%p6575_p1)
}
  0x47   :  { %66 = dma.hbm_to_vmem [thread:$0]  %s7344_s6, 4096, %s61_s27, [#allocation5], %s6650_s28, %s6650_s28, %s6651_s29  }
  0x48   :  { %s6587_s2 = scalar_lea.vmem %s85_s14, 1024  ;;  %p6592_p3 = scmp.lt.s32.totalorder %s85_s14, %s85_s14 }
  0x49   :  { %p6588_p2 = scmp.ne.s32.totalorder %s85_s14, %s6587_s2  ;;  %p6593_p4 = scmp.lt.s32.totalorder %s6587_s2, %s6587_s2 }
  0x4b   :  { %p6594_p5 = por %p6593_p4, %p6592_p3 }
  0x4d   :  { %p6595_p6 = pnand %p6594_p5, %p6588_p2 }
  0x4f   :  { %6598 = shalt.err (!%p6595_p6)
}
  0x50   :  { %90 = dma.hbm_to_vmem [thread:$0]  %s7346_s8, 1024, %s85_s14, [#allocation8], %s6653_s18, %s6653_s18, %s6654_s19  }
  0x51   :  { %s6664_s20 = smov [#allocation12]   ;;  %s6665_s21 = smov [#allocation15]  }
  0x52   :  { %s108_s9 = sshll.u32 %s6664_s20, 4  ;;  %s132_s6 = sshll.u32 %s6665_s21, 4  ;;  %s109_s9 = int_to_ptr.vmem [resolvable:$true] %s108_s9  ;;  %s133_s6 = int_to_ptr.vmem [resolvable:$true] %s132_s6 }
  0x53   :  { %s6607_s28 = scalar_lea.vmem %s109_s9, 16384  ;;  %p6612_p8 = scmp.lt.s32.totalorder %s109_s9, %s109_s9 }
  0x54   :  { %p6608_p7 = scmp.ne.s32.totalorder %s109_s9, %s6607_s28  ;;  %p6613_p9 = scmp.lt.s32.totalorder %s6607_s28, %s6607_s28 }
  0x56   :  { %p6614_p10 = por %p6613_p9, %p6612_p8 }
  0x58   :  { %p6615_p11 = pnand %p6614_p10, %p6608_p7 }
  0x5a   :  { %6618 = shalt.err (!%p6615_p11)
}
  0x5b   :  { %114 = dma.hbm_to_vmem [thread:$0]  %s7348_s10, 16384, %s109_s9, [#allocation11], %s6656_s24, %s6656_s24, %s6657_s25  }
  0x5c   :  { %s6627_s8 = scalar_lea.vmem %s133_s6, 2048  ;;  %p6632_p13 = scmp.lt.s32.totalorder %s133_s6, %s133_s6 }
  0x5d   :  { %p6628_p12 = scmp.ne.s32.totalorder %s133_s6, %s6627_s8  ;;  %p6633_p0 = scmp.lt.s32.totalorder %s6627_s8, %s6627_s8 }
  0x5f   :  { %p6634_p1 = por %p6633_p0, %p6632_p13 }
  0x61   :  { %p6635_p2 = pnand %p6634_p1, %p6628_p12 }
  0x63   :  { %6638 = shalt.err (!%p6635_p2)
}
  0x64   :  { %138 = dma.hbm_to_vmem [thread:$0]  %s7350_s12, 2048, %s133_s6, [#allocation14], %s6653_s18, %s6653_s18, %s6654_s19  }
  0x65   :  { %6639 = dma.done.wait [#allocation3], 1024  }
  0x66   :  { %6640 = vsyncadd [#allocation3], 4294966272 }
  0x67   :  { %6641 = dma.done.wait [#allocation5], 12288  }
  0x68   :  { %6642 = vsyncadd [#allocation5], 4294955008 }
  0x69   :  { %6643 = dma.done.wait [#allocation8], 3072  }
  0x6a   :  { %6644 = vsyncadd [#allocation8], 4294964224 }
  0x6b   :  { %6645 = dma.done.wait [#allocation11], 28672  }
  0x6c   :  { %6646 = vsyncadd [#allocation11], 4294938624 }
  0x6d   :  { %6647 = dma.done.wait [#allocation14], 10240  }
  0x6e   :  { %6648 = vsyncadd [#allocation14], 4294957056  ;;  %v5620_v0 = vld [vmem:[%s7341_s3 + $0xe4] ss:$16 sps:$4 sm:$0xff]   ;;  %v5624_v2 = vld [vmem:[%s7341_s3 + $0xe0] ss:$16 sps:$4 sm:$0xff]  }
  0x6f   :  { %v5622_v1 = vld [vmem:[%s7341_s3 + $0x2e4] ss:$16 sps:$4 sm:$0xff]   ;;  %1006 = vmatprep.subr.bf16.mxu0 %v5620_v0  ;;  %v5625_v3 = vld [vmem:[%s7341_s3 + $0x2e0] ss:$16 sps:$4 sm:$0xff]   ;;  %v6948_v51 = vld [vmem:[%s7338_s0 + $0xc] ss:$16 sps:$4 sm:$0xff]  }
  0x70   :  { %1059 = vmatprep.subr.bf16.mxu1 %v5622_v1  ;;  %v5626_v4 = vld [vmem:[%s7341_s3 + $0xc4] ss:$16 sps:$4 sm:$0xff]   ;;  %1007 = vmatpush1.bf16.msra.mxu0 %v5624_v2  ;;  %v5630_v6 = vld [vmem:[%s7341_s3 + $0xc0] ss:$16 sps:$4 sm:$0xff]   ;;  %v5724_v2 = vld [vmem:[%s7341_s3 + $0xec] ss:$16 sps:$4 sm:$0xff]  }
  0x71   :  { %1060 = vmatpush1.bf16.msra.mxu1 %v5625_v3  ;;  %v5628_v5 = vld [vmem:[%s7341_s3 + $0x2c4] ss:$16 sps:$4 sm:$0xff]   ;;  %1008 = vmatprep.subr.bf16.mxu0 %v5626_v4  ;;  %v5631_v7 = vld [vmem:[%s7341_s3 + $0x2c0] ss:$16 sps:$4 sm:$0xff]   ;;  %v5727_v3 = vld [vmem:[%s7341_s3 + $0x2ec] ss:$16 sps:$4 sm:$0xff]  }
  0x72   :  { %1061 = vmatprep.subr.bf16.mxu1 %v5628_v5  ;;  %v5632_v8 = vld [vmem:[%s7341_s3 + $0xa4] ss:$16 sps:$4 sm:$0xff]   ;;  %v5636_v10 = vld [vmem:[%s7341_s3 + $0xa0] ss:$16 sps:$4 sm:$0xff]   ;;  %1091 = vmatprep.mubr.bf16.mxu1 %v6948_v51  ;;  %v7008_v5 = vld [vmem:[%s7338_s0 + $0x8] ss:$16 sps:$4 sm:$0xff]  }
  0x73   :  { %v5634_v9 = vld [vmem:[%s7341_s3 + $0x2a4] ss:$16 sps:$4 sm:$0xff]   ;;  %v5637_v11 = vld [vmem:[%s7341_s3 + $0x2a0] ss:$16 sps:$4 sm:$0xff]   ;;  %vm6667_vm0 = vmmov 0  }
  0x74   :  { %1009 = vmatpush1.bf16.msra.mxu0 %v5630_v6  ;;  %v5638_v12 = vld [vmem:[%s7341_s3 + $0x84] ss:$16 sps:$4 sm:$0xff]   ;;  %v5642_v14 = vld [vmem:[%s7341_s3 + $0x80] ss:$16 sps:$4 sm:$0xff]   ;;  %v5722_v6 = vld [vmem:[%s7341_s3 + $0xe8] ss:$16 sps:$4 sm:$0xff]  }
  0x75   :  { %1062 = vmatpush1.bf16.msra.mxu1 %v5631_v7  ;;  %1010 = vmatprep.subr.bf16.mxu0 %v5632_v8  ;;  %v5640_v13 = vld [vmem:[%s7341_s3 + $0x284] ss:$16 sps:$4 sm:$0xff]   ;;  %v5643_v15 = vld [vmem:[%s7341_s3 + $0x280] ss:$16 sps:$4 sm:$0xff]   ;;  %v5725_v7 = vld [vmem:[%s7341_s3 + $0x2e8] ss:$16 sps:$4 sm:$0xff]  }
  0x76   :  { %1063 = vmatprep.subr.bf16.mxu1 %v5634_v9  ;;  %v5644_v16 = vld [vmem:[%s7341_s3 + $0x64] ss:$16 sps:$4 sm:$0xff]   ;;  %v5648_v18 = vld [vmem:[%s7341_s3 + $0x60] ss:$16 sps:$4 sm:$0xff]   ;;  %v5730_v8 = vld [vmem:[%s7341_s3 + $0xcc] ss:$16 sps:$4 sm:$0xff]  }
  0x77   :  { %v5646_v17 = vld [vmem:[%s7341_s3 + $0x264] ss:$16 sps:$4 sm:$0xff]   ;;  %v5649_v19 = vld [vmem:[%s7341_s3 + $0x260] ss:$16 sps:$4 sm:$0xff]   ;;  %v5733_v9 = vld [vmem:[%s7341_s3 + $0x2cc] ss:$16 sps:$4 sm:$0xff]  }
  0x78   :  { %1011 = vmatpush1.bf16.msra.mxu0 %v5636_v10  ;;  %v5650_v20 = vld [vmem:[%s7341_s3 + $0x44] ss:$16 sps:$4 sm:$0xff]   ;;  %v5654_v22 = vld [vmem:[%s7341_s3 + $0x40] ss:$16 sps:$4 sm:$0xff]   ;;  %v5728_v10 = vld [vmem:[%s7341_s3 + $0xc8] ss:$16 sps:$4 sm:$0xff]  }
  0x79   :  { %1064 = vmatpush1.bf16.msra.mxu1 %v5637_v11  ;;  %1012 = vmatprep.subr.bf16.mxu0 %v5638_v12  ;;  %v5652_v21 = vld [vmem:[%s7341_s3 + $0x244] ss:$16 sps:$4 sm:$0xff]   ;;  %v5655_v23 = vld [vmem:[%s7341_s3 + $0x240] ss:$16 sps:$4 sm:$0xff]   ;;  %v5731_v11 = vld [vmem:[%s7341_s3 + $0x2c8] ss:$16 sps:$4 sm:$0xff]  }
  0x7a   :  { %1065 = vmatprep.subr.bf16.mxu1 %v5640_v13  ;;  %v5656_v24 = vld [vmem:[%s7341_s3 + $0x24] ss:$16 sps:$4 sm:$0xff]   ;;  %v5660_v26 = vld [vmem:[%s7341_s3 + $0x20] ss:$16 sps:$4 sm:$0xff]   ;;  %v5736_v12 = vld [vmem:[%s7341_s3 + $0xac] ss:$16 sps:$4 sm:$0xff]  }
  0x7b   :  { %v5658_v25 = vld [vmem:[%s7341_s3 + $0x224] ss:$16 sps:$4 sm:$0xff]   ;;  %v5661_v27 = vld [vmem:[%s7341_s3 + $0x220] ss:$16 sps:$4 sm:$0xff]   ;;  %v5739_v13 = vld [vmem:[%s7341_s3 + $0x2ac] ss:$16 sps:$4 sm:$0xff]  }
  0x7c   :  { %1013 = vmatpush1.bf16.msra.mxu0 %v5642_v14  ;;  %v5662_v28 = vld [vmem:[%s7341_s3 + $0x4] ss:$16 sps:$4 sm:$0xff]   ;;  %v5666_v30 = vld [vmem:[%s7341_s3] ss:$16 sps:$4 sm:$0xff]   ;;  %v5734_v14 = vld [vmem:[%s7341_s3 + $0xa8] ss:$16 sps:$4 sm:$0xff]  }
  0x7d   :  { %1066 = vmatpush1.bf16.msra.mxu1 %v5643_v15  ;;  %1014 = vmatprep.subr.bf16.mxu0 %v5644_v16  ;;  %v5664_v29 = vld [vmem:[%s7341_s3 + $0x204] ss:$16 sps:$4 sm:$0xff]   ;;  %v5667_v31 = vld [vmem:[%s7341_s3 + $0x200] ss:$16 sps:$4 sm:$0xff]   ;;  %v5737_v15 = vld [vmem:[%s7341_s3 + $0x2a8] ss:$16 sps:$4 sm:$0xff]  }
  0x7e   :  { %1067 = vmatprep.subr.bf16.mxu1 %v5646_v17  ;;  %v5668_v32 = vld [vmem:[%s7341_s3 + $0x1e4] ss:$16 sps:$4 sm:$0xff]   ;;  %v5672_v34 = vld [vmem:[%s7341_s3 + $0x1e0] ss:$16 sps:$4 sm:$0xff]   ;;  %v5742_v16 = vld [vmem:[%s7341_s3 + $0x8c] ss:$16 sps:$4 sm:$0xff]  }
  0x7f   :  { %v5670_v33 = vld [vmem:[%s7341_s3 + $0x3e4] ss:$16 sps:$4 sm:$0xff]   ;;  %v5673_v35 = vld [vmem:[%s7341_s3 + $0x3e0] ss:$16 sps:$4 sm:$0xff]   ;;  %v5745_v17 = vld [vmem:[%s7341_s3 + $0x28c] ss:$16 sps:$4 sm:$0xff]  }
  0x80   :  { %1015 = vmatpush1.bf16.msra.mxu0 %v5648_v18  ;;  %v5674_v36 = vld [vmem:[%s7341_s3 + $0x1c4] ss:$16 sps:$4 sm:$0xff]   ;;  %v5678_v38 = vld [vmem:[%s7341_s3 + $0x1c0] ss:$16 sps:$4 sm:$0xff]   ;;  %v5740_v18 = vld [vmem:[%s7341_s3 + $0x88] ss:$16 sps:$4 sm:$0xff]  }
  0x81   :  { %1068 = vmatpush1.bf16.msra.mxu1 %v5649_v19  ;;  %1016 = vmatprep.subr.bf16.mxu0 %v5650_v20  ;;  %v5676_v37 = vld [vmem:[%s7341_s3 + $0x3c4] ss:$16 sps:$4 sm:$0xff]   ;;  %v5679_v39 = vld [vmem:[%s7341_s3 + $0x3c0] ss:$16 sps:$4 sm:$0xff]   ;;  %v5743_v19 = vld [vmem:[%s7341_s3 + $0x288] ss:$16 sps:$4 sm:$0xff]  }
  0x82   :  { %1069 = vmatprep.subr.bf16.mxu1 %v5652_v21  ;;  %v5680_v40 = vld [vmem:[%s7341_s3 + $0x1a4] ss:$16 sps:$4 sm:$0xff]   ;;  %v5684_v42 = vld [vmem:[%s7341_s3 + $0x1a0] ss:$16 sps:$4 sm:$0xff]   ;;  %v5748_v20 = vld [vmem:[%s7341_s3 + $0x6c] ss:$16 sps:$4 sm:$0xff]  }
  0x83   :  { %v5682_v41 = vld [vmem:[%s7341_s3 + $0x3a4] ss:$16 sps:$4 sm:$0xff]   ;;  %v5685_v43 = vld [vmem:[%s7341_s3 + $0x3a0] ss:$16 sps:$4 sm:$0xff]  }
  0x84   :  { %1017 = vmatpush1.bf16.msra.mxu0 %v5654_v22  ;;  %v5686_v44 = vld [vmem:[%s7341_s3 + $0x184] ss:$16 sps:$4 sm:$0xff]   ;;  %v5690_v46 = vld [vmem:[%s7341_s3 + $0x180] ss:$16 sps:$4 sm:$0xff]  }
  0x85   :  { %1070 = vmatpush1.bf16.msra.mxu1 %v5655_v23  ;;  %1018 = vmatprep.subr.bf16.mxu0 %v5656_v24  ;;  %v5688_v45 = vld [vmem:[%s7341_s3 + $0x384] ss:$16 sps:$4 sm:$0xff]   ;;  %v5691_v47 = vld [vmem:[%s7341_s3 + $0x380] ss:$16 sps:$4 sm:$0xff]   ;;  %v7070_v23 = vld [vmem:[%s7338_s0 + $0x2c] ss:$16 sps:$4 sm:$0xff]  }
  0x86   :  { %1071 = vmatprep.subr.bf16.mxu1 %v5658_v25  ;;  %v5692_v48 = vld [vmem:[%s7341_s3 + $0x164] ss:$16 sps:$4 sm:$0xff]   ;;  %v5696_v52 = vld [vmem:[%s7341_s3 + $0x160] ss:$16 sps:$4 sm:$0xff]   ;;  %v5751_v24 = vld [vmem:[%s7341_s3 + $0x26c] ss:$16 sps:$4 sm:$0xff]  }
  0x87   :  { %v6940_v49 = vld [vmem:[%s7338_s0 + $0x4] ss:$16 sps:$4 sm:$0xff]   ;;  %v5697_v53 = vld [vmem:[%s7341_s3 + $0x360] ss:$16 sps:$4 sm:$0xff]   ;;  %v5746_v25 = vld [vmem:[%s7341_s3 + $0x68] ss:$16 sps:$4 sm:$0xff]  }
  0x88   :  { %1019 = vmatpush1.bf16.msra.mxu0 %v5660_v26  ;;  %v5694_v50 = vld [vmem:[%s7341_s3 + $0x364] ss:$16 sps:$4 sm:$0xff]   ;;  %1038 = vmatprep.mubr.bf16.mxu0 %v6940_v49  ;;  %v5702_v56 = vld [vmem:[%s7341_s3 + $0x140] ss:$16 sps:$4 sm:$0xff]   ;;  %v5749_v26 = vld [vmem:[%s7341_s3 + $0x268] ss:$16 sps:$4 sm:$0xff]  }
  0x89   :  { %1072 = vmatpush1.bf16.msra.mxu1 %v5661_v27  ;;  %1020 = vmatprep.subr.bf16.mxu0 %v5662_v28  ;;  %v5698_v54 = vld [vmem:[%s7341_s3 + $0x144] ss:$16 sps:$4 sm:$0xff]   ;;  %v5703_v57 = vld [vmem:[%s7341_s3 + $0x340] ss:$16 sps:$4 sm:$0xff]   ;;  %v7087_v27 = vld [vmem:[%s7338_s0 + $0x28] ss:$16 sps:$4 sm:$0xff]  }
  0x8a   :  { %1073 = vmatprep.subr.bf16.mxu1 %v5664_v29  ;;  %v5700_v55 = vld [vmem:[%s7341_s3 + $0x344] ss:$16 sps:$4 sm:$0xff]   ;;  %v5708_v60 = vld [vmem:[%s7341_s3 + $0x120] ss:$16 sps:$4 sm:$0xff]   ;;  %v5754_v28 = vld [vmem:[%s7341_s3 + $0x4c] ss:$16 sps:$4 sm:$0xff]  }
  0x8b   :  { %v5704_v58 = vld [vmem:[%s7341_s3 + $0x124] ss:$16 sps:$4 sm:$0xff]   ;;  %v5709_v61 = vld [vmem:[%s7341_s3 + $0x320] ss:$16 sps:$4 sm:$0xff]   ;;  %v5757_v29 = vld [vmem:[%s7341_s3 + $0x24c] ss:$16 sps:$4 sm:$0xff]  }
  0x8c   :  { %1021 = vmatpush1.bf16.msra.mxu0 %v5666_v30  ;;  %v5706_v59 = vld [vmem:[%s7341_s3 + $0x324] ss:$16 sps:$4 sm:$0xff]   ;;  %v5714_v0 = vld [vmem:[%s7341_s3 + $0x100] ss:$16 sps:$4 sm:$0xff]   ;;  %v5752_v30 = vld [vmem:[%s7341_s3 + $0x48] ss:$16 sps:$4 sm:$0xff]  }
  0x8d   :  { %1074 = vmatpush1.bf16.msra.mxu1 %v5667_v31  ;;  %1022 = vmatprep.subr.bf16.mxu0 %v5668_v32  ;;  %v5710_v62 = vld [vmem:[%s7341_s3 + $0x104] ss:$16 sps:$4 sm:$0xff]   ;;  %v5715_v1 = vld [vmem:[%s7341_s3 + $0x300] ss:$16 sps:$4 sm:$0xff]   ;;  %v5755_v31 = vld [vmem:[%s7341_s3 + $0x248] ss:$16 sps:$4 sm:$0xff]  }
  0x8e   :  { %1075 = vmatprep.subr.bf16.mxu1 %v5670_v33  ;;  %v5712_v63 = vld [vmem:[%s7341_s3 + $0x304] ss:$16 sps:$4 sm:$0xff]   ;;  %v7003_v4 = vld [vmem:[%s7338_s0] ss:$16 sps:$4 sm:$0xff]   ;;  %v5760_v32 = vld [vmem:[%s7341_s3 + $0x2c] ss:$16 sps:$4 sm:$0xff]  }
  0x8f   :  { %v7060_v21 = vld [vmem:[%s7338_s0 + $0x24] ss:$16 sps:$4 sm:$0xff]   ;;  %v7065_v22 = vld [vmem:[%s7338_s0 + $0x20] ss:$16 sps:$4 sm:$0xff]   ;;  %v5763_v33 = vld [vmem:[%s7341_s3 + $0x22c] ss:$16 sps:$4 sm:$0xff]  }
  0x90   :  { %1023 = vmatpush2.bf16.msra.mxu0 %v5672_v34  ;;  %v5758_v34 = vld [vmem:[%s7341_s3 + $0x28] ss:$16 sps:$4 sm:$0xff]  }
  0x91   :  { %1076 = vmatpush2.bf16.msra.mxu1 %v5673_v35  ;;  %1024 = vmatprep.subr.bf16.mxu0 %v5674_v36  ;;  %v5761_v35 = vld [vmem:[%s7341_s3 + $0x228] ss:$16 sps:$4 sm:$0xff]   ;;  %v5766_v36 = vld [vmem:[%s7341_s3 + $0xc] ss:$16 sps:$4 sm:$0xff]  }
  0x92   :  { %1077 = vmatprep.subr.bf16.mxu1 %v5676_v37  ;;  %v5769_v37 = vld [vmem:[%s7341_s3 + $0x20c] ss:$16 sps:$4 sm:$0xff]  }
  0x94   :  { %1025 = vmatpush2.bf16.msra.mxu0 %v5678_v38  ;;  %v5764_v38 = vld [vmem:[%s7341_s3 + $0x8] ss:$16 sps:$4 sm:$0xff]  }
  0x95   :  { %1078 = vmatpush2.bf16.msra.mxu1 %v5679_v39  ;;  %1026 = vmatprep.subr.bf16.mxu0 %v5680_v40  ;;  %v5767_v39 = vld [vmem:[%s7341_s3 + $0x208] ss:$16 sps:$4 sm:$0xff]   ;;  %v5772_v40 = vld [vmem:[%s7341_s3 + $0x1ec] ss:$16 sps:$4 sm:$0xff]  }
  0x96   :  { %1079 = vmatprep.subr.bf16.mxu1 %v5682_v41  ;;  %v5775_v41 = vld [vmem:[%s7341_s3 + $0x3ec] ss:$16 sps:$4 sm:$0xff]  }
  0x98   :  { %1027 = vmatpush2.bf16.msra.mxu0 %v5684_v42  ;;  %v5770_v42 = vld [vmem:[%s7341_s3 + $0x1e8] ss:$16 sps:$4 sm:$0xff]  }
  0x99   :  { %1080 = vmatpush2.bf16.msra.mxu1 %v5685_v43  ;;  %1028 = vmatprep.subr.bf16.mxu0 %v5686_v44  ;;  %v5773_v43 = vld [vmem:[%s7341_s3 + $0x3e8] ss:$16 sps:$4 sm:$0xff]   ;;  %v5778_v44 = vld [vmem:[%s7341_s3 + $0x1cc] ss:$16 sps:$4 sm:$0xff]  }
  0x9a   :  { %1081 = vmatprep.subr.bf16.mxu1 %v5688_v45  ;;  %v5781_v45 = vld [vmem:[%s7341_s3 + $0x3cc] ss:$16 sps:$4 sm:$0xff]  }
  0x9c   :  { %1029 = vmatpush2.bf16.msra.mxu0 %v5690_v46  ;;  %v5776_v46 = vld [vmem:[%s7341_s3 + $0x1c8] ss:$16 sps:$4 sm:$0xff]  }
  0x9d   :  { %1082 = vmatpush2.bf16.msra.mxu1 %v5691_v47  ;;  %1030 = vmatprep.subr.bf16.mxu0 %v5692_v48  ;;  %v5779_v47 = vld [vmem:[%s7341_s3 + $0x3c8] ss:$16 sps:$4 sm:$0xff]   ;;  %v5784_v48 = vld [vmem:[%s7341_s3 + $0x1ac] ss:$16 sps:$4 sm:$0xff]  }
  0x9e   :  { %1083 = vmatprep.subr.bf16.mxu1 %v5694_v50  ;;  %v5782_v50 = vld [vmem:[%s7341_s3 + $0x1a8] ss:$16 sps:$4 sm:$0xff]  }
  0xa0   :  { %1031 = vmatpush2.bf16.msra.mxu0 %v5696_v52  ;;  %v5795_v52 = vld [vmem:[%s7341_s3 + $0x18c] ss:$16 sps:$4 sm:$0xff]  }
  0xa1   :  { %1084 = vmatpush2.bf16.msra.mxu1 %v5697_v53  ;;  %1032 = vmatprep.subr.bf16.mxu0 %v5698_v54  ;;  %v5798_v53 = vld [vmem:[%s7341_s3 + $0x38c] ss:$16 sps:$4 sm:$0xff]   ;;  %v5793_v54 = vld [vmem:[%s7341_s3 + $0x188] ss:$16 sps:$4 sm:$0xff]  }
  0xa2   :  { %1085 = vmatprep.subr.bf16.mxu1 %v5700_v55  ;;  %v5796_v55 = vld [vmem:[%s7341_s3 + $0x388] ss:$16 sps:$4 sm:$0xff]  }
  0xa4   :  { %1033 = vmatpush2.bf16.msra.mxu0 %v5702_v56  ;;  %v5802_v56 = vld [vmem:[%s7341_s3 + $0x16c] ss:$16 sps:$4 sm:$0xff]  }
  0xa5   :  { %1086 = vmatpush2.bf16.msra.mxu1 %v5703_v57  ;;  %1034 = vmatprep.subr.bf16.mxu0 %v5704_v58  ;;  %v5805_v57 = vld [vmem:[%s7341_s3 + $0x36c] ss:$16 sps:$4 sm:$0xff]   ;;  %v5800_v58 = vld [vmem:[%s7341_s3 + $0x168] ss:$16 sps:$4 sm:$0xff]  }
  0xa6   :  { %1087 = vmatprep.subr.bf16.mxu1 %v5706_v59  ;;  %v5803_v59 = vld [vmem:[%s7341_s3 + $0x368] ss:$16 sps:$4 sm:$0xff]  }
  0xa8   :  { %1035 = vmatpush2.bf16.msra.mxu0 %v5708_v60  ;;  %v5808_v60 = vld [vmem:[%s7341_s3 + $0x14c] ss:$16 sps:$4 sm:$0xff]  }
  0xa9   :  { %1088 = vmatpush2.bf16.msra.mxu1 %v5709_v61  ;;  %1036 = vmatprep.subr.bf16.mxu0 %v5710_v62  ;;  %v5811_v61 = vld [vmem:[%s7341_s3 + $0x34c] ss:$16 sps:$4 sm:$0xff]   ;;  %v5806_v62 = vld [vmem:[%s7341_s3 + $0x148] ss:$16 sps:$4 sm:$0xff]  }
  0xaa   :  { %1089 = vmatprep.subr.bf16.mxu1 %v5712_v63  ;;  %v5809_v63 = vld [vmem:[%s7341_s3 + $0x348] ss:$16 sps:$4 sm:$0xff]  }
  0xac   :  { %1037 = vmatpush2.bf16.msra.mxu0 %v5714_v0  ;;  %v5814_v0 = vld [vmem:[%s7341_s3 + $0x12c] ss:$16 sps:$4 sm:$0xff]  }
  0xad   :  { %1090 = vmatpush2.bf16.msra.mxu1 %v5715_v1  ;;  %1112 = vmatprep.subr.bf16.mxu0 %v5724_v2  ;;  %v5817_v1 = vld [vmem:[%s7341_s3 + $0x32c] ss:$16 sps:$4 sm:$0xff]   ;;  %v5812_v2 = vld [vmem:[%s7341_s3 + $0x128] ss:$16 sps:$4 sm:$0xff]  }
  0xae   :  { %1165 = vmatprep.subr.bf16.mxu1 %v5727_v3  ;;  %v5815_v3 = vld [vmem:[%s7341_s3 + $0x328] ss:$16 sps:$4 sm:$0xff]  }
  0xaf   :  { %1039 = vmatmul.mubr.bf16.vlgmr.msra.gmra.mxu0 %v7003_v4 }
  0xb0   :  { %1092 = vmatmul.mubr.bf16.vlgmr.msra.gmra.mxu1 %v7008_v5  ;;  %1113 = vmatpush1.bf16.msra.mxu0 %v5722_v6  ;;  %v5820_v6 = vld [vmem:[%s7341_s3 + $0x10c] ss:$16 sps:$4 sm:$0xff]  }
  0xb1   :  { %1166 = vmatpush1.bf16.msra.mxu1 %v5725_v7  ;;  %1114 = vmatprep.subr.bf16.mxu0 %v5730_v8  ;;  %v5823_v7 = vld [vmem:[%s7341_s3 + $0x30c] ss:$16 sps:$4 sm:$0xff]   ;;  %v5818_v8 = vld [vmem:[%s7341_s3 + $0x108] ss:$16 sps:$4 sm:$0xff]  }
  0xb2   :  { %1167 = vmatprep.subr.bf16.mxu1 %v5733_v9  ;;  %1048 = vmatprep.mubr.bf16.mxu0 %v7060_v21  ;;  %v5821_v9 = vld [vmem:[%s7341_s3 + $0x308] ss:$16 sps:$4 sm:$0xff]  }
  0xb3   :  { %1101 = vmatprep.mubr.bf16.mxu1 %v7070_v23 }
  0xb4   :  { %1115 = vmatpush1.bf16.msra.mxu0 %v5728_v10  ;;  %v5826_v10 = vld [vmem:[#allocation4 + $0x74] ss:$8 sps:$4 sm:$0xff]  }
  0xb5   :  { %1168 = vmatpush1.bf16.msra.mxu1 %v5731_v11  ;;  %1116 = vmatprep.subr.bf16.mxu0 %v5736_v12  ;;  %v5824_v11 = vld [vmem:[#allocation4 + $0x70] ss:$8 sps:$4 sm:$0xff]   ;;  %v5829_v12 = vld [vmem:[#allocation4 + $0x64] ss:$8 sps:$4 sm:$0xff]  }
  0xb6   :  { %1169 = vmatprep.subr.bf16.mxu1 %v5739_v13  ;;  %v5827_v13 = vld [vmem:[#allocation4 + $0x60] ss:$8 sps:$4 sm:$0xff]  }
  0xb7   :  { %1049 = vmatmul.mubr.bf16.gmra.mxu0 %v7065_v22 }
  0xb8   :  { %1117 = vmatpush1.bf16.msra.mxu0 %v5734_v14  ;;  %1102 = vmatmul.mubr.bf16.gmra.mxu1 %v7087_v27  ;;  %v5832_v14 = vld [vmem:[#allocation4 + $0x54] ss:$8 sps:$4 sm:$0xff]  }
  0xb9   :  { %1170 = vmatpush1.bf16.msra.mxu1 %v5737_v15  ;;  %1118 = vmatprep.subr.bf16.mxu0 %v5742_v16  ;;  %v5830_v15 = vld [vmem:[#allocation4 + $0x50] ss:$8 sps:$4 sm:$0xff]   ;;  %v5835_v16 = vld [vmem:[#allocation4 + $0x44] ss:$8 sps:$4 sm:$0xff]  }
  0xba   :  { %1171 = vmatprep.subr.bf16.mxu1 %v5745_v17  ;;  %1144 = vmatprep.mubr.bf16.mxu0 %v6940_v49  ;;  %v5787_v49 = vld [vmem:[%s7341_s3 + $0x3ac] ss:$16 sps:$4 sm:$0xff]   ;;  %v5836_v17 = vld [vmem:[#allocation4 + $0x30] ss:$8 sps:$4 sm:$0xff]  }
  0xbb   :  { %1197 = vmatprep.mubr.bf16.mxu1 %v6948_v51  ;;  %v5785_v51 = vld [vmem:[%s7341_s3 + $0x3a8] ss:$16 sps:$4 sm:$0xff]  }
  0xbc   :  { %1119 = vmatpush1.bf16.msra.mxu0 %v5740_v18  ;;  %v5841_v18 = vld [vmem:[#allocation4 + $0x24] ss:$8 sps:$4 sm:$0xff]  }
  0xbd   :  { %1172 = vmatpush1.bf16.msra.mxu1 %v5743_v19  ;;  %1120 = vmatprep.subr.bf16.mxu0 %v5748_v20  ;;  %v5874_v19 = vld [vmem:[#allocation4 + $0x174] ss:$8 sps:$4 sm:$0xff]   ;;  %v5872_v20 = vld [vmem:[#allocation4 + $0x170] ss:$8 sps:$4 sm:$0xff]  }
  0xbe   :  { %1173 = vmatprep.subr.bf16.mxu1 %v5751_v24  ;;  %v5880_v24 = vld [vmem:[#allocation4 + $0x154] ss:$8 sps:$4 sm:$0xff]  }
  0xc0   :  { %1121 = vmatpush1.bf16.msra.mxu0 %v5746_v25  ;;  %v5839_v25 = vld [vmem:[#allocation4 + $0x20] ss:$8 sps:$4 sm:$0xff]  }
  0xc1   :  { %1174 = vmatpush1.bf16.msra.mxu1 %v5749_v26  ;;  %1122 = vmatprep.subr.bf16.mxu0 %v5754_v28  ;;  %v5842_v26 = vld [vmem:[#allocation4 + $0x10] ss:$8 sps:$4 sm:$0xff]   ;;  %v5847_v28 = vld [vmem:[#allocation4 + $0x4] ss:$8 sps:$4 sm:$0xff]  }
  0xc2   :  { %1175 = vmatprep.subr.bf16.mxu1 %v5757_v29  ;;  %v5883_v29 = vld [vmem:[#allocation4 + $0x144] ss:$8 sps:$4 sm:$0xff]  }
  0xc4   :  { %1123 = vmatpush1.bf16.msra.mxu0 %v5752_v30  ;;  %v5881_v30 = vld [vmem:[#allocation4 + $0x140] ss:$8 sps:$4 sm:$0xff]  }
  0xc5   :  { %1176 = vmatpush1.bf16.msra.mxu1 %v5755_v31  ;;  %1124 = vmatprep.subr.bf16.mxu0 %v5760_v32  ;;  %v5886_v31 = vld [vmem:[#allocation4 + $0x134] ss:$8 sps:$4 sm:$0xff]   ;;  %v5845_v32 = vld [vmem:[#allocation4] ss:$8 sps:$4 sm:$0xff]  }
  0xc6   :  { %1177 = vmatprep.subr.bf16.mxu1 %v5763_v33  ;;  %v5850_v33 = vld [vmem:[#allocation4 + $0xf4] ss:$8 sps:$4 sm:$0xff]  }
  0xc8   :  { %1125 = vmatpush1.bf16.msra.mxu0 %v5758_v34  ;;  %v5884_v34 = vld [vmem:[#allocation4 + $0x130] ss:$8 sps:$4 sm:$0xff]  }
  0xc9   :  { %1178 = vmatpush1.bf16.msra.mxu1 %v5761_v35  ;;  %1126 = vmatprep.subr.bf16.mxu0 %v5766_v36  ;;  %v5848_v35 = vld [vmem:[#allocation4 + $0xf0] ss:$8 sps:$4 sm:$0xff]   ;;  %v5853_v36 = vld [vmem:[#allocation4 + $0xe4] ss:$8 sps:$4 sm:$0xff]  }
  0xca   :  { %1179 = vmatprep.subr.bf16.mxu1 %v5769_v37  ;;  %v5889_v37 = vld [vmem:[#allocation4 + $0x124] ss:$8 sps:$4 sm:$0xff]  }
  0xcc   :  { %1127 = vmatpush1.bf16.msra.mxu0 %v5764_v38  ;;  %v5887_v38 = vld [vmem:[#allocation4 + $0x120] ss:$8 sps:$4 sm:$0xff]  }
  0xcd   :  { %1180 = vmatpush1.bf16.msra.mxu1 %v5767_v39  ;;  %1128 = vmatprep.subr.bf16.mxu0 %v5772_v40  ;;  %v5892_v39 = vld [vmem:[#allocation4 + $0x114] ss:$8 sps:$4 sm:$0xff]   ;;  %v5851_v40 = vld [vmem:[#allocation4 + $0xe0] ss:$8 sps:$4 sm:$0xff]  }
  0xce   :  { %1181 = vmatprep.subr.bf16.mxu1 %v5775_v41  ;;  %v5856_v41 = vld [vmem:[#allocation4 + $0xd4] ss:$8 sps:$4 sm:$0xff]  }
  0xd0   :  { %1129 = vmatpush2.bf16.msra.mxu0 %v5770_v42  ;;  %v5890_v42 = vld [vmem:[#allocation4 + $0x110] ss:$8 sps:$4 sm:$0xff]  }
  0xd1   :  { %1182 = vmatpush2.bf16.msra.mxu1 %v5773_v43  ;;  %1130 = vmatprep.subr.bf16.mxu0 %v5778_v44  ;;  %v5895_v43 = vld [vmem:[#allocation4 + $0x104] ss:$8 sps:$4 sm:$0xff]   ;;  %v5854_v44 = vld [vmem:[#allocation4 + $0xd0] ss:$8 sps:$4 sm:$0xff]  }
  0xd2   :  { %1183 = vmatprep.subr.bf16.mxu1 %v5781_v45  ;;  %v5859_v45 = vld [vmem:[#allocation4 + $0xc4] ss:$8 sps:$4 sm:$0xff]  }
  0xd4   :  { %1131 = vmatpush2.bf16.msra.mxu0 %v5776_v46  ;;  %v5893_v46 = vld [vmem:[#allocation4 + $0x100] ss:$8 sps:$4 sm:$0xff]  }
  0xd5   :  { %1184 = vmatpush2.bf16.msra.mxu1 %v5779_v47  ;;  %1132 = vmatprep.subr.bf16.mxu0 %v5784_v48  ;;  %v5898_v47 = vld [vmem:[#allocation4 + $0x1f4] ss:$8 sps:$4 sm:$0xff]   ;;  %v5857_v48 = vld [vmem:[#allocation4 + $0xc0] ss:$8 sps:$4 sm:$0xff]  }
  0xd6   :  { %1185 = vmatprep.subr.bf16.mxu1 %v5787_v49  ;;  %v5862_v49 = vld [vmem:[#allocation4 + $0xb4] ss:$8 sps:$4 sm:$0xff]  }
  0xd8   :  { %1133 = vmatpush2.bf16.msra.mxu0 %v5782_v50  ;;  %v5896_v50 = vld [vmem:[#allocation4 + $0x1f0] ss:$8 sps:$4 sm:$0xff]  }
  0xd9   :  { %1186 = vmatpush2.bf16.msra.mxu1 %v5785_v51  ;;  %1134 = vmatprep.subr.bf16.mxu0 %v5795_v52  ;;  %v5901_v51 = vld [vmem:[#allocation4 + $0x1e4] ss:$8 sps:$4 sm:$0xff]   ;;  %v5860_v52 = vld [vmem:[#allocation4 + $0xb0] ss:$8 sps:$4 sm:$0xff]  }
  0xda   :  { %1187 = vmatprep.subr.bf16.mxu1 %v5798_v53  ;;  %v5865_v53 = vld [vmem:[#allocation4 + $0xa4] ss:$8 sps:$4 sm:$0xff]  }
  0xdc   :  { %1135 = vmatpush2.bf16.msra.mxu0 %v5793_v54  ;;  %v5899_v54 = vld [vmem:[#allocation4 + $0x1e0] ss:$8 sps:$4 sm:$0xff]  }
  0xdd   :  { %1188 = vmatpush2.bf16.msra.mxu1 %v5796_v55  ;;  %1136 = vmatprep.subr.bf16.mxu0 %v5802_v56  ;;  %v5904_v55 = vld [vmem:[#allocation4 + $0x1d4] ss:$8 sps:$4 sm:$0xff]   ;;  %v5863_v56 = vld [vmem:[#allocation4 + $0xa0] ss:$8 sps:$4 sm:$0xff]  }
  0xde   :  { %1189 = vmatprep.subr.bf16.mxu1 %v5805_v57  ;;  %v5868_v57 = vld [vmem:[#allocation4 + $0x94] ss:$8 sps:$4 sm:$0xff]  }
  0xe0   :  { %1137 = vmatpush2.bf16.msra.mxu0 %v5800_v58  ;;  %v5902_v58 = vld [vmem:[#allocation4 + $0x1d0] ss:$8 sps:$4 sm:$0xff]  }
  0xe1   :  { %1190 = vmatpush2.bf16.msra.mxu1 %v5803_v59  ;;  %1138 = vmatprep.subr.bf16.mxu0 %v5808_v60  ;;  %v5907_v59 = vld [vmem:[#allocation4 + $0x1c4] ss:$8 sps:$4 sm:$0xff]   ;;  %v5866_v60 = vld [vmem:[#allocation4 + $0x90] ss:$8 sps:$4 sm:$0xff]  }
  0xe2   :  { %1191 = vmatprep.subr.bf16.mxu1 %v5811_v61  ;;  %v5871_v61 = vld [vmem:[#allocation4 + $0x84] ss:$8 sps:$4 sm:$0xff]  }
  0xe4   :  { %1139 = vmatpush2.bf16.msra.mxu0 %v5806_v62  ;;  %v5905_v62 = vld [vmem:[#allocation4 + $0x1c0] ss:$8 sps:$4 sm:$0xff]  }
  0xe5   :  { %1192 = vmatpush2.bf16.msra.mxu1 %v5809_v63  ;;  %1140 = vmatprep.subr.bf16.mxu0 %v5814_v0  ;;  %v5910_v63 = vld [vmem:[#allocation4 + $0x1b4] ss:$8 sps:$4 sm:$0xff]   ;;  %v5869_v0 = vld [vmem:[#allocation4 + $0x80] ss:$8 sps:$4 sm:$0xff]  }
  0xe6   :  { %1193 = vmatprep.subr.bf16.mxu1 %v5817_v1  ;;  %v5908_v1 = vld [vmem:[#allocation4 + $0x1b0] ss:$8 sps:$4 sm:$0xff]  }
  0xe8   :  { %1141 = vmatpush2.bf16.msra.mxu0 %v5812_v2  ;;  %v5913_v2 = vld [vmem:[#allocation4 + $0x1a4] ss:$8 sps:$4 sm:$0xff]  }
  0xe9   :  { %1194 = vmatpush2.bf16.msra.mxu1 %v5815_v3  ;;  %1142 = vmatprep.subr.bf16.mxu0 %v5820_v6  ;;  %v5911_v3 = vld [vmem:[#allocation4 + $0x1a0] ss:$8 sps:$4 sm:$0xff]   ;;  %v5916_v6 = vld [vmem:[#allocation4 + $0x194] ss:$8 sps:$4 sm:$0xff]  }
  0xea   :  { %1195 = vmatprep.subr.bf16.mxu1 %v5823_v7  ;;  %v5914_v7 = vld [vmem:[#allocation4 + $0x190] ss:$8 sps:$4 sm:$0xff]  }
  0xec   :  { %1143 = vmatpush2.bf16.msra.mxu0 %v5818_v8  ;;  %v5919_v8 = vld [vmem:[#allocation4 + $0x184] ss:$8 sps:$4 sm:$0xff]  }
  0xed   :  { %1196 = vmatpush2.bf16.msra.mxu1 %v5821_v9  ;;  %1639 = vmatprep.subr.bf16.mxu0 %v5826_v10  ;;  %v5917_v9 = vld [vmem:[#allocation4 + $0x180] ss:$8 sps:$4 sm:$0xff]   ;;  %v5922_v10 = vld [vmem:[#allocation6 + $0x74] ss:$8 sps:$4 sm:$0xff]  }
  0xee   :  { %1692 = vmatprep.subr.bf16.mxu1 %v5874_v19 }
  0xef   :  { %1145 = vmatmul.mubr.bf16.vlgmr.msra.gmra.mxu0 %v7003_v4  ;;  %v5833_v4 = vld [vmem:[#allocation4 + $0x40] ss:$8 sps:$4 sm:$0xff]  }
  0xf0   :  { %1198 = vmatmul.mubr.bf16.vlgmr.msra.gmra.mxu1 %v7008_v5  ;;  %1154 = vmatprep.mubr.bf16.mxu0 %v7060_v21  ;;  %v5838_v5 = vld [vmem:[#allocation4 + $0x34] ss:$8 sps:$4 sm:$0xff]   ;;  %v5875_v21 = vld [vmem:[#allocation4 + $0x160] ss:$8 sps:$4 sm:$0xff]  }
  0xf1   :  { %1207 = vmatprep.mubr.bf16.mxu1 %v7070_v23  ;;  %1640 = vmatpush1.bf16.msra.mxu0 %v5824_v11  ;;  %v5877_v23 = vld [vmem:[#allocation4 + $0x164] ss:$8 sps:$4 sm:$0xff]   ;;  %v346_v11 = vlaneseq }
  0xf2   :  { %1641 = vmatprep.subr.bf16.mxu0 %v5829_v12  ;;  %1693 = vmatpush1.bf16.msra.mxu1 %v5872_v20 }
  0xf3   :  { %1694 = vmatprep.subr.bf16.mxu1 %v5877_v23  ;;  %v347_v12 = vshrl.u32 %v346_v11, 7 }
  0xf5   :  { %1642 = vmatpush1.bf16.msra.mxu0 %v5827_v13  ;;  %v344_v13 = vld [vmem:[#allocation2] ss:$8 sm:$0xf] }
  0xf6   :  { %1643 = vmatprep.subr.bf16.mxu0 %v5832_v14  ;;  %1695 = vmatpush1.bf16.msra.mxu1 %v5875_v21  ;;  %v7230_v14 = vsub.s32 1, %v347_v12 }
  0xf7   :  { %1155 = vmatmul.mubr.bf16.gmra.mxu0 %v7065_v22  ;;  %v5844_v22 = vld [vmem:[#allocation4 + $0x14] ss:$8 sps:$4 sm:$0xff]   ;;  %1696 = vmatprep.subr.bf16.mxu1 %v5880_v24 }
  0xf8   :  { %1208 = vmatmul.mubr.bf16.gmra.mxu1 %v7087_v27  ;;  %v5878_v27 = vld [vmem:[#allocation4 + $0x150] ss:$8 sps:$4 sm:$0xff]  }
  0xf9   :  { %1644 = vmatpush1.bf16.msra.mxu0 %v5830_v15  ;;  %v7232_v15 = vsub.s32 0, %v347_v12 }
  0xfa   :  { %1645 = vmatprep.subr.bf16.mxu0 %v5835_v16  ;;  %1697 = vmatpush1.bf16.msra.mxu1 %v5878_v27  ;;  %v353_v16 = vrot.slane %v344_v13, %v7230_v14 }
  0xfb   :  { %1698 = vmatprep.subr.bf16.mxu1 %v5883_v29 }
  0xfd   :  { %1646 = vmatpush1.bf16.msra.mxu0 %v5833_v4  ;;  %v349_v4 = vrot.slane %v344_v13, %v7232_v15 }
  0xfe   :  { %1647 = vmatprep.subr.bf16.mxu0 %v5838_v5  ;;  %1699 = vmatpush1.bf16.msra.mxu1 %v5881_v30 }
  0xff   :  { %1700 = vmatprep.subr.bf16.mxu1 %v5886_v31 }
 0x101   :  { %1648 = vmatpush1.bf16.msra.mxu0 %v5836_v17 }
 0x102   :  { %1649 = vmatprep.subr.bf16.mxu0 %v5841_v18  ;;  %1701 = vmatpush1.bf16.msra.mxu1 %v5884_v34 }
 0x103   :  { %1702 = vmatprep.subr.bf16.mxu1 %v5889_v37 }
 0x105   :  { %1650 = vmatpush1.bf16.msra.mxu0 %v5839_v25 }
 0x106   :  { %1651 = vmatprep.subr.bf16.mxu0 %v5844_v22  ;;  %1703 = vmatpush1.bf16.msra.mxu1 %v5887_v38 }
 0x107   :  { %1704 = vmatprep.subr.bf16.mxu1 %v5892_v39 }
 0x109   :  { %1652 = vmatpush1.bf16.msra.mxu0 %v5842_v26 }
 0x10a   :  { %1653 = vmatprep.subr.bf16.mxu0 %v5847_v28  ;;  %1705 = vmatpush1.bf16.msra.mxu1 %v5890_v42 }
 0x10b   :  { %1706 = vmatprep.subr.bf16.mxu1 %v5895_v43 }
 0x10d   :  { %1654 = vmatpush1.bf16.msra.mxu0 %v5845_v32 }
 0x10e   :  { %1655 = vmatprep.subr.bf16.mxu0 %v5850_v33  ;;  %1707 = vmatpush1.bf16.msra.mxu1 %v5893_v46 }
 0x10f   :  { %1708 = vmatprep.subr.bf16.mxu1 %v5898_v47 }
 0x111   :  { %1656 = vmatpush2.bf16.msra.mxu0 %v5848_v35 }
 0x112   :  { %1657 = vmatprep.subr.bf16.mxu0 %v5853_v36  ;;  %1709 = vmatpush2.bf16.msra.mxu1 %v5896_v50 }
 0x113   :  { %1710 = vmatprep.subr.bf16.mxu1 %v5901_v51 }
 0x115   :  { %1658 = vmatpush2.bf16.msra.mxu0 %v5851_v40 }
 0x116   :  { %1659 = vmatprep.subr.bf16.mxu0 %v5856_v41  ;;  %1711 = vmatpush2.bf16.msra.mxu1 %v5899_v54 }
 0x117   :  { %1712 = vmatprep.subr.bf16.mxu1 %v5904_v55 }
 0x119   :  { %1660 = vmatpush2.bf16.msra.mxu0 %v5854_v44 }
 0x11a   :  { %1661 = vmatprep.subr.bf16.mxu0 %v5859_v45  ;;  %1713 = vmatpush2.bf16.msra.mxu1 %v5902_v58 }
 0x11b   :  { %1714 = vmatprep.subr.bf16.mxu1 %v5907_v59 }
 0x11d   :  { %1662 = vmatpush2.bf16.msra.mxu0 %v5857_v48 }
 0x11e   :  { %1663 = vmatprep.subr.bf16.mxu0 %v5862_v49  ;;  %1715 = vmatpush2.bf16.msra.mxu1 %v5905_v62 }
 0x11f   :  { %1716 = vmatprep.subr.bf16.mxu1 %v5910_v63 }
 0x121   :  { %1664 = vmatpush2.bf16.msra.mxu0 %v5860_v52 }
 0x122   :  { %1665 = vmatprep.subr.bf16.mxu0 %v5865_v53  ;;  %1717 = vmatpush2.bf16.msra.mxu1 %v5908_v1 }
 0x123   :  { %1718 = vmatprep.subr.bf16.mxu1 %v5913_v2 }
 0x125   :  { %1666 = vmatpush2.bf16.msra.mxu0 %v5863_v56 }
 0x126   :  { %1667 = vmatprep.subr.bf16.mxu0 %v5868_v57  ;;  %1719 = vmatpush2.bf16.msra.mxu1 %v5911_v3 }
 0x127   :  { %1720 = vmatprep.subr.bf16.mxu1 %v5916_v6 }
 0x129   :  { %1668 = vmatpush2.bf16.msra.mxu0 %v5866_v60  ;;  %v7236_v60 = vsub.s32 3, %v347_v12 }
 0x12a   :  { %1669 = vmatprep.subr.bf16.mxu0 %v5871_v61  ;;  %1721 = vmatpush2.bf16.msra.mxu1 %v5914_v7  ;;  %v7238_v61 = vsub.s32 2, %v347_v12 }
 0x12b   :  { %1722 = vmatprep.subr.bf16.mxu1 %v5919_v8  ;;  %v361_v62 = vrot.slane %v344_v13, %v7236_v60 }
 0x12c   :  { %v357_v63 = vrot.slane %v344_v13, %v7238_v61 }
 0x12d   :  { %1670 = vmatpush2.bf16.msra.mxu0 %v5869_v0 }
 0x12e   :  { %1723 = vmatpush2.bf16.msra.mxu1 %v5917_v9 }
 0x12f   :  { %2156 = vmatprep.subr.bf16.mxu1 %v5922_v10 }
 0x16f   :  { %v1040_v5 = vpop.f32.mrf.mxu0 }
 0x170   :  { %v1093_v17 = vpop.f32.mrf.mxu1  ;;  %v1041_v21 = vadd.f32 %v1040_v5, %v349_v4 }
 0x171   :  { %v1042_v18 = vpop.f32.mrf.mxu0 }
 0x172   :  { %v1095_v19 = vpop.f32.mrf.mxu1  ;;  %v1043_v20 = vadd.f32 %v1042_v18, %v353_v16  ;;  %v1094_v29 = vadd.f32 %v1093_v17, %v1041_v21 }
 0x173   :  { %v1044_v23 = vpop.f32.mrf.mxu0 }
 0x174   :  { %v1097_v24 = vpop.f32.mrf.mxu1  ;;  %v1045_v25 = vadd.f32 %v1044_v23, %v349_v4  ;;  %v1096_v26 = vadd.f32 %v1095_v19, %v1043_v20  ;;  %v1218_v35 = vmax.f32 %v1094_v29, 0.0 }
 0x175   :  { %v1046_v22 = vpop.f32.mrf.mxu0 }
 0x176   :  { %v1098_v27 = vadd.f32 %v1097_v24, %v1045_v25  ;;  %v1047_v28 = vadd.f32 %v1046_v22, %v353_v16  ;;  %v1099_v30 = vpop.f32.mrf.mxu1  ;;  %v1219_v33 = vmax.f32 %v1096_v26, 0.0 }
 0x177   :  { %v1050_v36 = vpop.f32.mrf.mxu0 }
 0x178   :  { %v1100_v31 = vadd.f32 %v1099_v30, %v1047_v28  ;;  %v1222_v32 = vmax.f32 %v1098_v27, 0.0  ;;  %v1051_v38 = vadd.f32 %v1050_v36, %v349_v4  ;;  %v1103_v42 = vpop.f32.mrf.mxu1 }
 0x179   :  { %v1052_v40 = vpop.f32.mrf.mxu0 }
 0x17a   :  { %v1223_v34 = vmax.f32 %v1100_v31, 0.0  ;;  %v1234_v39 = vpack.c.bf16 %v1222_v32, %v1218_v35  ;;  %v1053_v41 = vadd.f32 %v1052_v40, %v353_v16  ;;  %v1104_v43 = vadd.f32 %v1103_v42, %v1051_v38  ;;  %v1105_v46 = vpop.f32.mrf.mxu1  ;;  %v5925_v38 = vld [vmem:[#allocation6 + $0x64] ss:$8 sps:$4 sm:$0xff]  }
 0x17b   :  { %v1054_v44 = vpop.f32.mrf.mxu0 }
 0x17c   :  { %v1235_v37 = vpack.c.bf16 %v1223_v34, %v1219_v33  ;;  %v1055_v45 = vadd.f32 %v1054_v44, %v349_v4  ;;  %v1106_v47 = vadd.f32 %v1105_v46, %v1053_v41  ;;  %v1107_v50 = vpop.f32.mrf.mxu1  ;;  %v1226_v51 = vmax.f32 %v1104_v43, 0.0  ;;  %v5920_v34 = vld [vmem:[#allocation6 + $0x70] ss:$8 sps:$4 sm:$0xff]   ;;  %v5928_v46 = vld [vmem:[#allocation6 + $0x54] ss:$8 sps:$4 sm:$0xff]  }
 0x17d   :  { %v1056_v48 = vpop.f32.mrf.mxu0 }
 0x17e   :  { %1671 = vmatprep.mubr.bf16.mxu0 %v1235_v37  ;;  %v1057_v49 = vadd.f32 %v1056_v48, %v353_v16  ;;  %v1108_v52 = vadd.f32 %v1107_v50, %v1055_v45  ;;  %v1109_v53 = vpop.f32.mrf.mxu1  ;;  %v1227_v54 = vmax.f32 %v1106_v47, 0.0  ;;  %v5923_v45 = vld [vmem:[#allocation6 + $0x60] ss:$8 sps:$4 sm:$0xff]   ;;  %v5926_v50 = vld [vmem:[#allocation6 + $0x50] ss:$8 sps:$4 sm:$0xff]  }
 0x17f   :  { %1672 = vmatmul.mubr.bf16.vlgmr.msra.gmra.mxu0 %v1234_v39 }
 0x180   :  { %v1230_v55 = vmax.f32 %v1108_v52, 0.0  ;;  %v1110_v56 = vadd.f32 %v1109_v53, %v1057_v49  ;;  %v5931_v52 = vld [vmem:[#allocation6 + $0x44] ss:$8 sps:$4 sm:$0xff]   ;;  %v5929_v53 = vld [vmem:[#allocation6 + $0x40] ss:$8 sps:$4 sm:$0xff]  }
 0x182   :  { %v1231_v57 = vmax.f32 %v1110_v56, 0.0  ;;  %v1238_v58 = vpack.c.bf16 %v1230_v55, %v1226_v51  ;;  %v5970_v51 = vld [vmem:[%s7339_s1 + $0x4] ss:$8 sps:$4 sm:$0xff]   ;;  %v5932_v55 = vld [vmem:[#allocation6 + $0x30] ss:$8 sps:$4 sm:$0xff]  }
 0x183   :  { %v5937_v56 = vld [vmem:[#allocation6 + $0x24] ss:$8 sps:$4 sm:$0xff]  }
 0x184   :  { %v1239_v59 = vpack.c.bf16 %v1231_v57, %v1227_v54  ;;  %v5934_v54 = vld [vmem:[#allocation6 + $0x34] ss:$8 sps:$4 sm:$0xff]  }
 0x185   :  { %v5971_v57 = vld [vmem:[%s7343_s5 + $0x78] sm:$0xff]  }
 0x186   :  { %1681 = vmatprep.mubr.bf16.mxu0 %v1239_v59  ;;  %v5940_v59 = vld [vmem:[#allocation6 + $0x14] ss:$8 sps:$4 sm:$0xff]   ;;  %5499 = vmatprep.subr.bf16.mxu0 %v5971_v57 }
 0x187   :  { %1682 = vmatmul.mubr.bf16.gmra.mxu0 %v1238_v58  ;;  %v5935_v58 = vld [vmem:[#allocation6 + $0x20] ss:$8 sps:$4 sm:$0xff]  }
 0x1af   :  { %v1146_v0 = vpop.f32.mrf.mxu0 }
 0x1b0   :  { %v1199_v1 = vpop.f32.mrf.mxu1  ;;  %v1147_v7 = vadd.f32 %v1146_v0, %v357_v63  ;;  %v5974_v0 = vld [vmem:[%s7343_s5 + $0x30] sm:$0xff]  }
 0x1b1   :  { %v1148_v2 = vpop.f32.mrf.mxu0 }
 0x1b2   :  { %v1201_v3 = vpop.f32.mrf.mxu1  ;;  %v1149_v6 = vadd.f32 %v1148_v2, %v361_v62  ;;  %v1200_v12 = vadd.f32 %v1199_v1, %v1147_v7  ;;  %v5938_v1 = vld [vmem:[#allocation6 + $0x10] ss:$8 sps:$4 sm:$0xff]   ;;  %v5975_v2 = vld [vmem:[%s7343_s5 + $0x68] sm:$0xff]  }
 0x1b3   :  { %v1150_v8 = vpop.f32.mrf.mxu0  ;;  %v5941_v7 = vld [vmem:[#allocation6] ss:$8 sps:$4 sm:$0xff]  }
 0x1b4   :  { %v1203_v9 = vpop.f32.mrf.mxu1  ;;  %v1151_v10 = vadd.f32 %v1150_v8, %v357_v63  ;;  %v1202_v4 = vadd.f32 %v1201_v3, %v1149_v6  ;;  %v1220_v27 = vmax.f32 %v1200_v12, 0.0  ;;  %v5943_v3 = vld [vmem:[#allocation6 + $0x4] ss:$8 sps:$4 sm:$0xff]   ;;  %v5952_v12 = vld [vmem:[#allocation6 + $0xd4] ss:$8 sps:$4 sm:$0xff]  }
 0x1b5   :  { %v1152_v11 = vpop.f32.mrf.mxu0  ;;  %v5976_v6 = vld [vmem:[%s7343_s5 + $0x28] sm:$0xff]   ;;  %v5977_v8 = vld [vmem:[%s7343_s5 + $0x60] sm:$0xff]  }
 0x1b6   :  { %v1205_v16 = vpop.f32.mrf.mxu1  ;;  %v1204_v5 = vadd.f32 %v1203_v9, %v1151_v10  ;;  %v1153_v17 = vadd.f32 %v1152_v11, %v361_v62  ;;  %v1221_v25 = vmax.f32 %v1202_v4, 0.0  ;;  %v5946_v9 = vld [vmem:[#allocation6 + $0xf4] ss:$8 sps:$4 sm:$0xff]   ;;  %v5978_v10 = vld [vmem:[%s7343_s5 + $0x20] sm:$0xff]   ;;  %v5944_v11 = vld [vmem:[#allocation6 + $0xf0] ss:$8 sps:$4 sm:$0xff]  }
 0x1b7   :  { %v1156_v18 = vpop.f32.mrf.mxu0  ;;  %v5949_v4 = vld [vmem:[#allocation6 + $0xe4] ss:$8 sps:$4 sm:$0xff]  }
 0x1b8   :  { %v1209_v19 = vpop.f32.mrf.mxu1  ;;  %v1206_v20 = vadd.f32 %v1205_v16, %v1153_v17  ;;  %v1157_v21 = vadd.f32 %v1156_v18, %v357_v63  ;;  %v1224_v13 = vmax.f32 %v1204_v5, 0.0  ;;  %v5979_v16 = vld [vmem:[%s7343_s5 + $0x58] sm:$0xff]   ;;  %v5947_v17 = vld [vmem:[#allocation6 + $0xe0] ss:$8 sps:$4 sm:$0xff]  }
 0x1b9   :  { %v1158_v23 = vpop.f32.mrf.mxu0  ;;  %v5980_v5 = vld [vmem:[%s7343_s5 + $0x18] sm:$0xff]  }
 0x1ba   :  { %v1211_v24 = vpop.f32.mrf.mxu1  ;;  %v1225_v22 = vmax.f32 %v1206_v20, 0.0  ;;  %v1159_v26 = vadd.f32 %v1158_v23, %v361_v62  ;;  %v1210_v28 = vadd.f32 %v1209_v19, %v1157_v21  ;;  %v1236_v35 = vpack.c.bf16 %v1224_v13, %v1220_v27  ;;  %v5950_v18 = vld [vmem:[#allocation6 + $0xd0] ss:$8 sps:$4 sm:$0xff]   ;;  %v5955_v19 = vld [vmem:[#allocation6 + $0xc4] ss:$8 sps:$4 sm:$0xff]  }
 0x1bb   :  { %v1160_v29 = vpop.f32.mrf.mxu0  ;;  %v5953_v20 = vld [vmem:[#allocation6 + $0xc0] ss:$8 sps:$4 sm:$0xff]   ;;  %v5958_v21 = vld [vmem:[#allocation6 + $0xb4] ss:$8 sps:$4 sm:$0xff]   ;;  %v5956_v13 = vld [vmem:[#allocation6 + $0xb0] ss:$8 sps:$4 sm:$0xff]  }
 0x1bc   :  { %v1213_v30 = vpop.f32.mrf.mxu1  ;;  %v1237_v31 = vpack.c.bf16 %v1225_v22, %v1221_v25  ;;  %v1161_v32 = vadd.f32 %v1160_v29, %v357_v63  ;;  %v1212_v33 = vadd.f32 %v1211_v24, %v1159_v26  ;;  %v1228_v41 = vmax.f32 %v1210_v28, 0.0  ;;  %v5973_v63 = vld [vmem:[%s7343_s5 + $0x70] sm:$0xff]   ;;  %v5961_v23 = vld [vmem:[#allocation6 + $0xa4] ss:$8 sps:$4 sm:$0xff]   ;;  %v5959_v24 = vld [vmem:[#allocation6 + $0xa0] ss:$8 sps:$4 sm:$0xff]  }
 0x1bd   :  { %v1162_v36 = vpop.f32.mrf.mxu0  ;;  %v5964_v25 = vld [vmem:[#allocation6 + $0x94] ss:$8 sps:$4 sm:$0xff]   ;;  %v5962_v22 = vld [vmem:[#allocation6 + $0x90] ss:$8 sps:$4 sm:$0xff]   ;;  %v5967_v26 = vld [vmem:[#allocation6 + $0x84] ss:$8 sps:$4 sm:$0xff]  }
 0x1be   :  { %v1215_v37 = vpop.f32.mrf.mxu1  ;;  %v1163_v39 = vadd.f32 %v1162_v36, %v361_v62  ;;  %v1214_v40 = vadd.f32 %v1213_v30, %v1161_v32  ;;  %1724 = vmatprep.mubr.bf16.mxu1 %v1237_v31  ;;  %v1229_v42 = vmax.f32 %v1212_v33, 0.0  ;;  %v5972_v62 = vld [vmem:[%s7343_s5 + $0x38] sm:$0xff]   ;;  %v5965_v27 = vld [vmem:[#allocation6 + $0x80] ss:$8 sps:$4 sm:$0xff]   ;;  %v5981_v29 = vld [vmem:[%s7343_s5 + $0x50] sm:$0xff]  }
 0x1bf   :  { %1725 = vmatmul.mubr.bf16.vlgmr.msra.gmra.mxu1 %v1236_v35  ;;  %5500 = vmatpush3.bf16.msra.mxu0 %v5972_v62  ;;  %v5968_v28 = vld [vmem:[%s7339_s1] ss:$8 sps:$4 sm:$0xff]   ;;  %v5982_v30 = vld [vmem:[%s7343_s5 + $0x10] sm:$0xff]   ;;  %v5987_v35 = vld [vmem:[#allocation7 + $0x78] sm:$0xff]  }
 0x1c0   :  { %v1232_v43 = vmax.f32 %v1214_v40, 0.0  ;;  %v1216_v44 = vadd.f32 %v1215_v37, %v1163_v39  ;;  %2157 = vmatpush1.bf16.msra.mxu1 %v5920_v34  ;;  %5501 = vmatprep.subr.bf16.mxu0 %v5973_v63  ;;  %v5983_v31 = vld [vmem:[%s7343_s5 + $0x48] sm:$0xff]   ;;  %v5985_v33 = vld [vmem:[%s7343_s5 + $0x40] sm:$0xff]  }
 0x1c1   :  { %2158 = vmatprep.subr.bf16.mxu1 %v5925_v38  ;;  %v5984_v32 = vld [vmem:[%s7343_s5 + $0x8] sm:$0xff]   ;;  %v5986_v34 = vld [vmem:[%s7343_s5] sm:$0xff]  }
 0x1c2   :  { %v1233_v47 = vmax.f32 %v1216_v44, 0.0  ;;  %v1240_v48 = vpack.c.bf16 %v1232_v43, %v1228_v41  ;;  %v6003_v36 = vld [vmem:[#allocation10 + $0xe0] ss:$16 sps:$4 sm:$0xff]   ;;  %v6005_v37 = vld [vmem:[#allocation10 + $0xe4] ss:$16 sps:$4 sm:$0xff]  }
 0x1c3   :  { %5502 = vmatpush3.bf16.msra.mxu0 %v5974_v0  ;;  %v6008_v38 = vld [vmem:[#allocation10 + $0xc4] ss:$16 sps:$4 sm:$0xff]   ;;  %v6006_v39 = vld [vmem:[#allocation10 + $0xc0] ss:$16 sps:$4 sm:$0xff]  }
 0x1c4   :  { %v1241_v49 = vpack.c.bf16 %v1233_v47, %v1229_v42  ;;  %2159 = vmatpush1.bf16.msra.mxu1 %v5923_v45  ;;  %5503 = vmatprep.subr.bf16.mxu0 %v5975_v2  ;;  %v6011_v40 = vld [vmem:[#allocation10 + $0xa4] ss:$16 sps:$4 sm:$0xff]   ;;  %v6009_v41 = vld [vmem:[#allocation10 + $0xa0] ss:$16 sps:$4 sm:$0xff]  }
 0x1c5   :  { %2160 = vmatprep.subr.bf16.mxu1 %v5928_v46  ;;  %v6014_v42 = vld [vmem:[#allocation10 + $0x84] ss:$16 sps:$4 sm:$0xff]   ;;  %v6012_v43 = vld [vmem:[#allocation10 + $0x80] ss:$16 sps:$4 sm:$0xff]  }
 0x1c6   :  { %1734 = vmatprep.mubr.bf16.mxu1 %v1241_v49  ;;  %v6017_v44 = vld [vmem:[#allocation10 + $0x64] ss:$16 sps:$4 sm:$0xff]   ;;  %v6015_v45 = vld [vmem:[#allocation10 + $0x60] ss:$16 sps:$4 sm:$0xff]  }
 0x1c7   :  { %1735 = vmatmul.mubr.bf16.gmra.mxu1 %v1240_v48  ;;  %5504 = vmatpush3.bf16.msra.mxu0 %v5976_v6  ;;  %v6020_v46 = vld [vmem:[#allocation10 + $0x44] ss:$16 sps:$4 sm:$0xff]   ;;  %v6018_v47 = vld [vmem:[#allocation10 + $0x40] ss:$16 sps:$4 sm:$0xff]  }
 0x1c8   :  { %2161 = vmatpush1.bf16.msra.mxu1 %v5926_v50  ;;  %2188 = vmatprep.mubr.bf16.mxu1 %v5970_v51  ;;  %v6023_v48 = vld [vmem:[#allocation10 + $0x24] ss:$16 sps:$4 sm:$0xff]   ;;  %v6021_v49 = vld [vmem:[#allocation10 + $0x20] ss:$16 sps:$4 sm:$0xff]  }
 0x1c9   :  { %2162 = vmatprep.subr.bf16.mxu1 %v5931_v52  ;;  %5505 = vmatprep.subr.bf16.mxu0 %v5977_v8  ;;  %v6026_v50 = vld [vmem:[#allocation10 + $0x4] ss:$16 sps:$4 sm:$0xff]   ;;  %v6024_v51 = vld [vmem:[#allocation10] ss:$16 sps:$4 sm:$0xff]  }
 0x1ca   :  { %v6029_v52 = vld [vmem:[#allocation10 + $0x1e4] ss:$16 sps:$4 sm:$0xff]   ;;  %v1307_v62 = vld [vmem:[#allocation2 + $0x1] ss:$8 sm:$0x3] }
 0x1cb   :  { %5506 = vmatpush3.bf16.msra.mxu0 %v5978_v10  ;;  %v1316_v0 = vrot.slane %v1307_v62, %v7230_v14 }
 0x1cc   :  { %2163 = vmatpush1.bf16.msra.mxu1 %v5929_v53  ;;  %5507 = vmatprep.subr.bf16.mxu0 %v5979_v16  ;;  %v6027_v53 = vld [vmem:[#allocation10 + $0x1e0] ss:$16 sps:$4 sm:$0xff]  }
 0x1cd   :  { %2164 = vmatprep.subr.bf16.mxu1 %v5934_v54  ;;  %v6032_v54 = vld [vmem:[#allocation10 + $0x1c4] ss:$16 sps:$4 sm:$0xff]  }
 0x1cf   :  { %5508 = vmatpush3.bf16.msra.mxu0 %v5980_v5 }
 0x1d0   :  { %2165 = vmatpush1.bf16.msra.mxu1 %v5932_v55  ;;  %5509 = vmatprep.subr.bf16.mxu0 %v5981_v29 }
 0x1d1   :  { %2166 = vmatprep.subr.bf16.mxu1 %v5937_v56  ;;  %v6030_v56 = vld [vmem:[#allocation10 + $0x1c0] ss:$16 sps:$4 sm:$0xff]  }
 0x1d3   :  { %5510 = vmatpush3.bf16.msra.mxu0 %v5982_v30 }
 0x1d4   :  { %2167 = vmatpush1.bf16.msra.mxu1 %v5935_v58  ;;  %5511 = vmatprep.subr.bf16.mxu0 %v5983_v31 }
 0x1d5   :  { %2168 = vmatprep.subr.bf16.mxu1 %v5940_v59 }
 0x1d7   :  { %5512 = vmatpush3.bf16.msra.mxu0 %v5984_v32  ;;  %v5989_v32 = vld [vmem:[#allocation7 + $0x70] sm:$0xff]  }
 0x1d8   :  { %2169 = vmatpush1.bf16.msra.mxu1 %v5938_v1  ;;  %5513 = vmatprep.subr.bf16.mxu0 %v5985_v33  ;;  %v1312_v1 = vrot.slane %v1307_v62, %v7232_v15 }
 0x1d9   :  { %2170 = vmatprep.subr.bf16.mxu1 %v5943_v3 }
 0x1db   :  { %5514 = vmatpush3.bf16.msra.mxu0 %v5986_v34 }
 0x1dc   :  { %2171 = vmatpush1.bf16.msra.mxu1 %v5941_v7  ;;  %5527 = vmatprep.subr.bf16.mxu0 %v5987_v35 }
 0x1dd   :  { %2172 = vmatprep.subr.bf16.mxu1 %v5946_v9 }
 0x1e0   :  { %2173 = vmatpush2.bf16.msra.mxu1 %v5944_v11 }
 0x1e1   :  { %2174 = vmatprep.subr.bf16.mxu1 %v5949_v4 }
 0x1e4   :  { %2175 = vmatpush2.bf16.msra.mxu1 %v5947_v17 }
 0x1e5   :  { %2176 = vmatprep.subr.bf16.mxu1 %v5952_v12 }
 0x1e8   :  { %2177 = vmatpush2.bf16.msra.mxu1 %v5950_v18 }
 0x1e9   :  { %2178 = vmatprep.subr.bf16.mxu1 %v5955_v19 }
 0x1ec   :  { %2179 = vmatpush2.bf16.msra.mxu1 %v5953_v20 }
 0x1ed   :  { %2180 = vmatprep.subr.bf16.mxu1 %v5958_v21 }
 0x1f0   :  { %2181 = vmatpush2.bf16.msra.mxu1 %v5956_v13 }
 0x1f1   :  { %2182 = vmatprep.subr.bf16.mxu1 %v5961_v23 }
 0x1f4   :  { %2183 = vmatpush2.bf16.msra.mxu1 %v5959_v24 }
 0x1f5   :  { %2184 = vmatprep.subr.bf16.mxu1 %v5964_v25 }
 0x1f8   :  { %2185 = vmatpush2.bf16.msra.mxu1 %v5962_v22 }
 0x1f9   :  { %2186 = vmatprep.subr.bf16.mxu1 %v5967_v26 }
 0x1fc   :  { %2187 = vmatpush2.bf16.msra.mxu1 %v5965_v27 }
 0x1fd   :  { %3088 = vmatprep.subr.bf16.mxu1 %v6005_v37 }
 0x1ff   :  { %2189 = vmatmul.mubr.bf16.vlgmr.msra.gmra.mxu1 %v5968_v28  ;;  %v5988_v28 = vld [vmem:[#allocation7 + $0x38] sm:$0xff]  }
 0x200   :  { %3089 = vmatpush1.bf16.msra.mxu1 %v6003_v36 }
 0x201   :  { %3090 = vmatprep.subr.bf16.mxu1 %v6008_v38 }
 0x204   :  { %3091 = vmatpush1.bf16.msra.mxu1 %v6006_v39  ;;  %v5990_v39 = vld [vmem:[#allocation7 + $0x30] sm:$0xff]  }
 0x205   :  { %3092 = vmatprep.subr.bf16.mxu1 %v6011_v40 }
 0x208   :  { %3093 = vmatpush1.bf16.msra.mxu1 %v6009_v41  ;;  %v5991_v41 = vld [vmem:[#allocation7 + $0x68] sm:$0xff]  }
 0x209   :  { %3094 = vmatprep.subr.bf16.mxu1 %v6014_v42 }
 0x20c   :  { %3095 = vmatpush1.bf16.msra.mxu1 %v6012_v43 }
 0x20d   :  { %3096 = vmatprep.subr.bf16.mxu1 %v6017_v44 }
 0x210   :  { %3097 = vmatpush1.bf16.msra.mxu1 %v6015_v45 }
 0x211   :  { %3098 = vmatprep.subr.bf16.mxu1 %v6020_v46  ;;  %v5992_v46 = vld [vmem:[#allocation7 + $0x28] sm:$0xff]  }
 0x214   :  { %3099 = vmatpush1.bf16.msra.mxu1 %v6018_v47 }
 0x215   :  { %3100 = vmatprep.subr.bf16.mxu1 %v6023_v48  ;;  %v5993_v48 = vld [vmem:[#allocation7 + $0x60] sm:$0xff]  }
 0x218   :  { %3101 = vmatpush1.bf16.msra.mxu1 %v6021_v49  ;;  %v5994_v49 = vld [vmem:[#allocation7 + $0x20] sm:$0xff]  }
 0x219   :  { %3102 = vmatprep.subr.bf16.mxu1 %v6026_v50  ;;  %v5995_v50 = vld [vmem:[#allocation7 + $0x58] sm:$0xff]  }
 0x21c   :  { %3103 = vmatpush1.bf16.msra.mxu1 %v6024_v51  ;;  %v5996_v51 = vld [vmem:[#allocation7 + $0x18] sm:$0xff]  }
 0x21d   :  { %3104 = vmatprep.subr.bf16.mxu1 %v6029_v52  ;;  %v5997_v52 = vld [vmem:[#allocation7 + $0x50] sm:$0xff]  }
 0x220   :  { %3105 = vmatpush2.bf16.msra.mxu1 %v6027_v53  ;;  %v5998_v53 = vld [vmem:[#allocation7 + $0x10] sm:$0xff]  }
 0x221   :  { %3106 = vmatprep.subr.bf16.mxu1 %v6032_v54  ;;  %v5999_v54 = vld [vmem:[#allocation7 + $0x48] sm:$0xff]  }
 0x224   :  { %3107 = vmatpush2.bf16.msra.mxu1 %v6030_v56  ;;  %v6001_v56 = vld [vmem:[#allocation7 + $0x40] sm:$0xff]  }
 0x23f   :  { %v1673_v55 = vpop.f32.mrf.mxu0 }
 0x240   :  { %v1674_v9 = vadd.f32 %v1673_v55, %v1312_v1  ;;  %v6000_v55 = vld [vmem:[#allocation7 + $0x8] sm:$0xff]  }
 0x241   :  { %v1675_v57 = vpop.f32.mrf.mxu0 }
 0x242   :  { %v1676_v7 = vadd.f32 %v1675_v57, %v1316_v0  ;;  %v6002_v57 = vld [vmem:[#allocation7] sm:$0xff]  }
 0x243   :  { %v1677_v58 = vpop.f32.mrf.mxu0 }
 0x244   :  { %v1678_v8 = vadd.f32 %v1677_v58, %v1312_v1  ;;  %v1974_v58 = vld [vmem:[#allocation2 + $0x3] ss:$8 sm:$0x3] }
 0x245   :  { %v1679_v59 = vpop.f32.mrf.mxu0  ;;  %v1983_v62 = vrot.slane %v1974_v58, %v7230_v14 }
 0x246   :  { %v1680_v11 = vadd.f32 %v1679_v59, %v1316_v0 }
 0x247   :  { %v1683_v63 = vpop.f32.mrf.mxu0 }
 0x248   :  { %v1684_v29 = vadd.f32 %v1683_v63, %v1312_v1  ;;  %v1979_v63 = vrot.slane %v1974_v58, %v7232_v15 }
 0x249   :  { %v1685_v3 = vpop.f32.mrf.mxu0 }
 0x24a   :  { %v1686_v22 = vadd.f32 %v1685_v3, %v1316_v0 }
 0x24b   :  { %v1687_v5 = vpop.f32.mrf.mxu0 }
 0x24c   :  { %v1688_v26 = vadd.f32 %v1687_v5, %v1312_v1 }
 0x24d   :  { %v1689_v23 = vpop.f32.mrf.mxu0 }
 0x24e   :  { %v1690_v33 = vadd.f32 %v1689_v23, %v1316_v0  ;;  %v6042_v23 = vld [vmem:[#allocation10 + $0x140] ss:$16 sps:$4 sm:$0xff]  }
 0x27f   :  { %v1726_v2 = vpop.f32.mrf.mxu1 }
 0x280   :  { %v1727_v17 = vadd.f32 %v1726_v2, %v1674_v9 }
 0x281   :  { %v1728_v6 = vpop.f32.mrf.mxu1 }
 0x282   :  { %v1729_v16 = vadd.f32 %v1728_v6, %v1676_v7  ;;  %v1745_v24 = vmax.f32 %v1727_v17, 0.0  ;;  %v6035_v17 = vld [vmem:[#allocation10 + $0x1a4] ss:$16 sps:$4 sm:$0xff]  }
 0x283   :  { %v1730_v10 = vpop.f32.mrf.mxu1  ;;  %3108 = vmatprep.subr.bf16.mxu1 %v6035_v17  ;;  %v6067_v17 = vld [vmem:[#allocation10 + $0x2c4] ss:$16 sps:$4 sm:$0xff]  }
 0x284   :  { %v1731_v4 = vadd.f32 %v1730_v10, %v1678_v8  ;;  %v1746_v21 = vmax.f32 %v1729_v16, 0.0 }
 0x285   :  { %v1732_v12 = vpop.f32.mrf.mxu1 }
 0x286   :  { %v1733_v18 = vadd.f32 %v1732_v12, %v1680_v11  ;;  %v1747_v19 = vmax.f32 %v1731_v4, 0.0  ;;  %v6033_v12 = vld [vmem:[#allocation10 + $0x1a0] ss:$16 sps:$4 sm:$0xff]  }
 0x287   :  { %v1736_v20 = vpop.f32.mrf.mxu1  ;;  %3109 = vmatpush2.bf16.msra.mxu1 %v6033_v12  ;;  %v6070_v12 = vld [vmem:[#allocation10 + $0x2cc] ss:$16 sps:$4 sm:$0xff]  }
 0x288   :  { %v1748_v13 = vmax.f32 %v1733_v18, 0.0  ;;  %v1753_v30 = vpack.c.bf16 %v1747_v19, %v1745_v24  ;;  %v1737_v36 = vadd.f32 %v1736_v20, %v1684_v29  ;;  %v6038_v18 = vld [vmem:[#allocation10 + $0x184] ss:$16 sps:$4 sm:$0xff]   ;;  %v6036_v19 = vld [vmem:[#allocation10 + $0x180] ss:$16 sps:$4 sm:$0xff]  }
 0x289   :  { %v1738_v25 = vpop.f32.mrf.mxu1  ;;  %3110 = vmatprep.subr.bf16.mxu1 %v6038_v18  ;;  %v6041_v20 = vld [vmem:[#allocation10 + $0x164] ss:$16 sps:$4 sm:$0xff]   ;;  %v6065_v18 = vld [vmem:[#allocation10 + $0x2c0] ss:$16 sps:$4 sm:$0xff]  }
 0x28a   :  { %v1754_v27 = vpack.c.bf16 %v1748_v13, %v1746_v21  ;;  %v1739_v34 = vadd.f32 %v1738_v25, %v1686_v22  ;;  %v1749_v44 = vmax.f32 %v1737_v36, 0.0  ;;  %v6039_v21 = vld [vmem:[#allocation10 + $0x160] ss:$16 sps:$4 sm:$0xff]   ;;  %v6044_v13 = vld [vmem:[#allocation10 + $0x144] ss:$16 sps:$4 sm:$0xff]  }
 0x28b   :  { %v1740_v31 = vpop.f32.mrf.mxu1  ;;  %3111 = vmatpush2.bf16.msra.mxu1 %v6036_v19  ;;  %v6047_v24 = vld [vmem:[#allocation10 + $0x124] ss:$16 sps:$4 sm:$0xff]   ;;  %v6045_v25 = vld [vmem:[#allocation10 + $0x120] ss:$16 sps:$4 sm:$0xff]   ;;  %v6068_v19 = vld [vmem:[#allocation10 + $0x2c8] ss:$16 sps:$4 sm:$0xff]  }
 0x28c   :  { %v1741_v35 = vadd.f32 %v1740_v31, %v1688_v26  ;;  %1918 = vmatprep.mubr.bf16.mxu0 %v1754_v27  ;;  %v1750_v42 = vmax.f32 %v1739_v34, 0.0  ;;  %3112 = vmatprep.subr.bf16.mxu1 %v6041_v20  ;;  %v6048_v22 = vld [vmem:[#allocation10 + $0x100] ss:$16 sps:$4 sm:$0xff]   ;;  %v6050_v26 = vld [vmem:[#allocation10 + $0x104] ss:$16 sps:$4 sm:$0xff]   ;;  %v6051_v27 = vld [vmem:[#allocation9 + $0x38] sm:$0xff]  }
 0x28d   :  { %v1742_v37 = vpop.f32.mrf.mxu1  ;;  %1919 = vmatmul.mubr.bf16.vlgmr.msra.gmra.mxu0 %v1753_v30  ;;  %v6052_v29 = vld [vmem:[#allocation9 + $0x30] sm:$0xff]   ;;  %v6053_v30 = vld [vmem:[#allocation9 + $0x28] sm:$0xff]   ;;  %v6054_v31 = vld [vmem:[#allocation9 + $0x20] sm:$0xff]  }
 0x28e   :  { %v1743_v38 = vadd.f32 %v1742_v37, %v1690_v33  ;;  %5528 = vmatpush3.bf16.msra.mxu0 %v5988_v28  ;;  %v1751_v40 = vmax.f32 %v1741_v35, 0.0  ;;  %v6666_v28 = vmov 0.0   ;;  %v6056_v33 = vld [vmem:[#allocation9 + $0x10] sm:$0xff]   ;;  %v6057_v34 = vld [vmem:[#allocation9 + $0x8] sm:$0xff]   ;;  %v6058_v35 = vld [vmem:[#allocation9] sm:$0xff]  }
 0x28f   :  { %5529 = vmatprep.subr.bf16.mxu0 %v5989_v32  ;;  %3113 = vmatpush2.bf16.msra.mxu1 %v6039_v21  ;;  %v6055_v32 = vld [vmem:[#allocation9 + $0x18] sm:$0xff]   ;;  %v6073_v20 = vld [vmem:[#allocation10 + $0x2a4] ss:$16 sps:$4 sm:$0xff]  }
 0x290   :  { %v1752_v43 = vmax.f32 %v1743_v38, 0.0  ;;  %v1755_v47 = vpack.c.bf16 %v1751_v40, %v1749_v44  ;;  %3114 = vmatprep.subr.bf16.mxu1 %v6044_v13  ;;  %v6076_v21 = vld [vmem:[#allocation10 + $0x2ac] ss:$16 sps:$4 sm:$0xff]   ;;  %v6071_v13 = vld [vmem:[#allocation10 + $0x2a0] ss:$16 sps:$4 sm:$0xff]  }
 0x292   :  { %v1756_v45 = vpack.c.bf16 %v1752_v43, %v1750_v42  ;;  %5530 = vmatpush3.bf16.msra.mxu0 %v5990_v39 }
 0x293   :  { %5531 = vmatprep.subr.bf16.mxu0 %v5991_v41  ;;  %3115 = vmatpush2.bf16.msra.mxu1 %v6042_v23  ;;  %v6074_v23 = vld [vmem:[#allocation10 + $0x2a8] ss:$16 sps:$4 sm:$0xff]  }
 0x294   :  { %1926 = vmatprep.mubr.bf16.mxu0 %v1756_v45  ;;  %3116 = vmatprep.subr.bf16.mxu1 %v6047_v24  ;;  %v6079_v24 = vld [vmem:[#allocation10 + $0x284] ss:$16 sps:$4 sm:$0xff]  }
 0x295   :  { %1927 = vmatmul.mubr.bf16.gmra.mxu0 %v1755_v47 }
 0x296   :  { %5532 = vmatpush3.bf16.msra.mxu0 %v5992_v46  ;;  %v1789_v46 = vld [vmem:[#allocation2 + $0x2] ss:$0 sm:$0xff] }
 0x297   :  { %5533 = vmatprep.subr.bf16.mxu0 %v5993_v48  ;;  %3117 = vmatpush2.bf16.msra.mxu1 %v6045_v25  ;;  %v6082_v25 = vld [vmem:[#allocation10 + $0x28c] ss:$16 sps:$4 sm:$0xff]  }
 0x298   :  { %3118 = vmatprep.subr.bf16.mxu1 %v6050_v26  ;;  %v6080_v26 = vld [vmem:[#allocation10 + $0x288] ss:$16 sps:$4 sm:$0xff]  }
 0x29a   :  { %5534 = vmatpush3.bf16.msra.mxu0 %v5994_v49 }
 0x29b   :  { %5535 = vmatprep.subr.bf16.mxu0 %v5995_v50  ;;  %3119 = vmatpush2.bf16.msra.mxu1 %v6048_v22  ;;  %v6077_v22 = vld [vmem:[#allocation10 + $0x280] ss:$16 sps:$4 sm:$0xff]  }
 0x29e   :  { %5536 = vmatpush3.bf16.msra.mxu0 %v5996_v51 }
 0x29f   :  { %5537 = vmatprep.subr.bf16.mxu0 %v5997_v52 }
 0x2a2   :  { %5538 = vmatpush3.bf16.msra.mxu0 %v5998_v53 }
 0x2a3   :  { %5539 = vmatprep.subr.bf16.mxu0 %v5999_v54 }
 0x2a6   :  { %5540 = vmatpush3.bf16.msra.mxu0 %v6000_v55 }
 0x2a7   :  { %5541 = vmatprep.subr.bf16.mxu0 %v6001_v56 }
 0x2aa   :  { %5542 = vmatpush3.bf16.msra.mxu0 %v6002_v57 }
 0x2ab   :  { %5580 = vmatprep.subr.bf16.mxu0 %v6666_v28 }
 0x2bf   :  { %v2190_v59 = vpop.f32.mrf.mxu1 }
 0x2c0   :  { %v2191_v6 = vadd.f32 %v2190_v59, %v1979_v63 }
 0x2c1   :  { %v2192_v0 = vpop.f32.mrf.mxu1 }
 0x2c2   :  { %v2193_v2 = vadd.f32 %v2192_v0, %v1983_v62  ;;  %v2199_v16 = vmax.f32 %v2191_v6, 0.0  ;;  %v2237_v0 = vld [vmem:[#allocation2 + $0x4] ss:$0 sm:$0xff] }
 0x2c3   :  { %v2194_v1 = vpop.f32.mrf.mxu1 }
 0x2c4   :  { %v2195_v3 = vadd.f32 %v2194_v1, %v1979_v63  ;;  %v2200_v10 = vmax.f32 %v2193_v2, 0.0 }
 0x2c5   :  { %v2196_v7 = vpop.f32.mrf.mxu1 }
 0x2c6   :  { %v2197_v8 = vadd.f32 %v2196_v7, %v1983_v62  ;;  %v2201_v9 = vmax.f32 %v2195_v3, 0.0 }
 0x2c8   :  { %v2202_v11 = vmax.f32 %v2197_v8, 0.0  ;;  %v2203_v5 = vpack.c.bf16 %v2201_v9, %v2199_v16  ;;  %v6061_v16 = vld [vmem:[#allocation10 + $0x2e4] ss:$16 sps:$4 sm:$0xff]  }
 0x2ca   :  { %v2204_v4 = vpack.c.bf16 %v2202_v11, %v2200_v10  ;;  %v6059_v11 = vld [vmem:[#allocation10 + $0x2e0] ss:$16 sps:$4 sm:$0xff]  }
 0x2cc   :  { %2366 = vmatprep.mubr.bf16.mxu0 %v2204_v4  ;;  %v6062_v4 = vld [vmem:[#allocation10 + $0x2e8] ss:$16 sps:$4 sm:$0xff]  }
 0x2cd   :  { %2367 = vmatmul.mubr.bf16.vlgmr.msra.gmra.mxu0 %v2203_v5  ;;  %v6064_v5 = vld [vmem:[#allocation10 + $0x2ec] ss:$16 sps:$4 sm:$0xff]  }
 0x2ce   :  { %5581 = vmatpush3.bf16.msra.mxu0 %v6051_v27  ;;  %5596 = vmatprep.mubr.msk.bf16.mxu0 %vm6667_vm0, %v6666_v28  ;;  %v6085_v27 = vld [vmem:[#allocation10 + $0x264] ss:$16 sps:$4 sm:$0xff]  }
 0x2cf   :  { %5582 = vmatprep.subr.bf16.mxu0 %v6666_v28  ;;  %3217 = vmatprep.subr.bf16.mxu1 %v6064_v5  ;;  %v6124_v5 = vld [vmem:[#allocation10 + $0x4c] ss:$16 sps:$4 sm:$0xff]  }
 0x2d2   :  { %5583 = vmatpush3.bf16.msra.mxu0 %v6052_v29  ;;  %v6083_v29 = vld [vmem:[#allocation10 + $0x260] ss:$16 sps:$4 sm:$0xff]  }
 0x2d3   :  { %5584 = vmatprep.subr.bf16.mxu0 %v6666_v28 }
 0x2d6   :  { %5585 = vmatpush3.bf16.msra.mxu0 %v6053_v30  ;;  %v6086_v30 = vld [vmem:[#allocation10 + $0x268] ss:$16 sps:$4 sm:$0xff]  }
 0x2d7   :  { %5586 = vmatprep.subr.bf16.mxu0 %v6666_v28 }
 0x2da   :  { %5587 = vmatpush3.bf16.msra.mxu0 %v6054_v31  ;;  %v6091_v31 = vld [vmem:[#allocation10 + $0x244] ss:$16 sps:$4 sm:$0xff]  }
 0x2db   :  { %5588 = vmatprep.subr.bf16.mxu0 %v6666_v28 }
 0x2de   :  { %5589 = vmatpush3.bf16.msra.mxu0 %v6055_v32  ;;  %v6094_v32 = vld [vmem:[#allocation10 + $0x24c] ss:$16 sps:$4 sm:$0xff]  }
 0x2df   :  { %5590 = vmatprep.subr.bf16.mxu0 %v6666_v28 }
 0x2e2   :  { %5591 = vmatpush3.bf16.msra.mxu0 %v6056_v33  ;;  %v6089_v33 = vld [vmem:[#allocation10 + $0x240] ss:$16 sps:$4 sm:$0xff]  }
 0x2e3   :  { %5592 = vmatprep.subr.bf16.mxu0 %v6666_v28 }
 0x2e6   :  { %5593 = vmatpush3.bf16.msra.mxu0 %v6057_v34  ;;  %v6092_v34 = vld [vmem:[#allocation10 + $0x248] ss:$16 sps:$4 sm:$0xff]  }
 0x2e7   :  { %5594 = vmatprep.subr.bf16.mxu0 %v6666_v28  ;;  %v6088_v28 = vld [vmem:[#allocation10 + $0x26c] ss:$16 sps:$4 sm:$0xff]  }
 0x2ea   :  { %5595 = vmatpush3.bf16.msra.mxu0 %v6058_v35  ;;  %v6097_v35 = vld [vmem:[#allocation10 + $0x224] ss:$16 sps:$4 sm:$0xff]  }
 0x2eb   :  { %3131 = vmatprep.subr.bf16.mxu0 %v6061_v16  ;;  %v6169_v16 = vld [vmem:[#allocation12 + $0x64] ss:$16 sps:$4 sm:$0xff]  }
 0x34d   :  { %v5515_v36 = vpop.f32.mrf.mxu0 }
 0x34f   :  { %v5516_v37 = vpop.f32.mrf.mxu0 }
 0x350   :  { %v5517_v44 = vadd.f32 %v5516_v37, %v5515_v36  ;;  %v6095_v36 = vld [vmem:[#allocation10 + $0x220] ss:$16 sps:$4 sm:$0xff]   ;;  %v6100_v37 = vld [vmem:[#allocation10 + $0x22c] ss:$16 sps:$4 sm:$0xff]  }
 0x351   :  { %v5518_v38 = vpop.f32.mrf.mxu0 }
 0x352   :  { %v1921_v51 = vadd.f32 %v5517_v44, %v1789_v46  ;;  %v6668_v44 = vmov 0  }
 0x353   :  { %v5519_v39 = vpop.f32.mrf.mxu0 }
 0x354   :  { %v5520_v41 = vadd.f32 %v5519_v39, %v5518_v38  ;;  %v1935_v56 = vmax.f32 %v1921_v51, 0.0  ;;  %v6098_v38 = vld [vmem:[#allocation10 + $0x228] ss:$16 sps:$4 sm:$0xff]   ;;  %v6103_v39 = vld [vmem:[#allocation10 + $0x204] ss:$16 sps:$4 sm:$0xff]  }
 0x355   :  { %v5521_v40 = vpop.f32.mrf.mxu0 }
 0x356   :  { %v1924_v47 = vadd.f32 %v5520_v41, %v1789_v46  ;;  %v6106_v41 = vld [vmem:[#allocation10 + $0x20c] ss:$16 sps:$4 sm:$0xff]  }
 0x357   :  { %v5522_v42 = vpop.f32.mrf.mxu0 }
 0x358   :  { %v5523_v43 = vadd.f32 %v5522_v42, %v5521_v40  ;;  %v1936_v53 = vmax.f32 %v1924_v47, 0.0  ;;  %v6101_v40 = vld [vmem:[#allocation10 + $0x200] ss:$16 sps:$4 sm:$0xff]   ;;  %v6104_v42 = vld [vmem:[#allocation10 + $0x208] ss:$16 sps:$4 sm:$0xff]  }
 0x359   :  { %v5524_v45 = vpop.f32.mrf.mxu0 }
 0x35a   :  { %v1929_v49 = vadd.f32 %v5523_v43, %v1789_v46  ;;  %v7302_v58 = vpack.c.bf16 %v1936_v53, %v1935_v56  ;;  %v6109_v43 = vld [vmem:[#allocation10 + $0xec] ss:$16 sps:$4 sm:$0xff]  }
 0x35b   :  { %v5525_v48 = vpop.f32.mrf.mxu0 }
 0x35c   :  { %v5526_v50 = vadd.f32 %v5525_v48, %v5524_v45  ;;  %v1937_v54 = vmax.f32 %v1929_v49, 0.0  ;;  %v6157_v45 = vld [vmem:[#allocation12 + $0xe4] ss:$16 sps:$4 sm:$0xff]  }
 0x35e   :  { %v1932_v52 = vadd.f32 %v5526_v50, %v1789_v46  ;;  %v2394_v46 = vld [vmem:[#allocation2 + $0x5] ss:$0 sm:$0xff] }
 0x360   :  { %v1938_v55 = vmax.f32 %v1932_v52, 0.0 }
 0x362   :  { %v7300_v57 = vpack.c.bf16 %v1938_v55, %v1937_v54  ;;  %v6107_v55 = vld [vmem:[#allocation10 + $0xe8] ss:$16 sps:$4 sm:$0xff]  }
 0x364   :  { %3120 = vmatprep.mubr.bf16.mxu1 %v7300_v57 }
 0x365   :  { %3121 = vmatmul.mubr.bf16.vlgmr.msra.gmra.mxu1 %v7302_v58 }
 0x366   :  { %3218 = vmatpush1.bf16.msra.mxu1 %v6062_v4  ;;  %3249 = vmatprep.mubr.bf16.mxu1 %v6668_v44  ;;  %v6119_v4 = vld [vmem:[#allocation10 + $0x68] ss:$16 sps:$4 sm:$0xff]  }
 0x367   :  { %3219 = vmatprep.subr.bf16.mxu1 %v6070_v12  ;;  %v6172_v12 = vld [vmem:[#allocation12 + $0x44] ss:$16 sps:$4 sm:$0xff]  }
 0x36a   :  { %3220 = vmatpush1.bf16.msra.mxu1 %v6068_v19  ;;  %v6127_v19 = vld [vmem:[#allocation10 + $0x2c] ss:$16 sps:$4 sm:$0xff]  }
 0x36b   :  { %3221 = vmatprep.subr.bf16.mxu1 %v6076_v21  ;;  %v6175_v21 = vld [vmem:[#allocation12 + $0x24] ss:$16 sps:$4 sm:$0xff]  }
 0x36e   :  { %3222 = vmatpush1.bf16.msra.mxu1 %v6074_v23  ;;  %v6130_v23 = vld [vmem:[#allocation10 + $0xc] ss:$16 sps:$4 sm:$0xff]  }
 0x36f   :  { %3223 = vmatprep.subr.bf16.mxu1 %v6082_v25  ;;  %v6178_v25 = vld [vmem:[#allocation12 + $0x4] ss:$16 sps:$4 sm:$0xff]  }
 0x372   :  { %3224 = vmatpush1.bf16.msra.mxu1 %v6080_v26  ;;  %v6133_v26 = vld [vmem:[#allocation10 + $0x1ec] ss:$16 sps:$4 sm:$0xff]  }
 0x373   :  { %3225 = vmatprep.subr.bf16.mxu1 %v6088_v28  ;;  %v6181_v28 = vld [vmem:[#allocation12 + $0x1e4] ss:$16 sps:$4 sm:$0xff]  }
 0x376   :  { %3226 = vmatpush1.bf16.msra.mxu1 %v6086_v30  ;;  %v6136_v30 = vld [vmem:[#allocation10 + $0x1cc] ss:$16 sps:$4 sm:$0xff]  }
 0x377   :  { %3227 = vmatprep.subr.bf16.mxu1 %v6094_v32  ;;  %v6184_v32 = vld [vmem:[#allocation12 + $0x1c4] ss:$16 sps:$4 sm:$0xff]  }
 0x37a   :  { %3228 = vmatpush1.bf16.msra.mxu1 %v6092_v34  ;;  %v6139_v34 = vld [vmem:[#allocation10 + $0x1ac] ss:$16 sps:$4 sm:$0xff]  }
 0x37b   :  { %3229 = vmatprep.subr.bf16.mxu1 %v6100_v37  ;;  %v6137_v37 = vld [vmem:[#allocation10 + $0x1a8] ss:$16 sps:$4 sm:$0xff]  }
 0x37e   :  { %3230 = vmatpush1.bf16.msra.mxu1 %v6098_v38  ;;  %v6142_v38 = vld [vmem:[#allocation10 + $0x18c] ss:$16 sps:$4 sm:$0xff]  }
 0x37f   :  { %3231 = vmatprep.subr.bf16.mxu1 %v6106_v41  ;;  %v6140_v41 = vld [vmem:[#allocation10 + $0x188] ss:$16 sps:$4 sm:$0xff]  }
 0x382   :  { %3232 = vmatpush1.bf16.msra.mxu1 %v6104_v42  ;;  %v6145_v42 = vld [vmem:[#allocation10 + $0x16c] ss:$16 sps:$4 sm:$0xff]  }
 0x383   :  { %4063 = vmatprep.subr.bf16.mxu1 %v6157_v45  ;;  %v6143_v45 = vld [vmem:[#allocation10 + $0x168] ss:$16 sps:$4 sm:$0xff]  }
 0x38d   :  { %v5543_v59 = vpop.f32.mrf.mxu0 }
 0x38f   :  { %v5544_v62 = vpop.f32.mrf.mxu0 }
 0x390   :  { %v5545_v63 = vadd.f32 %v5544_v62, %v5543_v59  ;;  %v6112_v59 = vld [vmem:[#allocation10 + $0xcc] ss:$16 sps:$4 sm:$0xff]   ;;  %v6155_v62 = vld [vmem:[#allocation12 + $0xe0] ss:$16 sps:$4 sm:$0xff]  }
 0x391   :  { %v5546_v1 = vpop.f32.mrf.mxu0 }
 0x392   :  { %v2369_v3 = vadd.f32 %v5545_v63, %v2237_v0  ;;  %v6160_v63 = vld [vmem:[#allocation12 + $0xc4] ss:$16 sps:$4 sm:$0xff]  }
 0x393   :  { %v5547_v2 = vpop.f32.mrf.mxu0 }
 0x394   :  { %v5548_v6 = vadd.f32 %v5547_v2, %v5546_v1  ;;  %v2375_v8 = vmax.f32 %v2369_v3, 0.0  ;;  %v6115_v1 = vld [vmem:[#allocation10 + $0xac] ss:$16 sps:$4 sm:$0xff]   ;;  %v6158_v2 = vld [vmem:[#allocation12 + $0xc0] ss:$16 sps:$4 sm:$0xff]  }
 0x395   :  { %v6163_v3 = vld [vmem:[#allocation12 + $0xa4] ss:$16 sps:$4 sm:$0xff]  }
 0x396   :  { %v2372_v7 = vadd.f32 %v5548_v6, %v2237_v0  ;;  %v6110_v0 = vld [vmem:[#allocation10 + $0xc8] ss:$16 sps:$4 sm:$0xff]  }
 0x397   :  { %v6113_v6 = vld [vmem:[#allocation10 + $0xa8] ss:$16 sps:$4 sm:$0xff]  }
 0x398   :  { %v2376_v9 = vmax.f32 %v2372_v7, 0.0  ;;  %v6118_v7 = vld [vmem:[#allocation10 + $0x8c] ss:$16 sps:$4 sm:$0xff]  }
 0x39a   :  { %v2377_v10 = vpack.c.bf16 %v2376_v9, %v2375_v8  ;;  %v6161_v8 = vld [vmem:[#allocation12 + $0xa0] ss:$16 sps:$4 sm:$0xff]   ;;  %v6166_v9 = vld [vmem:[#allocation12 + $0x84] ss:$16 sps:$4 sm:$0xff]  }
 0x39c   :  { %5597 = vmatmul.mubr.bf16.vlgmr.msra.gmra.mxu0 %v2377_v10  ;;  %v6116_v10 = vld [vmem:[#allocation10 + $0x88] ss:$16 sps:$4 sm:$0xff]  }
 0x39d   :  { %3132 = vmatpush1.bf16.msra.mxu0 %v6059_v11  ;;  %3163 = vmatprep.mubr.bf16.mxu0 %v6668_v44  ;;  %v6121_v11 = vld [vmem:[#allocation10 + $0x6c] ss:$16 sps:$4 sm:$0xff]   ;;  %v6193_v44 = vld [vmem:[#allocation12 + $0x164] ss:$16 sps:$4 sm:$0xff]  }
 0x39e   :  { %3133 = vmatprep.subr.bf16.mxu0 %v6067_v17  ;;  %v6167_v17 = vld [vmem:[#allocation12 + $0x60] ss:$16 sps:$4 sm:$0xff]  }
 0x3a1   :  { %3134 = vmatpush1.bf16.msra.mxu0 %v6065_v18  ;;  %v6122_v18 = vld [vmem:[#allocation10 + $0x48] ss:$16 sps:$4 sm:$0xff]  }
 0x3a2   :  { %3135 = vmatprep.subr.bf16.mxu0 %v6073_v20  ;;  %v6170_v20 = vld [vmem:[#allocation12 + $0x40] ss:$16 sps:$4 sm:$0xff]  }
 0x3a5   :  { %3136 = vmatpush1.bf16.msra.mxu0 %v6071_v13  ;;  %v6125_v13 = vld [vmem:[#allocation10 + $0x28] ss:$16 sps:$4 sm:$0xff]  }
 0x3a6   :  { %3137 = vmatprep.subr.bf16.mxu0 %v6079_v24  ;;  %v6173_v24 = vld [vmem:[#allocation12 + $0x20] ss:$16 sps:$4 sm:$0xff]  }
 0x3a9   :  { %3138 = vmatpush1.bf16.msra.mxu0 %v6077_v22  ;;  %v6128_v22 = vld [vmem:[#allocation10 + $0x8] ss:$16 sps:$4 sm:$0xff]  }
 0x3aa   :  { %3139 = vmatprep.subr.bf16.mxu0 %v6085_v27  ;;  %v6176_v27 = vld [vmem:[#allocation12] ss:$16 sps:$4 sm:$0xff]  }
 0x3ad   :  { %3140 = vmatpush1.bf16.msra.mxu0 %v6083_v29  ;;  %v6131_v29 = vld [vmem:[#allocation10 + $0x1e8] ss:$16 sps:$4 sm:$0xff]  }
 0x3ae   :  { %3141 = vmatprep.subr.bf16.mxu0 %v6091_v31  ;;  %v6179_v31 = vld [vmem:[#allocation12 + $0x1e0] ss:$16 sps:$4 sm:$0xff]  }
 0x3b1   :  { %3142 = vmatpush1.bf16.msra.mxu0 %v6089_v33  ;;  %v6134_v33 = vld [vmem:[#allocation10 + $0x1c8] ss:$16 sps:$4 sm:$0xff]  }
 0x3b2   :  { %3143 = vmatprep.subr.bf16.mxu0 %v6097_v35  ;;  %v6182_v35 = vld [vmem:[#allocation12 + $0x1c0] ss:$16 sps:$4 sm:$0xff]  }
 0x3b5   :  { %3144 = vmatpush1.bf16.msra.mxu0 %v6095_v36  ;;  %v6187_v36 = vld [vmem:[#allocation12 + $0x1a4] ss:$16 sps:$4 sm:$0xff]  }
 0x3b6   :  { %3145 = vmatprep.subr.bf16.mxu0 %v6103_v39  ;;  %v6185_v39 = vld [vmem:[#allocation12 + $0x1a0] ss:$16 sps:$4 sm:$0xff]  }
 0x3b9   :  { %3146 = vmatpush1.bf16.msra.mxu0 %v6101_v40  ;;  %v6190_v40 = vld [vmem:[#allocation12 + $0x184] ss:$16 sps:$4 sm:$0xff]  }
 0x3ba   :  { %3174 = vmatprep.subr.bf16.mxu0 %v6109_v43  ;;  %v6188_v43 = vld [vmem:[#allocation12 + $0x180] ss:$16 sps:$4 sm:$0xff]  }
 0x45c   :  { %v2477_v47 = vpop.f32.mrf.mxu0 }
 0x45d   :  { %v2478_v49 = vadd.f32 %v2477_v47, %v2394_v46  ;;  %v6191_v47 = vld [vmem:[#allocation12 + $0x160] ss:$16 sps:$4 sm:$0xff]  }
 0x45e   :  { %v5598_v48 = vpop.f32.mrf.mxu0 }
 0x45f   :  { %v2484_v53 = vmax.f32 %v2478_v49, 0.0  ;;  %v6146_v48 = vld [vmem:[#allocation10 + $0x148] ss:$16 sps:$4 sm:$0xff]   ;;  %v6151_v49 = vld [vmem:[#allocation10 + $0x12c] ss:$16 sps:$4 sm:$0xff]  }
 0x460   :  { %v2480_v50 = vpop.f32.mrf.mxu0 }
 0x461   :  { %v2481_v51 = vadd.f32 %v2480_v50, %v2394_v46  ;;  %v6148_v46 = vld [vmem:[#allocation10 + $0x14c] ss:$16 sps:$4 sm:$0xff]   ;;  %v6149_v50 = vld [vmem:[#allocation10 + $0x128] ss:$16 sps:$4 sm:$0xff]  }
 0x462   :  { %v5599_v52 = vpop.f32.mrf.mxu0 }
 0x463   :  { %v2485_v54 = vmax.f32 %v2481_v51, 0.0  ;;  %v6154_v51 = vld [vmem:[#allocation10 + $0x10c] ss:$16 sps:$4 sm:$0xff]   ;;  %v6152_v52 = vld [vmem:[#allocation10 + $0x108] ss:$16 sps:$4 sm:$0xff]  }
 0x465   :  { %v2488_v56 = vpack.c.bf16 %v2485_v54, %v2484_v53  ;;  %v6196_v53 = vld [vmem:[#allocation12 + $0x144] ss:$16 sps:$4 sm:$0xff]   ;;  %v6194_v54 = vld [vmem:[#allocation12 + $0x140] ss:$16 sps:$4 sm:$0xff]  }
 0x467   :  { %3164 = vmatmul.mubr.bf16.vlgmr.msra.gmra.mxu0 %v2488_v56  ;;  %3250 = vmatmul.mubr.bf16.vlgmr.msra.gmra.mxu1 %v2488_v56  ;;  %v6197_v56 = vld [vmem:[#allocation12 + $0x120] ss:$16 sps:$4 sm:$0xff]  }
 0x468   :  { %3175 = vmatpush1.bf16.msra.mxu0 %v6107_v55  ;;  %3206 = vmatprep.mubr.bf16.mxu0 %v7300_v57  ;;  %v6164_v57 = vld [vmem:[#allocation12 + $0x80] ss:$16 sps:$4 sm:$0xff]   ;;  %v6199_v55 = vld [vmem:[#allocation12 + $0x124] ss:$16 sps:$4 sm:$0xff]  }
 0x469   :  { %3176 = vmatprep.subr.bf16.mxu0 %v6112_v59  ;;  %4064 = vmatpush1.bf16.msra.mxu1 %v6155_v62  ;;  %v6202_v59 = vld [vmem:[#allocation12 + $0x104] ss:$16 sps:$4 sm:$0xff]   ;;  %v6200_v62 = vld [vmem:[#allocation12 + $0x100] ss:$16 sps:$4 sm:$0xff]  }
 0x46a   :  { %4065 = vmatprep.subr.bf16.mxu1 %v6160_v63  ;;  %v6205_v63 = vld [vmem:[#allocation12 + $0xec] ss:$16 sps:$4 sm:$0xff]  }
 0x46c   :  { %3177 = vmatpush1.bf16.msra.mxu0 %v6110_v0  ;;  %v6208_v0 = vld [vmem:[#allocation12 + $0x2e4] ss:$16 sps:$4 sm:$0xff]  }
 0x46d   :  { %3178 = vmatprep.subr.bf16.mxu0 %v6115_v1  ;;  %4066 = vmatpush1.bf16.msra.mxu1 %v6158_v2  ;;  %v6206_v1 = vld [vmem:[#allocation12 + $0x2e0] ss:$16 sps:$4 sm:$0xff]  }
 0x46e   :  { %4067 = vmatprep.subr.bf16.mxu1 %v6163_v3  ;;  %v6212_v2 = vld [vmem:[#allocation12 + $0x2c0] ss:$16 sps:$4 sm:$0xff]  }
 0x46f   :  { %v6218_v3 = vld [vmem:[#allocation12 + $0x2a0] ss:$16 sps:$4 sm:$0xff]  }
 0x470   :  { %3179 = vmatpush1.bf16.msra.mxu0 %v6113_v6  ;;  %v6220_v6 = vld [vmem:[#allocation12 + $0x2a4] ss:$16 sps:$4 sm:$0xff]  }
 0x471   :  { %3180 = vmatprep.subr.bf16.mxu0 %v6118_v7  ;;  %4068 = vmatpush1.bf16.msra.mxu1 %v6161_v8  ;;  %v6224_v7 = vld [vmem:[#allocation12 + $0x280] ss:$16 sps:$4 sm:$0xff]   ;;  %v6226_v8 = vld [vmem:[#allocation12 + $0x284] ss:$16 sps:$4 sm:$0xff]  }
 0x472   :  { %4069 = vmatprep.subr.bf16.mxu1 %v6166_v9  ;;  %v6230_v9 = vld [vmem:[#allocation12 + $0x260] ss:$16 sps:$4 sm:$0xff]  }
 0x474   :  { %3181 = vmatpush1.bf16.msra.mxu0 %v6116_v10  ;;  %v6232_v10 = vld [vmem:[#allocation12 + $0x264] ss:$16 sps:$4 sm:$0xff]  }
 0x475   :  { %3182 = vmatprep.subr.bf16.mxu0 %v6121_v11  ;;  %4070 = vmatpush1.bf16.msra.mxu1 %v6164_v57  ;;  %v6236_v11 = vld [vmem:[#allocation12 + $0x240] ss:$16 sps:$4 sm:$0xff]   ;;  %v6238_v57 = vld [vmem:[#allocation12 + $0x244] ss:$16 sps:$4 sm:$0xff]  }
 0x476   :  { %4071 = vmatprep.subr.bf16.mxu1 %v6169_v16  ;;  %v6242_v16 = vld [vmem:[#allocation12 + $0x220] ss:$16 sps:$4 sm:$0xff]  }
 0x478   :  { %3183 = vmatpush1.bf16.msra.mxu0 %v6119_v4  ;;  %v6244_v4 = vld [vmem:[#allocation12 + $0x224] ss:$16 sps:$4 sm:$0xff]  }
 0x479   :  { %3184 = vmatprep.subr.bf16.mxu0 %v6124_v5  ;;  %4072 = vmatpush1.bf16.msra.mxu1 %v6167_v17  ;;  %v6248_v5 = vld [vmem:[#allocation12 + $0x200] ss:$16 sps:$4 sm:$0xff]   ;;  %v6250_v17 = vld [vmem:[#allocation12 + $0x204] ss:$16 sps:$4 sm:$0xff]  }
 0x47a   :  { %4073 = vmatprep.subr.bf16.mxu1 %v6172_v12  ;;  %v6254_v12 = vld [vmem:[#allocation12 + $0x3e0] ss:$16 sps:$4 sm:$0xff]  }
 0x47c   :  { %3185 = vmatpush1.bf16.msra.mxu0 %v6122_v18  ;;  %v6256_v18 = vld [vmem:[#allocation12 + $0x3e4] ss:$16 sps:$4 sm:$0xff]  }
 0x47d   :  { %3186 = vmatprep.subr.bf16.mxu0 %v6127_v19  ;;  %4074 = vmatpush1.bf16.msra.mxu1 %v6170_v20  ;;  %v6260_v19 = vld [vmem:[#allocation12 + $0x3c0] ss:$16 sps:$4 sm:$0xff]   ;;  %v6262_v20 = vld [vmem:[#allocation12 + $0x3c4] ss:$16 sps:$4 sm:$0xff]  }
 0x47e   :  { %4075 = vmatprep.subr.bf16.mxu1 %v6175_v21  ;;  %v6266_v21 = vld [vmem:[#allocation12 + $0x3a0] ss:$16 sps:$4 sm:$0xff]  }
 0x480   :  { %3187 = vmatpush1.bf16.msra.mxu0 %v6125_v13  ;;  %v6268_v13 = vld [vmem:[#allocation12 + $0x3a4] ss:$16 sps:$4 sm:$0xff]  }
 0x481   :  { %3188 = vmatprep.subr.bf16.mxu0 %v6130_v23  ;;  %4076 = vmatpush1.bf16.msra.mxu1 %v6173_v24  ;;  %v6272_v23 = vld [vmem:[#allocation12 + $0x380] ss:$16 sps:$4 sm:$0xff]   ;;  %v6274_v24 = vld [vmem:[#allocation12 + $0x384] ss:$16 sps:$4 sm:$0xff]  }
 0x482   :  { %4077 = vmatprep.subr.bf16.mxu1 %v6178_v25  ;;  %v6278_v25 = vld [vmem:[#allocation12 + $0x360] ss:$16 sps:$4 sm:$0xff]  }
 0x484   :  { %3189 = vmatpush1.bf16.msra.mxu0 %v6128_v22  ;;  %v6280_v22 = vld [vmem:[#allocation12 + $0x364] ss:$16 sps:$4 sm:$0xff]  }
 0x485   :  { %3190 = vmatprep.subr.bf16.mxu0 %v6133_v26  ;;  %4078 = vmatpush1.bf16.msra.mxu1 %v6176_v27  ;;  %v6286_v26 = vld [vmem:[#allocation12 + $0x344] ss:$16 sps:$4 sm:$0xff]   ;;  %v6284_v27 = vld [vmem:[#allocation12 + $0x340] ss:$16 sps:$4 sm:$0xff]  }
 0x486   :  { %4079 = vmatprep.subr.bf16.mxu1 %v6181_v28  ;;  %v6292_v28 = vld [vmem:[#allocation12 + $0x324] ss:$16 sps:$4 sm:$0xff]  }
 0x488   :  { %3191 = vmatpush2.bf16.msra.mxu0 %v6131_v29  ;;  %v6290_v29 = vld [vmem:[#allocation12 + $0x320] ss:$16 sps:$4 sm:$0xff]  }
 0x489   :  { %3192 = vmatprep.subr.bf16.mxu0 %v6136_v30  ;;  %4080 = vmatpush2.bf16.msra.mxu1 %v6179_v31  ;;  %v6298_v30 = vld [vmem:[#allocation12 + $0x304] ss:$16 sps:$4 sm:$0xff]   ;;  %v6296_v31 = vld [vmem:[#allocation12 + $0x300] ss:$16 sps:$4 sm:$0xff]  }
 0x48a   :  { %4081 = vmatprep.subr.bf16.mxu1 %v6184_v32  ;;  %v6301_v32 = vld [vmem:[#allocation12 + $0x2ec] ss:$16 sps:$4 sm:$0xff]  }
 0x48c   :  { %3193 = vmatpush2.bf16.msra.mxu0 %v6134_v33  ;;  %v3122_v33 = vpop.f32.mrf.mxu1 }
 0x48d   :  { %3194 = vmatprep.subr.bf16.mxu0 %v6139_v34  ;;  %4082 = vmatpush2.bf16.msra.mxu1 %v6182_v35  ;;  %v7308_v35 = vld [vmem:[#allocation2 + $0x6] ss:$8 sm:$0xf] }
 0x48e   :  { %4083 = vmatprep.subr.bf16.mxu1 %v6187_v36  ;;  %v3124_v34 = vpop.f32.mrf.mxu1 }
 0x490   :  { %3195 = vmatpush2.bf16.msra.mxu0 %v6137_v37  ;;  %v3126_v36 = vpop.f32.mrf.mxu1  ;;  %v2595_v37 = vrot.slane %v7308_v35, %v7230_v14 }
 0x491   :  { %3196 = vmatprep.subr.bf16.mxu0 %v6142_v38  ;;  %4084 = vmatpush2.bf16.msra.mxu1 %v6185_v39  ;;  %v2591_v38 = vrot.slane %v7308_v35, %v7232_v15 }
 0x492   :  { %4085 = vmatprep.subr.bf16.mxu1 %v6190_v40  ;;  %v3128_v40 = vpop.f32.mrf.mxu1 }
 0x494   :  { %3197 = vmatpush2.bf16.msra.mxu0 %v6140_v41 }
 0x495   :  { %3198 = vmatprep.subr.bf16.mxu0 %v6145_v42  ;;  %4086 = vmatpush2.bf16.msra.mxu1 %v6188_v43  ;;  %v3125_v42 = vadd.f32 %v3124_v34, %v2595_v37  ;;  %v3127_v43 = vadd.f32 %v3126_v36, %v2591_v38 }
 0x496   :  { %4087 = vmatprep.subr.bf16.mxu1 %v6193_v44  ;;  %v3123_v44 = vadd.f32 %v3122_v33, %v2591_v38  ;;  %v6287_v33 = vld [vmem:[#allocation12 + $0x128] ss:$16 sps:$4 sm:$0xff]   ;;  %v6295_v38 = vld [vmem:[#allocation12 + $0x10c] ss:$16 sps:$4 sm:$0xff]  }
 0x498   :  { %3199 = vmatpush2.bf16.msra.mxu0 %v6143_v45 }
 0x499   :  { %3200 = vmatprep.subr.bf16.mxu0 %v6148_v46  ;;  %4088 = vmatpush2.bf16.msra.mxu1 %v6191_v47  ;;  %v3129_v46 = vadd.f32 %v3128_v40, %v2595_v37 }
 0x49a   :  { %4089 = vmatprep.subr.bf16.mxu1 %v6196_v53 }
 0x49c   :  { %3201 = vmatpush2.bf16.msra.mxu0 %v6146_v48 }
 0x49d   :  { %3202 = vmatprep.subr.bf16.mxu0 %v6151_v49  ;;  %4090 = vmatpush2.bf16.msra.mxu1 %v6194_v54 }
 0x49e   :  { %4091 = vmatprep.subr.bf16.mxu1 %v6199_v55 }
 0x4a0   :  { %3203 = vmatpush2.bf16.msra.mxu0 %v6149_v50 }
 0x4a1   :  { %3204 = vmatprep.subr.bf16.mxu0 %v6154_v51  ;;  %4092 = vmatpush2.bf16.msra.mxu1 %v6197_v56 }
 0x4a2   :  { %4093 = vmatprep.subr.bf16.mxu1 %v6202_v59  ;;  %v6203_v59 = vld [vmem:[#allocation12 + $0xe8] ss:$16 sps:$4 sm:$0xff]  }
 0x4a4   :  { %3205 = vmatpush2.bf16.msra.mxu0 %v6152_v52 }
 0x4a5   :  { %4094 = vmatpush2.bf16.msra.mxu1 %v6200_v62  ;;  %4106 = vmatprep.subr.bf16.mxu0 %v6208_v0  ;;  %v6209_v0 = vld [vmem:[#allocation12 + $0xc8] ss:$16 sps:$4 sm:$0xff]  }
 0x4a6   :  { %4149 = vmatprep.subr.bf16.mxu1 %v6205_v63  ;;  %v6211_v63 = vld [vmem:[#allocation12 + $0xcc] ss:$16 sps:$4 sm:$0xff]  }
 0x4a7   :  { %3207 = vmatmul.mubr.bf16.vlgmr.msra.gmra.mxu0 %v7302_v58  ;;  %v6214_v58 = vld [vmem:[#allocation12 + $0x2c4] ss:$16 sps:$4 sm:$0xff]  }
 0x4a8   :  { %4107 = vmatpush1.bf16.msra.mxu0 %v6206_v1  ;;  %v6217_v1 = vld [vmem:[#allocation12 + $0xac] ss:$16 sps:$4 sm:$0xff]  }
 0x4a9   :  { %4108 = vmatprep.subr.bf16.mxu0 %v6214_v58  ;;  %v6223_v58 = vld [vmem:[#allocation12 + $0x8c] ss:$16 sps:$4 sm:$0xff]  }
 0x4ac   :  { %4109 = vmatpush1.bf16.msra.mxu0 %v6212_v2  ;;  %v6215_v2 = vld [vmem:[#allocation12 + $0xa8] ss:$16 sps:$4 sm:$0xff]  }
 0x4ad   :  { %4110 = vmatprep.subr.bf16.mxu0 %v6220_v6  ;;  %v6229_v6 = vld [vmem:[#allocation12 + $0x6c] ss:$16 sps:$4 sm:$0xff]  }
 0x4b0   :  { %4111 = vmatpush1.bf16.msra.mxu0 %v6218_v3  ;;  %v6221_v3 = vld [vmem:[#allocation12 + $0x88] ss:$16 sps:$4 sm:$0xff]  }
 0x4b1   :  { %4112 = vmatprep.subr.bf16.mxu0 %v6226_v8  ;;  %v6235_v8 = vld [vmem:[#allocation12 + $0x4c] ss:$16 sps:$4 sm:$0xff]  }
 0x4b4   :  { %4113 = vmatpush1.bf16.msra.mxu0 %v6224_v7  ;;  %v6227_v7 = vld [vmem:[#allocation12 + $0x68] ss:$16 sps:$4 sm:$0xff]  }
 0x4b5   :  { %4114 = vmatprep.subr.bf16.mxu0 %v6232_v10  ;;  %v6241_v10 = vld [vmem:[#allocation12 + $0x2c] ss:$16 sps:$4 sm:$0xff]  }
 0x4b8   :  { %4115 = vmatpush1.bf16.msra.mxu0 %v6230_v9  ;;  %v6233_v9 = vld [vmem:[#allocation12 + $0x48] ss:$16 sps:$4 sm:$0xff]  }
 0x4b9   :  { %4116 = vmatprep.subr.bf16.mxu0 %v6238_v57  ;;  %v6247_v57 = vld [vmem:[#allocation12 + $0xc] ss:$16 sps:$4 sm:$0xff]  }
 0x4bc   :  { %4117 = vmatpush1.bf16.msra.mxu0 %v6236_v11  ;;  %v6239_v11 = vld [vmem:[#allocation12 + $0x28] ss:$16 sps:$4 sm:$0xff]  }
 0x4bd   :  { %4118 = vmatprep.subr.bf16.mxu0 %v6244_v4  ;;  %v6253_v4 = vld [vmem:[#allocation12 + $0x1ec] ss:$16 sps:$4 sm:$0xff]  }
 0x4c0   :  { %4119 = vmatpush1.bf16.msra.mxu0 %v6242_v16  ;;  %v6245_v16 = vld [vmem:[#allocation12 + $0x8] ss:$16 sps:$4 sm:$0xff]  }
 0x4c1   :  { %4120 = vmatprep.subr.bf16.mxu0 %v6250_v17  ;;  %v6259_v17 = vld [vmem:[#allocation12 + $0x1cc] ss:$16 sps:$4 sm:$0xff]  }
 0x4c4   :  { %4121 = vmatpush1.bf16.msra.mxu0 %v6248_v5  ;;  %v6251_v5 = vld [vmem:[#allocation12 + $0x1e8] ss:$16 sps:$4 sm:$0xff]  }
 0x4c5   :  { %4122 = vmatprep.subr.bf16.mxu0 %v6256_v18  ;;  %v6265_v18 = vld [vmem:[#allocation12 + $0x1ac] ss:$16 sps:$4 sm:$0xff]  }
 0x4c8   :  { %4123 = vmatpush2.bf16.msra.mxu0 %v6254_v12  ;;  %v6257_v12 = vld [vmem:[#allocation12 + $0x1c8] ss:$16 sps:$4 sm:$0xff]  }
 0x4c9   :  { %4124 = vmatprep.subr.bf16.mxu0 %v6262_v20  ;;  %v6271_v20 = vld [vmem:[#allocation12 + $0x18c] ss:$16 sps:$4 sm:$0xff]  }
 0x4cc   :  { %4125 = vmatpush2.bf16.msra.mxu0 %v6260_v19  ;;  %v6263_v19 = vld [vmem:[#allocation12 + $0x1a8] ss:$16 sps:$4 sm:$0xff]  }
 0x4cd   :  { %4126 = vmatprep.subr.bf16.mxu0 %v6268_v13  ;;  %v6277_v13 = vld [vmem:[#allocation12 + $0x16c] ss:$16 sps:$4 sm:$0xff]  }
 0x4d0   :  { %4127 = vmatpush2.bf16.msra.mxu0 %v6266_v21  ;;  %v6269_v21 = vld [vmem:[#allocation12 + $0x188] ss:$16 sps:$4 sm:$0xff]  }
 0x4d1   :  { %4128 = vmatprep.subr.bf16.mxu0 %v6274_v24 }
 0x4d4   :  { %4129 = vmatpush2.bf16.msra.mxu0 %v6272_v23  ;;  %v6275_v23 = vld [vmem:[#allocation12 + $0x168] ss:$16 sps:$4 sm:$0xff]  }
 0x4d5   :  { %4130 = vmatprep.subr.bf16.mxu0 %v6280_v22  ;;  %v2603_v22 = vrot.slane %v7308_v35, %v7236_v60 }
 0x4d8   :  { %4131 = vmatpush2.bf16.msra.mxu0 %v6278_v25  ;;  %v6283_v25 = vld [vmem:[#allocation12 + $0x14c] ss:$16 sps:$4 sm:$0xff]  }
 0x4d9   :  { %4132 = vmatprep.subr.bf16.mxu0 %v6286_v26  ;;  %v6281_v26 = vld [vmem:[#allocation12 + $0x148] ss:$16 sps:$4 sm:$0xff]  }
 0x4dc   :  { %4133 = vmatpush2.bf16.msra.mxu0 %v6284_v27 }
 0x4dd   :  { %4134 = vmatprep.subr.bf16.mxu0 %v6292_v28  ;;  %v2599_v28 = vrot.slane %v7308_v35, %v7238_v61 }
 0x4e0   :  { %4135 = vmatpush2.bf16.msra.mxu0 %v6290_v29 }
 0x4e1   :  { %4136 = vmatprep.subr.bf16.mxu0 %v6298_v30  ;;  %v6289_v30 = vld [vmem:[#allocation12 + $0x12c] ss:$16 sps:$4 sm:$0xff]  }
 0x4e4   :  { %4137 = vmatpush2.bf16.msra.mxu0 %v6296_v31 }
 0x4e5   :  { %4192 = vmatprep.subr.bf16.mxu0 %v6301_v32 }
 0x527   :  { %v3165_v39 = vpop.f32.mrf.mxu0  ;;  %v3251_v24 = vpop.f32.mrf.mxu1 }
 0x528   :  { %v3166_v49 = vadd.f32 %v3165_v39, %v3123_v44  ;;  %v6293_v44 = vld [vmem:[#allocation12 + $0x108] ss:$16 sps:$4 sm:$0xff]  }
 0x529   :  { %v3167_v41 = vpop.f32.mrf.mxu0  ;;  %v3253_v27 = vpop.f32.mrf.mxu1 }
 0x52a   :  { %v3168_v47 = vadd.f32 %v3167_v41, %v3125_v42  ;;  %v3260_v55 = vmax.f32 %v3166_v49, 0.0 }
 0x52b   :  { %v3169_v45 = vpop.f32.mrf.mxu0  ;;  %v3255_v34 = vpop.f32.mrf.mxu1 }
 0x52c   :  { %v3170_v48 = vadd.f32 %v3169_v45, %v3127_v43  ;;  %v3261_v53 = vmax.f32 %v3168_v47, 0.0 }
 0x52d   :  { %v3171_v50 = vpop.f32.mrf.mxu0  ;;  %v3257_v35 = vpop.f32.mrf.mxu1 }
 0x52e   :  { %v3172_v51 = vadd.f32 %v3171_v50, %v3129_v46  ;;  %v3264_v52 = vmax.f32 %v3170_v48, 0.0 }
 0x530   :  { %v3265_v54 = vmax.f32 %v3172_v51, 0.0  ;;  %v7314_v62 = vpack.c.bf16 %v3264_v52, %v3260_v55  ;;  %v6299_v52 = vld [vmem:[#allocation12 + $0x2e8] ss:$16 sps:$4 sm:$0xff]  }
 0x531   :  { %v6302_v55 = vld [vmem:[#allocation12 + $0x2c8] ss:$16 sps:$4 sm:$0xff]  }
 0x532   :  { %v3269_v56 = vpack.c.bf16 %v3265_v54, %v3261_v53  ;;  %v6304_v54 = vld [vmem:[#allocation12 + $0x2cc] ss:$16 sps:$4 sm:$0xff]  }
 0x534   :  { %4095 = vmatprep.mubr.bf16.mxu1 %v3269_v56 }
 0x535   :  { %4096 = vmatmul.mubr.bf16.vlgmr.msra.gmra.mxu1 %v7314_v62 }
 0x536   :  { %4150 = vmatpush1.bf16.msra.mxu1 %v6203_v59  ;;  %4181 = vmatprep.mubr.bf16.mxu1 %v3269_v56  ;;  %v6307_v56 = vld [vmem:[#allocation12 + $0x2ac] ss:$16 sps:$4 sm:$0xff]   ;;  %v6305_v59 = vld [vmem:[#allocation12 + $0x2a8] ss:$16 sps:$4 sm:$0xff]  }
 0x537   :  { %4151 = vmatprep.subr.bf16.mxu1 %v6211_v63  ;;  %v6347_v63 = vld [vmem:[#allocation13 + $0x70] ss:$8 sps:$4 sm:$0xff]  }
 0x53a   :  { %4152 = vmatpush1.bf16.msra.mxu1 %v6209_v0  ;;  %v6349_v0 = vld [vmem:[#allocation13 + $0x74] ss:$8 sps:$4 sm:$0xff]  }
 0x53b   :  { %4153 = vmatprep.subr.bf16.mxu1 %v6217_v1  ;;  %v6310_v1 = vld [vmem:[#allocation12 + $0x28c] ss:$16 sps:$4 sm:$0xff]  }
 0x53e   :  { %4154 = vmatpush1.bf16.msra.mxu1 %v6215_v2  ;;  %v6352_v2 = vld [vmem:[#allocation13 + $0x64] ss:$8 sps:$4 sm:$0xff]  }
 0x53f   :  { %4155 = vmatprep.subr.bf16.mxu1 %v6223_v58  ;;  %v6350_v58 = vld [vmem:[#allocation13 + $0x60] ss:$8 sps:$4 sm:$0xff]  }
 0x542   :  { %4156 = vmatpush1.bf16.msra.mxu1 %v6221_v3  ;;  %v6355_v3 = vld [vmem:[#allocation13 + $0x54] ss:$8 sps:$4 sm:$0xff]  }
 0x543   :  { %4157 = vmatprep.subr.bf16.mxu1 %v6229_v6  ;;  %v6313_v6 = vld [vmem:[#allocation12 + $0x26c] ss:$16 sps:$4 sm:$0xff]  }
 0x546   :  { %4158 = vmatpush1.bf16.msra.mxu1 %v6227_v7  ;;  %v6353_v7 = vld [vmem:[#allocation13 + $0x50] ss:$8 sps:$4 sm:$0xff]  }
 0x547   :  { %4159 = vmatprep.subr.bf16.mxu1 %v6235_v8  ;;  %v6311_v8 = vld [vmem:[#allocation12 + $0x268] ss:$16 sps:$4 sm:$0xff]  }
 0x54a   :  { %4160 = vmatpush1.bf16.msra.mxu1 %v6233_v9  ;;  %v6358_v9 = vld [vmem:[#allocation13 + $0x44] ss:$8 sps:$4 sm:$0xff]  }
 0x54b   :  { %4161 = vmatprep.subr.bf16.mxu1 %v6241_v10  ;;  %v6316_v10 = vld [vmem:[#allocation12 + $0x24c] ss:$16 sps:$4 sm:$0xff]  }
 0x54e   :  { %4162 = vmatpush1.bf16.msra.mxu1 %v6239_v11  ;;  %v6356_v11 = vld [vmem:[#allocation13 + $0x40] ss:$8 sps:$4 sm:$0xff]  }
 0x54f   :  { %4163 = vmatprep.subr.bf16.mxu1 %v6247_v57  ;;  %v6314_v57 = vld [vmem:[#allocation12 + $0x248] ss:$16 sps:$4 sm:$0xff]  }
 0x552   :  { %4164 = vmatpush1.bf16.msra.mxu1 %v6245_v16  ;;  %v6361_v16 = vld [vmem:[#allocation13 + $0x34] ss:$8 sps:$4 sm:$0xff]  }
 0x553   :  { %4165 = vmatprep.subr.bf16.mxu1 %v6253_v4  ;;  %v6319_v4 = vld [vmem:[#allocation12 + $0x22c] ss:$16 sps:$4 sm:$0xff]  }
 0x556   :  { %4166 = vmatpush2.bf16.msra.mxu1 %v6251_v5  ;;  %v6359_v5 = vld [vmem:[#allocation13 + $0x30] ss:$8 sps:$4 sm:$0xff]  }
 0x557   :  { %4167 = vmatprep.subr.bf16.mxu1 %v6259_v17  ;;  %v6317_v17 = vld [vmem:[#allocation12 + $0x228] ss:$16 sps:$4 sm:$0xff]  }
 0x55a   :  { %4168 = vmatpush2.bf16.msra.mxu1 %v6257_v12  ;;  %v6364_v12 = vld [vmem:[#allocation13 + $0x24] ss:$8 sps:$4 sm:$0xff]  }
 0x55b   :  { %4169 = vmatprep.subr.bf16.mxu1 %v6265_v18  ;;  %v6322_v18 = vld [vmem:[#allocation12 + $0x20c] ss:$16 sps:$4 sm:$0xff]  }
 0x55e   :  { %4170 = vmatpush2.bf16.msra.mxu1 %v6263_v19  ;;  %v6362_v19 = vld [vmem:[#allocation13 + $0x20] ss:$8 sps:$4 sm:$0xff]  }
 0x55f   :  { %4171 = vmatprep.subr.bf16.mxu1 %v6271_v20  ;;  %v6320_v20 = vld [vmem:[#allocation12 + $0x208] ss:$16 sps:$4 sm:$0xff]  }
 0x562   :  { %4172 = vmatpush2.bf16.msra.mxu1 %v6269_v21  ;;  %v6367_v21 = vld [vmem:[#allocation13 + $0x14] ss:$8 sps:$4 sm:$0xff]  }
 0x563   :  { %4173 = vmatprep.subr.bf16.mxu1 %v6277_v13  ;;  %v6325_v13 = vld [vmem:[#allocation12 + $0x3ec] ss:$16 sps:$4 sm:$0xff]  }
 0x566   :  { %4174 = vmatpush2.bf16.msra.mxu1 %v6275_v23  ;;  %v6365_v23 = vld [vmem:[#allocation13 + $0x10] ss:$8 sps:$4 sm:$0xff]  }
 0x567   :  { %v3208_v29 = vpop.f32.mrf.mxu0  ;;  %4175 = vmatprep.subr.bf16.mxu1 %v6283_v25  ;;  %v6370_v25 = vld [vmem:[#allocation13 + $0x4] ss:$8 sps:$4 sm:$0xff]  }
 0x568   :  { %v3209_v36 = vadd.f32 %v3208_v29, %v2599_v28  ;;  %v6331_v29 = vld [vmem:[#allocation12 + $0x3ac] ss:$16 sps:$4 sm:$0xff]  }
 0x569   :  { %v3210_v31 = vpop.f32.mrf.mxu0 }
 0x56a   :  { %v3211_v32 = vadd.f32 %v3210_v31, %v2603_v22  ;;  %4176 = vmatpush2.bf16.msra.mxu1 %v6281_v26  ;;  %v3252_v45 = vadd.f32 %v3251_v24, %v3209_v36  ;;  %v6323_v24 = vld [vmem:[#allocation12 + $0x3e8] ss:$16 sps:$4 sm:$0xff]  }
 0x56b   :  { %v3212_v37 = vpop.f32.mrf.mxu0  ;;  %4177 = vmatprep.subr.bf16.mxu1 %v6289_v30  ;;  %v6368_v26 = vld [vmem:[#allocation13] ss:$8 sps:$4 sm:$0xff]   ;;  %v6371_v30 = vld [vmem:[#allocation13 + $0xf0] ss:$8 sps:$4 sm:$0xff]  }
 0x56c   :  { %v3213_v39 = vadd.f32 %v3212_v37, %v2599_v28  ;;  %v3254_v41 = vadd.f32 %v3253_v27, %v3211_v32  ;;  %v3262_v50 = vmax.f32 %v3252_v45, 0.0  ;;  %v6326_v27 = vld [vmem:[#allocation12 + $0x3c8] ss:$16 sps:$4 sm:$0xff]   ;;  %v6373_v28 = vld [vmem:[#allocation13 + $0xf4] ss:$8 sps:$4 sm:$0xff]  }
 0x56d   :  { %v3214_v40 = vpop.f32.mrf.mxu0  ;;  %v6329_v31 = vld [vmem:[#allocation12 + $0x3a8] ss:$16 sps:$4 sm:$0xff]   ;;  %v6376_v32 = vld [vmem:[#allocation13 + $0xe4] ss:$8 sps:$4 sm:$0xff]   ;;  %v6379_v37 = vld [vmem:[#allocation13 + $0xd4] ss:$8 sps:$4 sm:$0xff]  }
 0x56e   :  { %v3256_v42 = vadd.f32 %v3255_v34, %v3213_v39  ;;  %v3215_v43 = vadd.f32 %v3214_v40, %v2603_v22  ;;  %4178 = vmatpush2.bf16.msra.mxu1 %v6287_v33  ;;  %v3263_v48 = vmax.f32 %v3254_v41, 0.0  ;;  %v6328_v22 = vld [vmem:[#allocation12 + $0x3cc] ss:$16 sps:$4 sm:$0xff]   ;;  %v6374_v34 = vld [vmem:[#allocation13 + $0xe0] ss:$8 sps:$4 sm:$0xff]  }
 0x56f   :  { %4179 = vmatprep.subr.bf16.mxu1 %v6295_v38  ;;  %v6334_v33 = vld [vmem:[#allocation12 + $0x38c] ss:$16 sps:$4 sm:$0xff]   ;;  %v6332_v36 = vld [vmem:[#allocation12 + $0x388] ss:$16 sps:$4 sm:$0xff]  }
 0x570   :  { %v3258_v46 = vadd.f32 %v3257_v35, %v3215_v43  ;;  %v3266_v47 = vmax.f32 %v3256_v42, 0.0  ;;  %v6337_v38 = vld [vmem:[#allocation12 + $0x36c] ss:$16 sps:$4 sm:$0xff]   ;;  %v6377_v39 = vld [vmem:[#allocation13 + $0xd0] ss:$8 sps:$4 sm:$0xff]  }
 0x571   :  { %v6335_v40 = vld [vmem:[#allocation12 + $0x368] ss:$16 sps:$4 sm:$0xff]   ;;  %v6382_v41 = vld [vmem:[#allocation13 + $0xc4] ss:$8 sps:$4 sm:$0xff]  }
 0x572   :  { %v3267_v49 = vmax.f32 %v3258_v46, 0.0  ;;  %4180 = vmatpush2.bf16.msra.mxu1 %v6293_v44  ;;  %v7321_v53 = vpack.c.bf16 %v3266_v47, %v3262_v50  ;;  %v6340_v42 = vld [vmem:[#allocation12 + $0x34c] ss:$16 sps:$4 sm:$0xff]   ;;  %v6380_v43 = vld [vmem:[#allocation13 + $0xc0] ss:$8 sps:$4 sm:$0xff]  }
 0x573   :  { %4644 = vmatprep.subr.bf16.mxu1 %v6349_v0  ;;  %v6338_v44 = vld [vmem:[#allocation12 + $0x348] ss:$16 sps:$4 sm:$0xff]   ;;  %v6343_v35 = vld [vmem:[#allocation12 + $0x32c] ss:$16 sps:$4 sm:$0xff]  }
 0x574   :  { %v3271_v51 = vpack.c.bf16 %v3267_v49, %v3263_v48  ;;  %v6341_v45 = vld [vmem:[#allocation12 + $0x328] ss:$16 sps:$4 sm:$0xff]   ;;  %v6346_v46 = vld [vmem:[#allocation12 + $0x30c] ss:$16 sps:$4 sm:$0xff]  }
 0x575   :  { %4182 = vmatmul.mubr.bf16.vlgmr.msra.gmra.mxu1 %v7314_v62  ;;  %v6308_v62 = vld [vmem:[#allocation12 + $0x288] ss:$16 sps:$4 sm:$0xff]   ;;  %v6385_v48 = vld [vmem:[#allocation13 + $0xb4] ss:$8 sps:$4 sm:$0xff]   ;;  %v6388_v50 = vld [vmem:[#allocation13 + $0xa4] ss:$8 sps:$4 sm:$0xff]  }
 0x576   :  { %4138 = vmatprep.mubr.bf16.mxu0 %v3271_v51  ;;  %4645 = vmatpush1.bf16.msra.mxu1 %v6347_v63  ;;  %v6344_v47 = vld [vmem:[#allocation12 + $0x308] ss:$16 sps:$4 sm:$0xff]   ;;  %v6400_v0 = vld [vmem:[#allocation13 + $0x164] ss:$8 sps:$4 sm:$0xff]  }
 0x577   :  { %4139 = vmatmul.mubr.bf16.vlgmr.msra.gmra.mxu0 %v7321_v53  ;;  %4646 = vmatprep.subr.bf16.mxu1 %v6352_v2  ;;  %v6383_v49 = vld [vmem:[#allocation13 + $0xb0] ss:$8 sps:$4 sm:$0xff]  }
 0x578   :  { %4193 = vmatpush1.bf16.msra.mxu0 %v6299_v52  ;;  %4224 = vmatprep.mubr.bf16.mxu0 %v3271_v51  ;;  %v6386_v51 = vld [vmem:[#allocation13 + $0xa0] ss:$8 sps:$4 sm:$0xff]   ;;  %v6391_v52 = vld [vmem:[#allocation13 + $0x94] ss:$8 sps:$4 sm:$0xff]   ;;  %v6395_v63 = vld [vmem:[#allocation13 + $0x170] ss:$8 sps:$4 sm:$0xff]  }
 0x579   :  { %4194 = vmatprep.subr.bf16.mxu0 %v6304_v54  ;;  %v6389_v54 = vld [vmem:[#allocation13 + $0x90] ss:$8 sps:$4 sm:$0xff]  }
 0x57a   :  { %4647 = vmatpush1.bf16.msra.mxu1 %v6350_v58  ;;  %v6401_v2 = vld [vmem:[#allocation13 + $0x150] ss:$8 sps:$4 sm:$0xff]   ;;  %v6406_v58 = vld [vmem:[#allocation13 + $0x144] ss:$8 sps:$4 sm:$0xff]  }
 0x57b   :  { %4648 = vmatprep.subr.bf16.mxu1 %v6355_v3  ;;  %v6409_v3 = vld [vmem:[#allocation13 + $0x134] ss:$8 sps:$4 sm:$0xff]  }
 0x57c   :  { %4195 = vmatpush1.bf16.msra.mxu0 %v6302_v55  ;;  %v6394_v55 = vld [vmem:[#allocation13 + $0x84] ss:$8 sps:$4 sm:$0xff]  }
 0x57d   :  { %4196 = vmatprep.subr.bf16.mxu0 %v6307_v56  ;;  %v6392_v56 = vld [vmem:[#allocation13 + $0x80] ss:$8 sps:$4 sm:$0xff]  }
 0x57e   :  { %4649 = vmatpush1.bf16.msra.mxu1 %v6353_v7  ;;  %v6412_v7 = vld [vmem:[#allocation13 + $0x124] ss:$8 sps:$4 sm:$0xff]  }
 0x57f   :  { %4650 = vmatprep.subr.bf16.mxu1 %v6358_v9  ;;  %v6415_v9 = vld [vmem:[#allocation13 + $0x114] ss:$8 sps:$4 sm:$0xff]  }
 0x580   :  { %4197 = vmatpush1.bf16.msra.mxu0 %v6305_v59  ;;  %v6397_v59 = vld [vmem:[#allocation13 + $0x174] ss:$8 sps:$4 sm:$0xff]  }
 0x581   :  { %4198 = vmatprep.subr.bf16.mxu0 %v6310_v1  ;;  %v6398_v1 = vld [vmem:[#allocation13 + $0x160] ss:$8 sps:$4 sm:$0xff]  }
 0x582   :  { %4651 = vmatpush1.bf16.msra.mxu1 %v6356_v11  ;;  %v6418_v11 = vld [vmem:[#allocation13 + $0x104] ss:$8 sps:$4 sm:$0xff]  }
 0x583   :  { %4652 = vmatprep.subr.bf16.mxu1 %v6361_v16  ;;  %v6421_v16 = vld [vmem:[#allocation13 + $0x1f4] ss:$8 sps:$4 sm:$0xff]  }
 0x584   :  { %4199 = vmatpush1.bf16.msra.mxu0 %v6308_v62  ;;  %v6404_v62 = vld [vmem:[#allocation13 + $0x140] ss:$8 sps:$4 sm:$0xff]  }
 0x585   :  { %4200 = vmatprep.subr.bf16.mxu0 %v6313_v6  ;;  %v6407_v6 = vld [vmem:[#allocation13 + $0x130] ss:$8 sps:$4 sm:$0xff]  }
 0x586   :  { %4653 = vmatpush1.bf16.msra.mxu1 %v6359_v5  ;;  %v6424_v5 = vld [vmem:[#allocation13 + $0x1e4] ss:$8 sps:$4 sm:$0xff]  }
 0x587   :  { %4654 = vmatprep.subr.bf16.mxu1 %v6364_v12  ;;  %v6427_v12 = vld [vmem:[#allocation13 + $0x1d4] ss:$8 sps:$4 sm:$0xff]  }
 0x588   :  { %4201 = vmatpush1.bf16.msra.mxu0 %v6311_v8  ;;  %v6410_v8 = vld [vmem:[#allocation13 + $0x120] ss:$8 sps:$4 sm:$0xff]  }
 0x589   :  { %4202 = vmatprep.subr.bf16.mxu0 %v6316_v10  ;;  %v6413_v10 = vld [vmem:[#allocation13 + $0x110] ss:$8 sps:$4 sm:$0xff]  }
 0x58a   :  { %4655 = vmatpush1.bf16.msra.mxu1 %v6362_v19  ;;  %v6430_v19 = vld [vmem:[#allocation13 + $0x1c4] ss:$8 sps:$4 sm:$0xff]  }
 0x58b   :  { %4656 = vmatprep.subr.bf16.mxu1 %v6367_v21  ;;  %v6433_v21 = vld [vmem:[#allocation13 + $0x1b4] ss:$8 sps:$4 sm:$0xff]  }
 0x58c   :  { %4203 = vmatpush1.bf16.msra.mxu0 %v6314_v57  ;;  %v6416_v57 = vld [vmem:[#allocation13 + $0x100] ss:$8 sps:$4 sm:$0xff]  }
 0x58d   :  { %4204 = vmatprep.subr.bf16.mxu0 %v6319_v4  ;;  %v6419_v4 = vld [vmem:[#allocation13 + $0x1f0] ss:$8 sps:$4 sm:$0xff]  }
 0x58e   :  { %4657 = vmatpush1.bf16.msra.mxu1 %v6365_v23  ;;  %v6436_v23 = vld [vmem:[#allocation13 + $0x1a4] ss:$8 sps:$4 sm:$0xff]  }
 0x58f   :  { %4658 = vmatprep.subr.bf16.mxu1 %v6370_v25  ;;  %v6439_v25 = vld [vmem:[#allocation13 + $0x194] ss:$8 sps:$4 sm:$0xff]  }
 0x590   :  { %4205 = vmatpush1.bf16.msra.mxu0 %v6317_v17  ;;  %v6422_v17 = vld [vmem:[#allocation13 + $0x1e0] ss:$8 sps:$4 sm:$0xff]  }
 0x591   :  { %4206 = vmatprep.subr.bf16.mxu0 %v6322_v18  ;;  %v6425_v18 = vld [vmem:[#allocation13 + $0x1d0] ss:$8 sps:$4 sm:$0xff]  }
 0x592   :  { %4659 = vmatpush1.bf16.msra.mxu1 %v6368_v26  ;;  %v6442_v26 = vld [vmem:[#allocation13 + $0x184] ss:$8 sps:$4 sm:$0xff]  }
 0x593   :  { %4660 = vmatprep.subr.bf16.mxu1 %v6373_v28 }
 0x594   :  { %4207 = vmatpush1.bf16.msra.mxu0 %v6320_v20  ;;  %v6428_v20 = vld [vmem:[#allocation13 + $0x1c0] ss:$8 sps:$4 sm:$0xff]  }
 0x595   :  { %4208 = vmatprep.subr.bf16.mxu0 %v6325_v13  ;;  %v6431_v13 = vld [vmem:[#allocation13 + $0x1b0] ss:$8 sps:$4 sm:$0xff]  }
 0x596   :  { %4661 = vmatpush2.bf16.msra.mxu1 %v6371_v30  ;;  %v3401_v30 = vld [vmem:[#allocation2 + $0x7] ss:$8 sm:$0xf] }
 0x597   :  { %4662 = vmatprep.subr.bf16.mxu1 %v6376_v32  ;;  %v3410_v32 = vrot.slane %v3401_v30, %v7230_v14 }
 0x598   :  { %4209 = vmatpush2.bf16.msra.mxu0 %v6323_v24  ;;  %v6434_v24 = vld [vmem:[#allocation13 + $0x1a0] ss:$8 sps:$4 sm:$0xff]  }
 0x599   :  { %4210 = vmatprep.subr.bf16.mxu0 %v6328_v22  ;;  %v6437_v22 = vld [vmem:[#allocation13 + $0x190] ss:$8 sps:$4 sm:$0xff]  }
 0x59a   :  { %4663 = vmatpush2.bf16.msra.mxu1 %v6374_v34 }
 0x59b   :  { %4664 = vmatprep.subr.bf16.mxu1 %v6379_v37 }
 0x59c   :  { %4211 = vmatpush2.bf16.msra.mxu0 %v6326_v27  ;;  %v6440_v27 = vld [vmem:[#allocation13 + $0x180] ss:$8 sps:$4 sm:$0xff]  }
 0x59d   :  { %4212 = vmatprep.subr.bf16.mxu0 %v6331_v29 }
 0x59e   :  { %4665 = vmatpush2.bf16.msra.mxu1 %v6377_v39 }
 0x59f   :  { %4666 = vmatprep.subr.bf16.mxu1 %v6382_v41 }
 0x5a0   :  { %4213 = vmatpush2.bf16.msra.mxu0 %v6329_v31 }
 0x5a1   :  { %4214 = vmatprep.subr.bf16.mxu0 %v6334_v33  ;;  %v3406_v33 = vrot.slane %v3401_v30, %v7232_v15 }
 0x5a2   :  { %4667 = vmatpush2.bf16.msra.mxu1 %v6380_v43 }
 0x5a3   :  { %4668 = vmatprep.subr.bf16.mxu1 %v6385_v48 }
 0x5a4   :  { %4215 = vmatpush2.bf16.msra.mxu0 %v6332_v36 }
 0x5a5   :  { %4216 = vmatprep.subr.bf16.mxu0 %v6337_v38 }
 0x5a6   :  { %4669 = vmatpush2.bf16.msra.mxu1 %v6383_v49 }
 0x5a7   :  { %4670 = vmatprep.subr.bf16.mxu1 %v6388_v50 }
 0x5a8   :  { %4217 = vmatpush2.bf16.msra.mxu0 %v6335_v40 }
 0x5a9   :  { %4218 = vmatprep.subr.bf16.mxu0 %v6340_v42 }
 0x5aa   :  { %4671 = vmatpush2.bf16.msra.mxu1 %v6386_v51 }
 0x5ab   :  { %4672 = vmatprep.subr.bf16.mxu1 %v6391_v52 }
 0x5ac   :  { %4219 = vmatpush2.bf16.msra.mxu0 %v6338_v44 }
 0x5ad   :  { %4220 = vmatprep.subr.bf16.mxu0 %v6343_v35 }
 0x5ae   :  { %4673 = vmatpush2.bf16.msra.mxu1 %v6389_v54 }
 0x5af   :  { %4674 = vmatprep.subr.bf16.mxu1 %v6394_v55 }
 0x5b0   :  { %4221 = vmatpush2.bf16.msra.mxu0 %v6341_v45 }
 0x5b1   :  { %4222 = vmatprep.subr.bf16.mxu0 %v6346_v46 }
 0x5b2   :  { %4675 = vmatpush2.bf16.msra.mxu1 %v6392_v56 }
 0x5b4   :  { %4223 = vmatpush2.bf16.msra.mxu0 %v6344_v47 }
 0x5b5   :  { %4687 = vmatprep.subr.bf16.mxu0 %v6397_v59  ;;  %v3418_v59 = vrot.slane %v3401_v30, %v7236_v60 }
 0x5b7   :  { %4225 = vmatmul.mubr.bf16.vlgmr.msra.gmra.mxu0 %v7321_v53  ;;  %v6403_v53 = vld [vmem:[#allocation13 + $0x154] ss:$8 sps:$4 sm:$0xff]  }
 0x5b8   :  { %4688 = vmatpush1.bf16.msra.mxu0 %v6395_v63  ;;  %v3414_v63 = vrot.slane %v3401_v30, %v7238_v61  ;;  %v6443_v61 = vld [vmem:[#allocation15 + $0x78] sm:$0xff]   ;;  %v6458_v30 = vld [vmem:[#allocation15] sm:$0xff]  }
 0x5b9   :  { %4689 = vmatprep.subr.bf16.mxu0 %v6400_v0  ;;  %5558 = vmatprep.subr.bf16.mxu1 %v6443_v61 }
 0x5bc   :  { %4690 = vmatpush1.bf16.msra.mxu0 %v6398_v1 }
 0x5bd   :  { %4691 = vmatprep.subr.bf16.mxu0 %v6403_v53 }
 0x5c0   :  { %4692 = vmatpush1.bf16.msra.mxu0 %v6401_v2 }
 0x5c1   :  { %4693 = vmatprep.subr.bf16.mxu0 %v6406_v58 }
 0x5c4   :  { %4694 = vmatpush1.bf16.msra.mxu0 %v6404_v62 }
 0x5c5   :  { %4695 = vmatprep.subr.bf16.mxu0 %v6409_v3 }
 0x5c8   :  { %4696 = vmatpush1.bf16.msra.mxu0 %v6407_v6 }
 0x5c9   :  { %4697 = vmatprep.subr.bf16.mxu0 %v6412_v7 }
 0x5cc   :  { %4698 = vmatpush1.bf16.msra.mxu0 %v6410_v8 }
 0x5cd   :  { %4699 = vmatprep.subr.bf16.mxu0 %v6415_v9 }
 0x5d0   :  { %4700 = vmatpush1.bf16.msra.mxu0 %v6413_v10 }
 0x5d1   :  { %4701 = vmatprep.subr.bf16.mxu0 %v6418_v11 }
 0x5d4   :  { %4702 = vmatpush1.bf16.msra.mxu0 %v6416_v57 }
 0x5d5   :  { %4703 = vmatprep.subr.bf16.mxu0 %v6421_v16 }
 0x5d8   :  { %4704 = vmatpush2.bf16.msra.mxu0 %v6419_v4 }
 0x5d9   :  { %4705 = vmatprep.subr.bf16.mxu0 %v6424_v5 }
 0x5dc   :  { %4706 = vmatpush2.bf16.msra.mxu0 %v6422_v17 }
 0x5dd   :  { %4707 = vmatprep.subr.bf16.mxu0 %v6427_v12  ;;  %v6444_v12 = vld [vmem:[#allocation15 + $0x38] sm:$0xff]  }
 0x5e0   :  { %4708 = vmatpush2.bf16.msra.mxu0 %v6425_v18  ;;  %v6445_v18 = vld [vmem:[#allocation15 + $0x70] sm:$0xff]  }
 0x5e1   :  { %4709 = vmatprep.subr.bf16.mxu0 %v6430_v19  ;;  %v6446_v19 = vld [vmem:[#allocation15 + $0x30] sm:$0xff]  }
 0x5e4   :  { %4710 = vmatpush2.bf16.msra.mxu0 %v6428_v20  ;;  %v6447_v20 = vld [vmem:[#allocation15 + $0x68] sm:$0xff]  }
 0x5e5   :  { %4711 = vmatprep.subr.bf16.mxu0 %v6433_v21  ;;  %v6448_v21 = vld [vmem:[#allocation15 + $0x28] sm:$0xff]  }
 0x5e8   :  { %4712 = vmatpush2.bf16.msra.mxu0 %v6431_v13  ;;  %v6449_v13 = vld [vmem:[#allocation15 + $0x60] sm:$0xff]  }
 0x5e9   :  { %4713 = vmatprep.subr.bf16.mxu0 %v6436_v23  ;;  %v6450_v23 = vld [vmem:[#allocation15 + $0x20] sm:$0xff]  }
 0x5ec   :  { %4714 = vmatpush2.bf16.msra.mxu0 %v6434_v24  ;;  %v6451_v24 = vld [vmem:[#allocation15 + $0x58] sm:$0xff]  }
 0x5ed   :  { %4715 = vmatprep.subr.bf16.mxu0 %v6439_v25  ;;  %v6452_v25 = vld [vmem:[#allocation15 + $0x18] sm:$0xff]  }
 0x5f0   :  { %4716 = vmatpush2.bf16.msra.mxu0 %v6437_v22  ;;  %v6453_v22 = vld [vmem:[#allocation15 + $0x50] sm:$0xff]  }
 0x5f1   :  { %4717 = vmatprep.subr.bf16.mxu0 %v6442_v26  ;;  %v6454_v26 = vld [vmem:[#allocation15 + $0x10] sm:$0xff]  }
 0x5f4   :  { %4718 = vmatpush2.bf16.msra.mxu0 %v6440_v27  ;;  %v6455_v27 = vld [vmem:[#allocation15 + $0x48] sm:$0xff]  }
 0x5f5   :  { %v4097_v28 = vpop.f32.mrf.mxu1 }
 0x5f6   :  { %v4098_v40 = vadd.f32 %v4097_v28, %v3406_v33  ;;  %v6456_v28 = vld [vmem:[#allocation15 + $0x8] sm:$0xff]  }
 0x5f7   :  { %v4099_v29 = vpop.f32.mrf.mxu1 }
 0x5f8   :  { %v4100_v38 = vadd.f32 %v4099_v29, %v3410_v32  ;;  %v6457_v29 = vld [vmem:[#allocation15 + $0x40] sm:$0xff]  }
 0x5f9   :  { %v4101_v31 = vpop.f32.mrf.mxu1 }
 0x5fa   :  { %v4102_v39 = vadd.f32 %v4101_v31, %v3406_v33  ;;  %v4312_v33 = vld [vmem:[#allocation2 + $0x20] ss:$8 sm:$0x3] }
 0x5fb   :  { %v4103_v36 = vpop.f32.mrf.mxu1 }
 0x5fc   :  { %v4104_v42 = vadd.f32 %v4103_v36, %v3410_v32  ;;  %v4321_v36 = vrot.slane %v4312_v33, %v7230_v14 }
 0x635   :  { %v4183_v54 = vpop.f32.mrf.mxu1 }
 0x636   :  { %v4184_v62 = vadd.f32 %v4183_v54, %v3414_v63 }
 0x637   :  { %v4140_v34 = vpop.f32.mrf.mxu0  ;;  %v4185_v55 = vpop.f32.mrf.mxu1 }
 0x638   :  { %v4141_v35 = vadd.f32 %v4140_v34, %v4098_v40  ;;  %v4186_v2 = vadd.f32 %v4185_v55, %v3418_v59 }
 0x639   :  { %v4142_v37 = vpop.f32.mrf.mxu0  ;;  %v4187_v56 = vpop.f32.mrf.mxu1 }
 0x63a   :  { %v4143_v43 = vadd.f32 %v4142_v37, %v4100_v38  ;;  %v4235_v50 = vmax.f32 %v4141_v35, 0.0  ;;  %v4188_v58 = vadd.f32 %v4187_v56, %v3414_v63  ;;  %v4317_v37 = vrot.slane %v4312_v33, %v7232_v15  ;;  %v4768_v56 = vld [vmem:[#allocation2 + $0x21] ss:$0 sm:$0xff] }
 0x63b   :  { %v4144_v41 = vpop.f32.mrf.mxu0  ;;  %v4189_v1 = vpop.f32.mrf.mxu1 }
 0x63c   :  { %v4145_v44 = vadd.f32 %v4144_v41, %v4102_v39  ;;  %v4236_v48 = vmax.f32 %v4143_v43, 0.0  ;;  %v4190_v6 = vadd.f32 %v4189_v1, %v3418_v59 }
 0x63d   :  { %v4146_v45 = vpop.f32.mrf.mxu0 }
 0x63e   :  { %v4147_v46 = vadd.f32 %v4146_v45, %v4104_v42  ;;  %v4239_v47 = vmax.f32 %v4145_v44, 0.0 }
 0x640   :  { %v4240_v49 = vmax.f32 %v4147_v46, 0.0  ;;  %v4243_v52 = vpack.c.bf16 %v4239_v47, %v4235_v50 }
 0x642   :  { %v4244_v51 = vpack.c.bf16 %v4240_v49, %v4236_v48 }
 0x644   :  { %4676 = vmatprep.mubr.bf16.mxu1 %v4244_v51 }
 0x645   :  { %4677 = vmatmul.mubr.bf16.vlgmr.msra.gmra.mxu1 %v4243_v52 }
 0x646   :  { %5559 = vmatpush3.bf16.msra.mxu1 %v6444_v12 }
 0x647   :  { %5560 = vmatprep.subr.bf16.mxu1 %v6445_v18 }
 0x64a   :  { %5561 = vmatpush3.bf16.msra.mxu1 %v6446_v19 }
 0x64b   :  { %5562 = vmatprep.subr.bf16.mxu1 %v6447_v20 }
 0x64e   :  { %5563 = vmatpush3.bf16.msra.mxu1 %v6448_v21 }
 0x64f   :  { %5564 = vmatprep.subr.bf16.mxu1 %v6449_v13 }
 0x652   :  { %5565 = vmatpush3.bf16.msra.mxu1 %v6450_v23 }
 0x653   :  { %5566 = vmatprep.subr.bf16.mxu1 %v6451_v24 }
 0x656   :  { %5567 = vmatpush3.bf16.msra.mxu1 %v6452_v25 }
 0x657   :  { %5568 = vmatprep.subr.bf16.mxu1 %v6453_v22 }
 0x65a   :  { %5569 = vmatpush3.bf16.msra.mxu1 %v6454_v26 }
 0x65b   :  { %5570 = vmatprep.subr.bf16.mxu1 %v6455_v27 }
 0x65e   :  { %5571 = vmatpush3.bf16.msra.mxu1 %v6456_v28 }
 0x65f   :  { %5572 = vmatprep.subr.bf16.mxu1 %v6457_v29 }
 0x662   :  { %5573 = vmatpush3.bf16.msra.mxu1 %v6458_v30 }
 0x677   :  { %v4226_v0 = vpop.f32.mrf.mxu0 }
 0x678   :  { %v4227_v9 = vadd.f32 %v4226_v0, %v4184_v62 }
 0x679   :  { %v4228_v53 = vpop.f32.mrf.mxu0 }
 0x67a   :  { %v4229_v7 = vadd.f32 %v4228_v53, %v4186_v2  ;;  %v4237_v5 = vmax.f32 %v4227_v9, 0.0 }
 0x67b   :  { %v4230_v3 = vpop.f32.mrf.mxu0 }
 0x67c   :  { %v4231_v8 = vadd.f32 %v4230_v3, %v4188_v58  ;;  %v4238_v16 = vmax.f32 %v4229_v7, 0.0 }
 0x67d   :  { %v4232_v10 = vpop.f32.mrf.mxu0 }
 0x67e   :  { %v4233_v11 = vadd.f32 %v4232_v10, %v4190_v6  ;;  %v4241_v57 = vmax.f32 %v4231_v8, 0.0 }
 0x680   :  { %v4242_v4 = vmax.f32 %v4233_v11, 0.0  ;;  %v4245_v17 = vpack.c.bf16 %v4241_v57, %v4237_v5 }
 0x682   :  { %v4246_v60 = vpack.c.bf16 %v4242_v4, %v4238_v16 }
 0x684   :  { %4719 = vmatprep.mubr.bf16.mxu0 %v4246_v60 }
 0x685   :  { %4720 = vmatmul.mubr.bf16.vlgmr.msra.gmra.mxu0 %v4245_v17 }
 0x705   :  { %v4678_v31 = vpop.f32.mrf.mxu1 }
 0x706   :  { %v4679_v43 = vadd.f32 %v4678_v31, %v4317_v37 }
 0x707   :  { %v4680_v32 = vpop.f32.mrf.mxu1 }
 0x708   :  { %v4681_v41 = vadd.f32 %v4680_v32, %v4321_v36 }
 0x709   :  { %v4682_v34 = vpop.f32.mrf.mxu1 }
 0x70a   :  { %v4683_v42 = vadd.f32 %v4682_v34, %v4317_v37 }
 0x70b   :  { %v4684_v39 = vpop.f32.mrf.mxu1 }
 0x70c   :  { %v4685_v35 = vadd.f32 %v4684_v39, %v4321_v36 }
 0x745   :  { %v4721_v38 = vpop.f32.mrf.mxu0 }
 0x746   :  { %v4722_v47 = vadd.f32 %v4721_v38, %v4679_v43 }
 0x747   :  { %v4723_v40 = vpop.f32.mrf.mxu0 }
 0x748   :  { %v4724_v45 = vadd.f32 %v4723_v40, %v4681_v41  ;;  %v4730_v54 = vmax.f32 %v4722_v47, 0.0 }
 0x749   :  { %v4725_v44 = vpop.f32.mrf.mxu0 }
 0x74a   :  { %v4726_v46 = vadd.f32 %v4725_v44, %v4683_v42  ;;  %v4731_v51 = vmax.f32 %v4724_v45, 0.0 }
 0x74b   :  { %v4727_v48 = vpop.f32.mrf.mxu0 }
 0x74c   :  { %v4728_v49 = vadd.f32 %v4727_v48, %v4685_v35  ;;  %v4732_v50 = vmax.f32 %v4726_v46, 0.0 }
 0x74e   :  { %v4733_v52 = vmax.f32 %v4728_v49, 0.0  ;;  %v4734_v55 = vpack.c.bf16 %v4732_v50, %v4730_v54 }
 0x750   :  { %v4735_v14 = vpack.c.bf16 %v4733_v52, %v4731_v51 }
 0x752   :  { %4897 = vmatprep.mubr.bf16.mxu1 %v4735_v14 }
 0x753   :  { %4898 = vmatmul.mubr.bf16.vlgmr.msra.gmra.mxu1 %v4734_v55 }
 0x813   :  { %v5574_v15 = vpop.f32.mrf.mxu1 }
 0x815   :  { %v5575_v59 = vpop.f32.mrf.mxu1 }
 0x816   :  { %v5576_v63 = vadd.f32 %v5575_v59, %v5574_v15 }
 0x817   :  { %v5577_v0 = vpop.f32.mrf.mxu1 }
 0x818   :  { %v4900_v1 = vadd.f32 %v5576_v63, %v4768_v56 }
 0x819   :  { %v5578_v53 = vpop.f32.mrf.mxu1 }
 0x81a   :  { %4906 = vst [vmem:[%s7351_s13] sm:$0xff] %v4900_v1  ;;  %v5579_v2 = vadd.f32 %v5578_v53, %v5577_v0 }
 0x81c   :  { %v4903_v58 = vadd.f32 %v5579_v2, %v4768_v56 }
 0x81e   :  { %4907 = vst [vmem:[%s7351_s13 + $0x8] sm:$0xff] %v4903_v58 }
 0x81f   :  { %4912 = vsyncpa [#allocation3], 1 }
 0x820   :  { %4913 = vsyncpa [#allocation5], 1 }
 0x821   :  { %4914 = vsyncpa [#allocation8], 1 }
 0x822   :  { %4915 = vsyncpa [#allocation11], 1 }
 0x823   :  { %4916 = vsyncpa [#allocation14], 1 }

</bundles_post_ra>
